<compile_context>
chip_gen: v7x
topology: tpu7x:2x2x1
jax: 0.10.0
libtpu: 0.0.40
codegen_flags: <defaults>
</compile_context>

<pallas_src>
import functools

import jax
import jax.numpy as jnp
from jax.experimental import pallas as pl
from jax.experimental.pallas import tpu as pltpu

BN_EPS = 1e-5


def _derive_vmem_limit(frac=0.75, fallback=48 * 1024 * 1024):
    """~75% of this generation's VMEM: ~96 MiB on v5e/v6e, ~48 MiB on v7x."""
    try:
        cap = getattr(pltpu.get_tpu_info(), "vmem_capacity_bytes", None)
        if cap:
            return max(32 * 1024 * 1024, min(int(cap * frac), 112 * 1024 * 1024))
    except Exception:
        pass
    return fallback


VMEM_LIMIT = _derive_vmem_limit()


def _f32(x):
    return x.astype(jnp.float32)


# ---------------------------------------------------------------------------
# Fused encoder: both 2-layer MLPs + mu_theta + softmax + RNA library MLP
# (rna_input is streamed into VMEM exactly once and reused for both paths)
# ---------------------------------------------------------------------------
def _encoder_kernel(
        rna_ref, atac_ref, loglr_ref, logla_ref, nc_ref,
        w1r_ref, w1rl_ref, w1rn_ref, b1r_ref, s1r_ref, t1r_ref,
        w2r_ref, b2r_ref, s2r_ref, t2r_ref,
        w1a_ref, w1al_ref, w1an_ref, b1a_ref, s1a_ref, t1a_ref,
        w2a_ref, b2a_ref, s2a_ref, t2a_ref,
        wmur_ref, wmua_ref, bmu_ref,
        lw1_ref, lb1_ref, ls1_ref, lt1_ref,
        lw2_ref, lb2_ref, ls2_ref, lt2_ref,
        lw3r_ref, lb3_ref,
        mu_ref, theta_ref, librna_ref):
    nc = nc_ref[...]
    rna = rna_ref[...]
    atac = atac_ref[...]

    def two_layer(x, loglib, w1, w1l, w1n, b1, s1, t1, w2, b2, s2, t2):
        # Linear over [x | log_lib | num_cells] with the concat folded into
        # split weight rows (avoids materialising the concatenated input).
        h = jnp.dot(x, w1, preferred_element_type=jnp.float32)
        h = h + loglib * w1l + nc * w1n + b1
        h = jnp.maximum(h * s1 + t1, 0.0)          # folded eval BN + ReLU
        q = jnp.dot(h, w2, preferred_element_type=jnp.float32) + b2
        return jnp.maximum(q * s2 + t2, 0.0)       # folded eval BN + ReLU

    qrna = two_layer(rna, loglr_ref[...],
                     _f32(w1r_ref[...]), w1rl_ref[...], w1rn_ref[...],
                     b1r_ref[...], s1r_ref[...], t1r_ref[...],
                     w2r_ref[...], b2r_ref[...], s2r_ref[...], t2r_ref[...])
    qatac = two_layer(atac, logla_ref[...],
                      _f32(w1a_ref[...]), w1al_ref[...], w1an_ref[...],
                      b1a_ref[...], s1a_ref[...], t1a_ref[...],
                      w2a_ref[...], b2a_ref[...], s2a_ref[...], t2a_ref[...])
    # mu_theta over concat([qrna, qatac]) with the concat folded into split W.
    mu = (jnp.dot(qrna, wmur_ref[...], preferred_element_type=jnp.float32)
          + jnp.dot(qatac, wmua_ref[...], preferred_element_type=jnp.float32)
          + bmu_ref[...])
    mu_ref[...] = mu
    z = mu - jnp.max(mu, axis=-1, keepdims=True)
    e = jnp.exp(z)
    theta_ref[...] = e / jnp.sum(e, axis=-1, keepdims=True)   # exact divide

    # Fused RNA library-factor MLP reusing the resident rna tile.
    h = jnp.dot(rna, _f32(lw1_ref[...]),
                preferred_element_type=jnp.float32) + lb1_ref[...]
    h = jnp.maximum(h * ls1_ref[...] + lt1_ref[...], 0.0)
    h = jnp.dot(h, lw2_ref[...], preferred_element_type=jnp.float32) + lb2_ref[...]
    h = jnp.maximum(h * ls2_ref[...] + lt2_ref[...], 0.0)
    # Final Linear(E1, 1) as a VPU multiply + lane reduction (no M x 1 matmul).
    y = jnp.sum(h * lw3r_ref[...], axis=-1, keepdims=True) + lb3_ref[...]
    # numerically stable softplus
    librna_ref[...] = jnp.maximum(y, 0.0) + jnp.log1p(jnp.exp(-jnp.abs(y)))


def encoder_forward(p, rna_input, atac_input, log_lib_rna, log_lib_atac, num_cells):
    # TODO(synk): tile over batch (parallel) and G / P (arbitrary, accumulator)
    # for production shapes; demo shapes fit one VMEM block.
    B = rna_input.shape[0]
    T = p["mu_theta_b"].shape[1]
    mu, theta, librna = pl.pallas_call(
        _encoder_kernel,
        out_shape=(jax.ShapeDtypeStruct((B, T), jnp.float32),
                   jax.ShapeDtypeStruct((B, T), jnp.float32),
                   jax.ShapeDtypeStruct((B, 1), jnp.float32)),
        compiler_params=pltpu.CompilerParams(vmem_limit_bytes=VMEM_LIMIT),
    )(rna_input, atac_input, log_lib_rna, log_lib_atac, num_cells,
      p["enc_rna_w1"], p["enc_rna_w1_lib"], p["enc_rna_w1_nc"],
      p["enc_rna_b1"], *p["enc_rna_bn1"],
      p["enc_rna_w2"], p["enc_rna_b2"], *p["enc_rna_bn2"],
      p["enc_atac_w1"], p["enc_atac_w1_lib"], p["enc_atac_w1_nc"],
      p["enc_atac_b1"], *p["enc_atac_bn1"],
      p["enc_atac_w2"], p["enc_atac_b2"], *p["enc_atac_bn2"],
      p["mu_theta_w_rna"], p["mu_theta_w_atac"], p["mu_theta_b"],
      p["rnalib_w1"], p["rnalib_b1"], *p["rnalib_bn1"],
      p["rnalib_w2"], p["rnalib_b2"], *p["rnalib_bn2"],
      p["rnalib_w3r"], p["rnalib_b3"])
    return theta, mu, librna


# ---------------------------------------------------------------------------
# Fused TF library-factor MLP: linear+BN+ReLU x2 + linear + softplus
# ---------------------------------------------------------------------------
def _library_mlp_kernel(x_ref, w1_ref, b1_ref, s1_ref, t1_ref,
                        w2_ref, b2_ref, s2_ref, t2_ref, w3r_ref, b3_ref, o_ref):
    h = jnp.dot(x_ref[...], _f32(w1_ref[...]),
                preferred_element_type=jnp.float32) + b1_ref[...]
    h = jnp.maximum(h * s1_ref[...] + t1_ref[...], 0.0)
    h = jnp.dot(h, w2_ref[...], preferred_element_type=jnp.float32) + b2_ref[...]
    h = jnp.maximum(h * s2_ref[...] + t2_ref[...], 0.0)
    y = jnp.sum(h * w3r_ref[...], axis=-1, keepdims=True) + b3_ref[...]
    o_ref[...] = jnp.maximum(y, 0.0) + jnp.log1p(jnp.exp(-jnp.abs(y)))


def library_mlp(x, w1, b1, bn1, w2, b2, bn2, w3r, b3):
    return pl.pallas_call(
        _library_mlp_kernel,
        out_shape=jax.ShapeDtypeStruct((x.shape[0], 1), jnp.float32),
        compiler_params=pltpu.CompilerParams(vmem_limit_bytes=VMEM_LIMIT),
    )(x, w1, b1, bn1[0], bn1[1], w2, b2, bn2[0], bn2[1], w3r, b3)


# ---------------------------------------------------------------------------
# Decoder: theta @ decoder + gathered batch_factor row -> eval BN -> softmax
# Batch-factor gather happens IN the BlockSpec via scalar-prefetched batch_ids
# (no (B, N) gather array ever hits HBM).
# ---------------------------------------------------------------------------
def _decoder_softmax_kernel(ids_ref, theta_ref, dec_ref, bf_ref,
                            scale_ref, shift_ref, o_ref):
    del ids_ref                                       # consumed by index_maps
    theta_col = theta_ref[0]                          # (T, 1) topic weights
    dec = _f32(dec_ref[...])                          # (T, N)
    # K = num_topics is tiny: do theta @ dec as a VPU multiply + sublane
    # reduction instead of an M=1 MXU matmul.
    logits = jnp.sum(dec * theta_col, axis=0, keepdims=True)   # (1, N)
    logits = logits + bf_ref[0]                       # gathered batch row
    logits = logits * scale_ref[...] + shift_ref[...] # folded eval BatchNorm1d
    z = logits - jnp.max(logits, axis=-1, keepdims=True)
    e = jnp.exp(z)
    o_ref[0] = e / jnp.sum(e, axis=-1, keepdims=True) # exact divide


def decoder_softmax(theta, decoder, batch_factor, batch_ids, scale, shift):
    # TODO(synk): tile the N axis ("arbitrary") with an online / two-pass
    # softmax and lane-dense output blocks for production N (P~1e5, G~2e4).
    B, T = theta.shape
    N = decoder.shape[1]
    NB = batch_factor.shape[0]
    theta3 = theta.reshape(B, T, 1)
    bf3 = batch_factor.reshape(NB, 1, N)
    out3 = pl.pallas_call(
        _decoder_softmax_kernel,
        out_shape=jax.ShapeDtypeStruct((B, 1, N), jnp.float32),
        grid_spec=pltpu.PrefetchScalarGridSpec(
            num_scalar_prefetch=1,
            grid=(B,),
            in_specs=[
                pl.BlockSpec((1, T, 1), lambda b, ids: (b, 0, 0)),     # theta[b]
                pl.BlockSpec((T, N), lambda b, ids: (0, 0)),           # decoder (resident)
                pl.BlockSpec((1, 1, N), lambda b, ids: (ids[b], 0, 0)),  # batch row gather
                pl.BlockSpec((1, N), lambda b, ids: (0, 0)),           # BN scale
                pl.BlockSpec((1, N), lambda b, ids: (0, 0)),           # BN shift
            ],
            out_specs=pl.BlockSpec((1, 1, N), lambda b, ids: (b, 0, 0)),
        ),
        compiler_params=pltpu.CompilerParams(
            dimension_semantics=("parallel",),
            vmem_limit_bytes=VMEM_LIMIT,
        ),
    )(batch_ids, theta3, decoder, bf3, scale, shift)
    return out3.reshape(B, N)


# ---------------------------------------------------------------------------
# topic -> gene projection.  gene_peak = learnt * fixed is fused in-kernel
# (never materialised in HBM); also emits 1/colsum(gene_peak) for the GRN.
# ---------------------------------------------------------------------------
def _topic_gene_kernel(tpd_ref, gpl_ref, gpf_ref, txg_ref, dpd1_ref, csuminv_ref):
    tpd = _f32(tpd_ref[...])                             # (T, P)
    z = tpd - jnp.max(tpd, axis=1, keepdims=True)
    e = jnp.exp(z)
    dpd1 = e / jnp.sum(e, axis=1, keepdims=True)         # exact softmax
    dpd1_ref[...] = dpd1
    dmin = jnp.min(dpd1, axis=0, keepdims=True)
    dmax = jnp.max(dpd1, axis=0, keepdims=True)
    dpd = (dpd1 - dmin) / (dmax - dmin + 1e-8)           # min-max over topics
    gp = _f32(gpl_ref[...]) * _f32(gpf_ref[...])         # fused (P, G) product
    txg_ref[...] = jnp.dot(dpd, gp, preferred_element_type=jnp.float32)
    csuminv_ref[...] = 1.0 / (jnp.sum(gp, axis=0, keepdims=True) + 1e-7)


def topic_gene(topic_peak_decoder, gp_learnt, gp_fixed):
    # TODO(synk): tile over P ("arbitrary", accumulator) and G for production.
    T, P = topic_peak_decoder.shape
    G = gp_learnt.shape[1]
    return pl.pallas_call(
        _topic_gene_kernel,
        out_shape=(jax.ShapeDtypeStruct((T, G), jnp.float32),
                   jax.ShapeDtypeStruct((T, P), jnp.float32),
                   jax.ShapeDtypeStruct((1, G), jnp.float32)),
        compiler_params=pltpu.CompilerParams(vmem_limit_bytes=VMEM_LIMIT),
    )(topic_peak_decoder, gp_learnt, gp_fixed)


# ---------------------------------------------------------------------------
# GRN kernel: `topics_per_step` topics per grid step.  Activator / repressor
# contractions for all topics in the step are stacked into one
# (2*tps*Tf, P) @ (P, G) MXU dot (M=256 with tps=2, Tf=64 -> fills the
# 256-wide v6e/v7x MXU); gene_peak = learnt * fixed is fused in-kernel.
# ---------------------------------------------------------------------------
def _grn_kernel(dpd_ref, gpl_ref, gpf_ref, at_ref, rt_ref, csuminv_ref,
                actgrn_ref, repgrn_ref, tfe_ref, c_ref, lhs_ref):
    num_tfs = at_ref.shape[0]
    tps = dpd_ref.shape[1]
    gp = _f32(gpl_ref[...]) * _f32(gpf_ref[...])         # fused (P, G) product
    at = _f32(at_ref[...])                               # (Tf, P)
    rt = _f32(rt_ref[...])                               # (Tf, P)
    dpd = dpd_ref[0]                                     # (tps, P)

    for j in range(tps):                                 # static unroll (tps<=2)
        d = dpd[j]                                       # (P,)
        dinv = 1.0 / (d + 1e-20)                         # exact reciprocal
        lhs_ref[pl.ds(2 * j * num_tfs, num_tfs), :] = at * d
        lhs_ref[pl.ds((2 * j + 1) * num_tfs, num_tfs), :] = rt * dinv

    g_both = jnp.dot(lhs_ref[...], gp,
                     preferred_element_type=jnp.float32) * csuminv_ref[...]

    rows = []
    for j in range(tps):
        g_act = g_both[2 * j * num_tfs:(2 * j + 1) * num_tfs, :]       # (Tf, G)
        g_rep = g_both[(2 * j + 1) * num_tfs:(2 * j + 2) * num_tfs, :]  # (Tf, G)
        g_max = jnp.max(jnp.max(g_act, axis=1, keepdims=True), axis=0, keepdims=True)
        g_min = jnp.min(jnp.min(g_rep, axis=1, keepdims=True), axis=0, keepdims=True)
        # NOTE: divide-by-(min+1e-15) matches the reference scDoRI normalisation.
        act_norm = g_act / (g_max + 1e-15)
        rep_norm = g_rep / (g_min + 1e-15)
        w_act = jnp.maximum(_f32(actgrn_ref[j]), 0.0)    # relu(activator GRN)
        w_rep = jnp.maximum(_f32(repgrn_ref[j]), 0.0)    # relu(repressor GRN)
        g_comb = act_norm * w_act - rep_norm * w_rep     # (Tf, G)
        tfe = tfe_ref[j]                                 # (Tf, 1)
        # C row = topic_tf_input[t] @ g_comb via VPU multiply + sublane reduce.
        rows.append(jnp.sum(g_comb * tfe, axis=0, keepdims=True))       # (1, G)
    c_ref[0] = jnp.concatenate(rows, axis=0) if tps > 1 else rows[0]


def grn_topic_gene_C(dpd1, gp_learnt, gp_fixed, a_t, r_t, csum_inv,
                     act_grn, rep_grn, topic_tf_input):
    # TODO(synk): production shapes need a (topic, G-tile, P-tile) grid with a
    # VMEM accumulator, a separate per-topic max/min reduction pass, and
    # single-buffered (pl.Buffered(1)) grid-constant operands.
    T, P = dpd1.shape
    G = gp_learnt.shape[1]
    Tf = a_t.shape[0]
    tps = 2 if T % 2 == 0 else 1       # M = 2*tps*Tf = 256 fills v6e/v7x MXU
    S = T // tps
    dpd3 = dpd1.reshape(S, tps, P)                 # per-step topic groups
    tfe3 = topic_tf_input.reshape(T, Tf, 1)        # per-topic column blocks
    c3 = pl.pallas_call(
        _grn_kernel,
        out_shape=jax.ShapeDtypeStruct((S, tps, G), jnp.float32),
        grid_spec=pltpu.PrefetchScalarGridSpec(
            num_scalar_prefetch=0,
            grid=(S,),
            in_specs=[
                pl.BlockSpec((1, tps, P), lambda s: (s, 0, 0)),    # denoised peaks
                pl.BlockSpec((P, G), lambda s: (0, 0)),            # gene_peak learnt
                pl.BlockSpec((P, G), lambda s: (0, 0)),            # gene_peak fixed
                pl.BlockSpec((Tf, P), lambda s: (0, 0)),           # activator binding^T
                pl.BlockSpec((Tf, P), lambda s: (0, 0)),           # repressor binding^T
                pl.BlockSpec((1, G), lambda s: (0, 0)),            # 1/(colsum + eps)
                pl.BlockSpec((tps, Tf, G), lambda s: (s, 0, 0)),   # activator GRN
                pl.BlockSpec((tps, Tf, G), lambda s: (s, 0, 0)),   # repressor GRN
                pl.BlockSpec((tps, Tf, 1), lambda s: (s, 0, 0)),   # topic_tf_input
            ],
            out_specs=pl.BlockSpec((1, tps, G), lambda s: (s, 0, 0)),
            scratch_shapes=[pltpu.VMEM((2 * tps * Tf, P), jnp.float32)],
        ),
        compiler_params=pltpu.CompilerParams(
            dimension_semantics=("parallel",),     # topic groups are independent
            vmem_limit_bytes=VMEM_LIMIT,
        ),
    )(dpd3, gp_learnt, gp_fixed, a_t, r_t, csum_inv, act_grn, rep_grn, tfe3)
    return c3.reshape(T, G)


# ---------------------------------------------------------------------------
# Parameter initialization (deterministic, synthetic)
# ---------------------------------------------------------------------------
def init_params(key, cfg):
    G, P, Tf = cfg["num_genes"], cfg["num_peaks"], cfg["num_tfs"]
    T, NB = cfg["num_topics"], cfg["num_batches"]
    E1, E2 = cfg["dim_encoder1"], cfg["dim_encoder2"]
    keys = iter(jax.random.split(key, 64))

    def u(shape, lo=0.0, hi=1.0):
        return jax.random.uniform(next(keys), shape, jnp.float32, lo, hi)

    def linear(din, dout):               # nn.Linear-style init, weight stored (din, dout)
        bound = 1.0 / (din ** 0.5)
        return u((din, dout), -bound, bound), u((1, dout), -bound, bound)

    def bn(dim):                         # eval-mode BN folded: gamma=1, beta=0, rm=0, rv=1
        # TODO(synk): recompute the folded (scale, shift) from real running
        # stats when loading a trained checkpoint.
        scale = jnp.full((1, dim), 1.0 / (1.0 + BN_EPS) ** 0.5, jnp.float32)
        shift = jnp.zeros((1, dim), jnp.float32)
        return scale, shift

    bf16 = jnp.bfloat16
    p = {}
    # encoder RNA: Linear(G+2, E1) split into [gene rows | log_lib row | num_cells row]
    w1, b1 = linear(G + 2, E1)
    p["enc_rna_w1"] = w1[:G].astype(bf16)                 # big streamed operand
    p["enc_rna_w1_lib"], p["enc_rna_w1_nc"] = w1[G:G + 1], w1[G + 1:G + 2]
    p["enc_rna_b1"] = b1
    p["enc_rna_bn1"] = bn(E1)
    p["enc_rna_w2"], p["enc_rna_b2"] = linear(E1, E2)
    p["enc_rna_bn2"] = bn(E2)
    # encoder ATAC
    w1, b1 = linear(P + 2, E1)
    p["enc_atac_w1"] = w1[:P].astype(bf16)                # big streamed operand
    p["enc_atac_w1_lib"], p["enc_atac_w1_nc"] = w1[P:P + 1], w1[P + 1:P + 2]
    p["enc_atac_b1"] = b1
    p["enc_atac_bn1"] = bn(E1)
    p["enc_atac_w2"], p["enc_atac_b2"] = linear(E1, E2)
    p["enc_atac_bn2"] = bn(E2)
    # mu_theta: Linear(2*E2, T) split for [qrna | qatac]
    wmu, bmu = linear(2 * E2, T)
    p["mu_theta_w_rna"], p["mu_theta_w_atac"], p["mu_theta_b"] = wmu[:E2], wmu[E2:], bmu

    p["topic_peak_decoder"] = u((T, P)).astype(bf16)
    p["atac_batch_factor"] = u((NB, P));  p["atac_bn"] = bn(P)
    # gene-peak factors stored pre-transposed as (P, G), bf16 in HBM
    p["gene_peak_factor_learnt"] = u((P, G)).astype(bf16)
    p["gene_peak_factor_fixed"] = jnp.ones((P, G), bf16)
    p["rna_batch_factor"] = u((NB, G));   p["rna_bn"] = bn(G)
    p["topic_tf_decoder"] = u((T, Tf))
    p["tf_batch_factor"] = u((NB, Tf));   p["tf_bn"] = bn(Tf)

    p["tflib_w1"], p["tflib_b1"] = linear(Tf, E2);  p["tflib_bn1"] = bn(E2)
    p["tflib_w2"], p["tflib_b2"] = linear(E2, E1);  p["tflib_bn2"] = bn(E1)
    w3, b3 = linear(E1, 1)
    p["tflib_w3r"], p["tflib_b3"] = w3.T, b3        # (1, E1), (1, 1)

    w1, b1 = linear(G, E2)
    p["rnalib_w1"], p["rnalib_b1"] = w1.astype(bf16), b1;  p["rnalib_bn1"] = bn(E2)
    p["rnalib_w2"], p["rnalib_b2"] = linear(E2, E1);       p["rnalib_bn2"] = bn(E1)
    w3, b3 = linear(E1, 1)
    p["rnalib_w3r"], p["rnalib_b3"] = w3.T, b3

    # TF-peak binding matrices stored pre-transposed as (Tf, P), bf16
    p["tf_binding_matrix_activator_T"] = u((Tf, P)).astype(bf16)
    p["tf_binding_matrix_repressor_T"] = u((Tf, P)).astype(bf16)
    p["tf_gene_topic_activator_grn"] = u((T, Tf, G)).astype(bf16)
    p["tf_gene_topic_repressor_grn"] = u((T, Tf, G)).astype(bf16)
    p["rna_grn_batch_factor"] = u((NB, G)); p["rna_grn_bn"] = bn(G)
    # TODO(synk): rna_alpha_nb / tf_alpha_nb are declared in __init__ but never
    # used in forward(); they are intentionally omitted here.
    return p


# ---------------------------------------------------------------------------
# Forward pass (thin glue in JAX, compute in Pallas kernels)
# ---------------------------------------------------------------------------
def scdori_forward(params, rna_input, atac_input, tf_input, topic_tf_input,
                   log_lib_rna, log_lib_atac, num_cells, batch_onehot,
                   phase="warmup_1"):
    p = params
    # -------- fused encoder (+ fused RNA library-factor MLP) --------
    theta, mu_theta, library_factor_rna = encoder_forward(
        p, rna_input, atac_input, log_lib_rna, log_lib_atac, num_cells)

    # batch_onehot @ factor == factor[batch_id] for one-hot rows; the row
    # gather itself happens inside the decoder kernels via scalar prefetch.
    batch_ids = jnp.argmax(batch_onehot, axis=1).astype(jnp.int32)

    # -------- ATAC / TF decoders --------
    preds_atac = decoder_softmax(theta, p["topic_peak_decoder"],
                                 p["atac_batch_factor"], batch_ids, *p["atac_bn"])
    preds_tf = decoder_softmax(theta, p["topic_tf_decoder"],
                               p["tf_batch_factor"], batch_ids, *p["tf_bn"])

    # -------- TF library factor MLP (fused) --------
    library_factor_tf = library_mlp(tf_input,
                                    p["tflib_w1"], p["tflib_b1"], p["tflib_bn1"],
                                    p["tflib_w2"], p["tflib_b2"], p["tflib_bn2"],
                                    p["tflib_w3r"], p["tflib_b3"])
    mu_nb_tf = preds_tf * library_factor_tf

    # -------- RNA decoder via gene-peak links --------
    topicxgene, topic_peak_denoised1, csum_inv = topic_gene(
        p["topic_peak_decoder"],
        p["gene_peak_factor_learnt"], p["gene_peak_factor_fixed"])
    preds_rna = decoder_softmax(theta, topicxgene,
                                p["rna_batch_factor"], batch_ids, *p["rna_bn"])
    mu_nb_rna = preds_rna * library_factor_rna

    # -------- GRN-based RNA reconstruction --------
    if phase == "grn":
        C = grn_topic_gene_C(topic_peak_denoised1,
                             p["gene_peak_factor_learnt"],
                             p["gene_peak_factor_fixed"],
                             p["tf_binding_matrix_activator_T"],
                             p["tf_binding_matrix_repressor_T"],
                             csum_inv,
                             p["tf_gene_topic_activator_grn"],
                             p["tf_gene_topic_repressor_grn"],
                             topic_tf_input)
        preds_rna_from_grn = decoder_softmax(theta, C, p["rna_grn_batch_factor"],
                                             batch_ids, *p["rna_grn_bn"])
    else:
        preds_rna_from_grn = jnp.zeros_like(preds_rna)
    mu_nb_rna_grn = preds_rna_from_grn * library_factor_rna

    return {
        "theta": theta, "mu_theta": mu_theta,
        "preds_atac": preds_atac,
        "preds_tf": preds_tf, "mu_nb_tf": mu_nb_tf,
        "preds_rna": preds_rna, "mu_nb_rna": mu_nb_rna,
        "preds_rna_from_grn": preds_rna_from_grn, "mu_nb_rna_grn": mu_nb_rna_grn,
        "library_factor_tf": library_factor_tf,
        "library_factor_rna": library_factor_rna,
    }


if __name__ == "__main__":
    cfg = dict(num_genes=128, num_peaks=256, num_tfs=64, num_topics=8,
               num_batches=8, dim_encoder1=128, dim_encoder2=64)
    B = 8
    key = jax.random.PRNGKey(0)
    pkey, dkey = jax.random.split(key)
    params = init_params(pkey, cfg)

    dks = jax.random.split(dkey, 8)
    rna_input = jax.random.uniform(dks[0], (B, cfg["num_genes"]), jnp.float32, 0.0, 5.0)
    atac_input = jax.random.uniform(dks[1], (B, cfg["num_peaks"]), jnp.float32, 0.0, 2.0)
    tf_input = jax.random.uniform(dks[2], (B, cfg["num_tfs"]), jnp.float32, 0.0, 3.0)
    topic_tf_input = jax.random.uniform(dks[3], (cfg["num_topics"], cfg["num_tfs"]),
                                        jnp.float32)
    log_lib_rna = jnp.log(jnp.sum(rna_input, axis=1, keepdims=True) + 1.0)
    log_lib_atac = jnp.log(jnp.sum(atac_input, axis=1, keepdims=True) + 1.0)
    num_cells = jnp.ones((B, 1), jnp.float32)
    batch_ids = jax.random.randint(dks[4], (B,), 0, cfg["num_batches"])
    batch_onehot = jax.nn.one_hot(batch_ids, cfg["num_batches"], dtype=jnp.float32)

    fwd = jax.jit(functools.partial(scdori_forward, phase="grn"))
    out = fwd(params, rna_input, atac_input, tf_input, topic_tf_input,
              log_lib_rna, log_lib_atac, num_cells, batch_onehot)
    out = jax.block_until_ready(out)

    assert out["theta"].shape == (B, cfg["num_topics"])
    assert out["mu_theta"].shape == (B, cfg["num_topics"])
    assert out["preds_atac"].shape == (B, cfg["num_peaks"])
    assert out["preds_tf"].shape == (B, cfg["num_tfs"])
    assert out["preds_rna"].shape == (B, cfg["num_genes"])
    assert out["preds_rna_from_grn"].shape == (B, cfg["num_genes"])
    assert out["library_factor_rna"].shape == (B, 1)
    assert out["library_factor_tf"].shape == (B, 1)
    # softmax outputs must be proper distributions (exact-division softmax)
    assert bool(jnp.allclose(jnp.sum(out["theta"], axis=-1), 1.0, atol=1e-4))
    assert bool(jnp.allclose(jnp.sum(out["preds_rna"], axis=-1), 1.0, atol=1e-4))
    assert bool(jnp.allclose(jnp.sum(out["preds_atac"], axis=-1), 1.0, atol=1e-4))
    assert bool(jnp.all(jnp.isfinite(out["preds_rna_from_grn"])))
    assert bool(jnp.all(jnp.isfinite(out["mu_nb_rna"])))
    assert bool(jnp.all(jnp.isfinite(out["mu_nb_tf"])))
    print("KERNEL_OK")
</pallas_src>

<mosaic_0001>
module attributes {stable_mosaic.version = 11 : i64} {
  func.func @_encoder_kernel(%arg0: memref<8x128xf32, #tpu.memory_space<vmem>>, %arg1: memref<8x256xf32, #tpu.memory_space<vmem>>, %arg2: memref<8x1xf32, #tpu.memory_space<vmem>>, %arg3: memref<8x1xf32, #tpu.memory_space<vmem>>, %arg4: memref<8x1xf32, #tpu.memory_space<vmem>>, %arg5: memref<128x128xbf16, #tpu.memory_space<vmem>>, %arg6: memref<1x128xf32, #tpu.memory_space<vmem>>, %arg7: memref<1x128xf32, #tpu.memory_space<vmem>>, %arg8: memref<1x128xf32, #tpu.memory_space<vmem>>, %arg9: memref<1x128xf32, #tpu.memory_space<vmem>>, %arg10: memref<1x128xf32, #tpu.memory_space<vmem>>, %arg11: memref<128x64xf32, #tpu.memory_space<vmem>>, %arg12: memref<1x64xf32, #tpu.memory_space<vmem>>, %arg13: memref<1x64xf32, #tpu.memory_space<vmem>>, %arg14: memref<1x64xf32, #tpu.memory_space<vmem>>, %arg15: memref<256x128xbf16, #tpu.memory_space<vmem>>, %arg16: memref<1x128xf32, #tpu.memory_space<vmem>>, %arg17: memref<1x128xf32, #tpu.memory_space<vmem>>, %arg18: memref<1x128xf32, #tpu.memory_space<vmem>>, %arg19: memref<1x128xf32, #tpu.memory_space<vmem>>, %arg20: memref<1x128xf32, #tpu.memory_space<vmem>>, %arg21: memref<128x64xf32, #tpu.memory_space<vmem>>, %arg22: memref<1x64xf32, #tpu.memory_space<vmem>>, %arg23: memref<1x64xf32, #tpu.memory_space<vmem>>, %arg24: memref<1x64xf32, #tpu.memory_space<vmem>>, %arg25: memref<64x8xf32, #tpu.memory_space<vmem>>, %arg26: memref<64x8xf32, #tpu.memory_space<vmem>>, %arg27: memref<1x8xf32, #tpu.memory_space<vmem>>, %arg28: memref<128x64xbf16, #tpu.memory_space<vmem>>, %arg29: memref<1x64xf32, #tpu.memory_space<vmem>>, %arg30: memref<1x64xf32, #tpu.memory_space<vmem>>, %arg31: memref<1x64xf32, #tpu.memory_space<vmem>>, %arg32: memref<64x128xf32, #tpu.memory_space<vmem>>, %arg33: memref<1x128xf32, #tpu.memory_space<vmem>>, %arg34: memref<1x128xf32, #tpu.memory_space<vmem>>, %arg35: memref<1x128xf32, #tpu.memory_space<vmem>>, %arg36: memref<1x128xf32, #tpu.memory_space<vmem>>, %arg37: memref<1x1xf32, #tpu.memory_space<vmem>>, %arg38: memref<8x8xf32, #tpu.memory_space<vmem>>, %arg39: memref<8x8xf32, #tpu.memory_space<vmem>>, %arg40: memref<8x1xf32, #tpu.memory_space<vmem>>) attributes {dimension_semantics = [], scalar_prefetch = 0 : i64, scratch_operands = 0 : i64, tpu.core_type = #tpu.core_type<tc>} {
    %c0 = arith.constant 0 : index
    %c0_0 = arith.constant 0 : index
    %0 = vector.load %arg4[%c0, %c0_0] : memref<8x1xf32, #tpu.memory_space<vmem>>, vector<8x1xf32>
    %c0_1 = arith.constant 0 : index
    %c0_2 = arith.constant 0 : index
    %1 = vector.load %arg0[%c0_1, %c0_2] : memref<8x128xf32, #tpu.memory_space<vmem>>, vector<8x128xf32>
    %c0_3 = arith.constant 0 : index
    %c0_4 = arith.constant 0 : index
    %2 = vector.load %arg1[%c0_3, %c0_4] : memref<8x256xf32, #tpu.memory_space<vmem>>, vector<8x256xf32>
    %c0_5 = arith.constant 0 : index
    %c0_6 = arith.constant 0 : index
    %3 = vector.load %arg2[%c0_5, %c0_6] : memref<8x1xf32, #tpu.memory_space<vmem>>, vector<8x1xf32>
    %c0_7 = arith.constant 0 : index
    %c0_8 = arith.constant 0 : index
    %4 = vector.load %arg5[%c0_7, %c0_8] : memref<128x128xbf16, #tpu.memory_space<vmem>>, vector<128x128xbf16>
    %5 = arith.extf %4 : vector<128x128xbf16> to vector<128x128xf32>
    %c0_9 = arith.constant 0 : index
    %c0_10 = arith.constant 0 : index
    %6 = vector.load %arg6[%c0_9, %c0_10] : memref<1x128xf32, #tpu.memory_space<vmem>>, vector<1x128xf32>
    %c0_11 = arith.constant 0 : index
    %c0_12 = arith.constant 0 : index
    %7 = vector.load %arg7[%c0_11, %c0_12] : memref<1x128xf32, #tpu.memory_space<vmem>>, vector<1x128xf32>
    %c0_13 = arith.constant 0 : index
    %c0_14 = arith.constant 0 : index
    %8 = vector.load %arg8[%c0_13, %c0_14] : memref<1x128xf32, #tpu.memory_space<vmem>>, vector<1x128xf32>
    %c0_15 = arith.constant 0 : index
    %c0_16 = arith.constant 0 : index
    %9 = vector.load %arg9[%c0_15, %c0_16] : memref<1x128xf32, #tpu.memory_space<vmem>>, vector<1x128xf32>
    %c0_17 = arith.constant 0 : index
    %c0_18 = arith.constant 0 : index
    %10 = vector.load %arg10[%c0_17, %c0_18] : memref<1x128xf32, #tpu.memory_space<vmem>>, vector<1x128xf32>
    %c0_19 = arith.constant 0 : index
    %c0_20 = arith.constant 0 : index
    %11 = vector.load %arg11[%c0_19, %c0_20] : memref<128x64xf32, #tpu.memory_space<vmem>>, vector<128x64xf32>
    %c0_21 = arith.constant 0 : index
    %c0_22 = arith.constant 0 : index
    %12 = vector.load %arg12[%c0_21, %c0_22] : memref<1x64xf32, #tpu.memory_space<vmem>>, vector<1x64xf32>
    %c0_23 = arith.constant 0 : index
    %c0_24 = arith.constant 0 : index
    %13 = vector.load %arg13[%c0_23, %c0_24] : memref<1x64xf32, #tpu.memory_space<vmem>>, vector<1x64xf32>
    %c0_25 = arith.constant 0 : index
    %c0_26 = arith.constant 0 : index
    %14 = vector.load %arg14[%c0_25, %c0_26] : memref<1x64xf32, #tpu.memory_space<vmem>>, vector<1x64xf32>
    %cst = arith.constant dense<0.000000e+00> : vector<8x128xf32>
    %15 = tpu.matmul %1, %5, %cst {dimension_numbers = #tpu.dot_dimension_numbers<[1], [0], [0], [1], [0, 0, 1, 1], [], []>} : vector<8x128xf32>, vector<128x128xf32>, vector<8x128xf32> -> vector<8x128xf32>
    %16 = vector.broadcast %3 : vector<8x1xf32> to vector<8x128xf32>
    %17 = vector.broadcast %6 : vector<1x128xf32> to vector<8x128xf32>
    %18 = arith.mulf %16, %17 : vector<8x128xf32>
    %19 = arith.addf %15, %18 : vector<8x128xf32>
    %20 = vector.broadcast %0 : vector<8x1xf32> to vector<8x128xf32>
    %21 = vector.broadcast %7 : vector<1x128xf32> to vector<8x128xf32>
    %22 = arith.mulf %20, %21 : vector<8x128xf32>
    %23 = arith.addf %19, %22 : vector<8x128xf32>
    %24 = vector.broadcast %8 : vector<1x128xf32> to vector<8x128xf32>
    %25 = arith.addf %23, %24 : vector<8x128xf32>
    %26 = vector.broadcast %9 : vector<1x128xf32> to vector<8x128xf32>
    %27 = arith.mulf %25, %26 : vector<8x128xf32>
    %28 = vector.broadcast %10 : vector<1x128xf32> to vector<8x128xf32>
    %29 = arith.addf %27, %28 : vector<8x128xf32>
    %cst_27 = arith.constant 0.000000e+00 : f32
    %30 = vector.broadcast %cst_27 : f32 to vector<8x128xf32>
    %31 = arith.maximumf %29, %30 : vector<8x128xf32>
    %cst_28 = arith.constant dense<0.000000e+00> : vector<8x64xf32>
    %32 = tpu.matmul %31, %11, %cst_28 {dimension_numbers = #tpu.dot_dimension_numbers<[1], [0], [0], [1], [0, 0, 1, 1], [], []>} : vector<8x128xf32>, vector<128x64xf32>, vector<8x64xf32> -> vector<8x64xf32>
    %33 = vector.broadcast %12 : vector<1x64xf32> to vector<8x64xf32>
    %34 = arith.addf %32, %33 : vector<8x64xf32>
    %35 = vector.broadcast %13 : vector<1x64xf32> to vector<8x64xf32>
    %36 = arith.mulf %34, %35 : vector<8x64xf32>
    %37 = vector.broadcast %14 : vector<1x64xf32> to vector<8x64xf32>
    %38 = arith.addf %36, %37 : vector<8x64xf32>
    %cst_29 = arith.constant 0.000000e+00 : f32
    %39 = vector.broadcast %cst_29 : f32 to vector<8x64xf32>
    %40 = arith.maximumf %38, %39 : vector<8x64xf32>
    %c0_30 = arith.constant 0 : index
    %c0_31 = arith.constant 0 : index
    %41 = vector.load %arg3[%c0_30, %c0_31] : memref<8x1xf32, #tpu.memory_space<vmem>>, vector<8x1xf32>
    %c0_32 = arith.constant 0 : index
    %c0_33 = arith.constant 0 : index
    %42 = vector.load %arg15[%c0_32, %c0_33] : memref<256x128xbf16, #tpu.memory_space<vmem>>, vector<256x128xbf16>
    %43 = arith.extf %42 : vector<256x128xbf16> to vector<256x128xf32>
    %c0_34 = arith.constant 0 : index
    %c0_35 = arith.constant 0 : index
    %44 = vector.load %arg16[%c0_34, %c0_35] : memref<1x128xf32, #tpu.memory_space<vmem>>, vector<1x128xf32>
    %c0_36 = arith.constant 0 : index
    %c0_37 = arith.constant 0 : index
    %45 = vector.load %arg17[%c0_36, %c0_37] : memref<1x128xf32, #tpu.memory_space<vmem>>, vector<1x128xf32>
    %c0_38 = arith.constant 0 : index
    %c0_39 = arith.constant 0 : index
    %46 = vector.load %arg18[%c0_38, %c0_39] : memref<1x128xf32, #tpu.memory_space<vmem>>, vector<1x128xf32>
    %c0_40 = arith.constant 0 : index
    %c0_41 = arith.constant 0 : index
    %47 = vector.load %arg19[%c0_40, %c0_41] : memref<1x128xf32, #tpu.memory_space<vmem>>, vector<1x128xf32>
    %c0_42 = arith.constant 0 : index
    %c0_43 = arith.constant 0 : index
    %48 = vector.load %arg20[%c0_42, %c0_43] : memref<1x128xf32, #tpu.memory_space<vmem>>, vector<1x128xf32>
    %c0_44 = arith.constant 0 : index
    %c0_45 = arith.constant 0 : index
    %49 = vector.load %arg21[%c0_44, %c0_45] : memref<128x64xf32, #tpu.memory_space<vmem>>, vector<128x64xf32>
    %c0_46 = arith.constant 0 : index
    %c0_47 = arith.constant 0 : index
    %50 = vector.load %arg22[%c0_46, %c0_47] : memref<1x64xf32, #tpu.memory_space<vmem>>, vector<1x64xf32>
    %c0_48 = arith.constant 0 : index
    %c0_49 = arith.constant 0 : index
    %51 = vector.load %arg23[%c0_48, %c0_49] : memref<1x64xf32, #tpu.memory_space<vmem>>, vector<1x64xf32>
    %c0_50 = arith.constant 0 : index
    %c0_51 = arith.constant 0 : index
    %52 = vector.load %arg24[%c0_50, %c0_51] : memref<1x64xf32, #tpu.memory_space<vmem>>, vector<1x64xf32>
    %cst_52 = arith.constant dense<0.000000e+00> : vector<8x128xf32>
    %53 = tpu.matmul %2, %43, %cst_52 {dimension_numbers = #tpu.dot_dimension_numbers<[1], [0], [0], [1], [0, 0, 1, 1], [], []>} : vector<8x256xf32>, vector<256x128xf32>, vector<8x128xf32> -> vector<8x128xf32>
    %54 = vector.broadcast %41 : vector<8x1xf32> to vector<8x128xf32>
    %55 = vector.broadcast %44 : vector<1x128xf32> to vector<8x128xf32>
    %56 = arith.mulf %54, %55 : vector<8x128xf32>
    %57 = arith.addf %53, %56 : vector<8x128xf32>
    %58 = vector.broadcast %0 : vector<8x1xf32> to vector<8x128xf32>
    %59 = vector.broadcast %45 : vector<1x128xf32> to vector<8x128xf32>
    %60 = arith.mulf %58, %59 : vector<8x128xf32>
    %61 = arith.addf %57, %60 : vector<8x128xf32>
    %62 = vector.broadcast %46 : vector<1x128xf32> to vector<8x128xf32>
    %63 = arith.addf %61, %62 : vector<8x128xf32>
    %64 = vector.broadcast %47 : vector<1x128xf32> to vector<8x128xf32>
    %65 = arith.mulf %63, %64 : vector<8x128xf32>
    %66 = vector.broadcast %48 : vector<1x128xf32> to vector<8x128xf32>
    %67 = arith.addf %65, %66 : vector<8x128xf32>
    %cst_53 = arith.constant 0.000000e+00 : f32
    %68 = vector.broadcast %cst_53 : f32 to vector<8x128xf32>
    %69 = arith.maximumf %67, %68 : vector<8x128xf32>
    %cst_54 = arith.constant dense<0.000000e+00> : vector<8x64xf32>
    %70 = tpu.matmul %69, %49, %cst_54 {dimension_numbers = #tpu.dot_dimension_numbers<[1], [0], [0], [1], [0, 0, 1, 1], [], []>} : vector<8x128xf32>, vector<128x64xf32>, vector<8x64xf32> -> vector<8x64xf32>
    %71 = vector.broadcast %50 : vector<1x64xf32> to vector<8x64xf32>
    %72 = arith.addf %70, %71 : vector<8x64xf32>
    %73 = vector.broadcast %51 : vector<1x64xf32> to vector<8x64xf32>
    %74 = arith.mulf %72, %73 : vector<8x64xf32>
    %75 = vector.broadcast %52 : vector<1x64xf32> to vector<8x64xf32>
    %76 = arith.addf %74, %75 : vector<8x64xf32>
    %cst_55 = arith.constant 0.000000e+00 : f32
    %77 = vector.broadcast %cst_55 : f32 to vector<8x64xf32>
    %78 = arith.maximumf %76, %77 : vector<8x64xf32>
    %c0_56 = arith.constant 0 : index
    %c0_57 = arith.constant 0 : index
    %79 = vector.load %arg25[%c0_56, %c0_57] : memref<64x8xf32, #tpu.memory_space<vmem>>, vector<64x8xf32>
    %cst_58 = arith.constant dense<0.000000e+00> : vector<8x8xf32>
    %80 = tpu.matmul %40, %79, %cst_58 {dimension_numbers = #tpu.dot_dimension_numbers<[1], [0], [0], [1], [0, 0, 1, 1], [], []>} : vector<8x64xf32>, vector<64x8xf32>, vector<8x8xf32> -> vector<8x8xf32>
    %c0_59 = arith.constant 0 : index
    %c0_60 = arith.constant 0 : index
    %81 = vector.load %arg26[%c0_59, %c0_60] : memref<64x8xf32, #tpu.memory_space<vmem>>, vector<64x8xf32>
    %cst_61 = arith.constant dense<0.000000e+00> : vector<8x8xf32>
    %82 = tpu.matmul %78, %81, %cst_61 {dimension_numbers = #tpu.dot_dimension_numbers<[1], [0], [0], [1], [0, 0, 1, 1], [], []>} : vector<8x64xf32>, vector<64x8xf32>, vector<8x8xf32> -> vector<8x8xf32>
    %83 = arith.addf %80, %82 : vector<8x8xf32>
    %c0_62 = arith.constant 0 : index
    %c0_63 = arith.constant 0 : index
    %84 = vector.load %arg27[%c0_62, %c0_63] : memref<1x8xf32, #tpu.memory_space<vmem>>, vector<1x8xf32>
    %85 = vector.broadcast %84 : vector<1x8xf32> to vector<8x8xf32>
    %86 = arith.addf %83, %85 : vector<8x8xf32>
    %c0_64 = arith.constant 0 : index
    %c0_65 = arith.constant 0 : index
    %87 = vector.load %arg38[%c0_64, %c0_65] : memref<8x8xf32, #tpu.memory_space<vmem>>, vector<8x8xf32>
    tpu.vector_store %arg38[%c0_64, %c0_65], %86 {strides = array<i32>} : memref<8x8xf32, #tpu.memory_space<vmem>>, vector<8x8xf32>,
    %cst_66 = arith.constant dense<0xFF800000> : vector<8xf32>
    %88 = vector.multi_reduction <maximumf>, %86, %cst_66 [1] : vector<8x8xf32> to vector<8xf32>
    %89 = vector.shape_cast %88 : vector<8xf32> to vector<8x1xf32>
    %90 = vector.broadcast %89 : vector<8x1xf32> to vector<8x8xf32>
    %91 = arith.subf %86, %90 : vector<8x8xf32>
    %92 = math.exp %91 : vector<8x8xf32>
    %cst_67 = arith.constant dense<0.000000e+00> : vector<8xf32>
    %93 = vector.multi_reduction <add>, %92, %cst_67 [1] : vector<8x8xf32> to vector<8xf32>
    %94 = vector.shape_cast %93 : vector<8xf32> to vector<8x1xf32>
    %95 = vector.broadcast %94 : vector<8x1xf32> to vector<8x8xf32>
    %96 = arith.divf %92, %95 : vector<8x8xf32>
    %c0_68 = arith.constant 0 : index
    %c0_69 = arith.constant 0 : index
    %97 = vector.load %arg39[%c0_68, %c0_69] : memref<8x8xf32, #tpu.memory_space<vmem>>, vector<8x8xf32>
    tpu.vector_store %arg39[%c0_68, %c0_69], %96 {strides = array<i32>} : memref<8x8xf32, #tpu.memory_space<vmem>>, vector<8x8xf32>,
    %c0_70 = arith.constant 0 : index
    %c0_71 = arith.constant 0 : index
    %98 = vector.load %arg28[%c0_70, %c0_71] : memref<128x64xbf16, #tpu.memory_space<vmem>>, vector<128x64xbf16>
    %99 = arith.extf %98 : vector<128x64xbf16> to vector<128x64xf32>
    %cst_72 = arith.constant dense<0.000000e+00> : vector<8x64xf32>
    %100 = tpu.matmul %1, %99, %cst_72 {dimension_numbers = #tpu.dot_dimension_numbers<[1], [0], [0], [1], [0, 0, 1, 1], [], []>} : vector<8x128xf32>, vector<128x64xf32>, vector<8x64xf32> -> vector<8x64xf32>
    %c0_73 = arith.constant 0 : index
    %c0_74 = arith.constant 0 : index
    %101 = vector.load %arg29[%c0_73, %c0_74] : memref<1x64xf32, #tpu.memory_space<vmem>>, vector<1x64xf32>
    %102 = vector.broadcast %101 : vector<1x64xf32> to vector<8x64xf32>
    %103 = arith.addf %100, %102 : vector<8x64xf32>
    %c0_75 = arith.constant 0 : index
    %c0_76 = arith.constant 0 : index
    %104 = vector.load %arg30[%c0_75, %c0_76] : memref<1x64xf32, #tpu.memory_space<vmem>>, vector<1x64xf32>
    %105 = vector.broadcast %104 : vector<1x64xf32> to vector<8x64xf32>
    %106 = arith.mulf %103, %105 : vector<8x64xf32>
    %c0_77 = arith.constant 0 : index
    %c0_78 = arith.constant 0 : index
    %107 = vector.load %arg31[%c0_77, %c0_78] : memref<1x64xf32, #tpu.memory_space<vmem>>, vector<1x64xf32>
    %108 = vector.broadcast %107 : vector<1x64xf32> to vector<8x64xf32>
    %109 = arith.addf %106, %108 : vector<8x64xf32>
    %cst_79 = arith.constant 0.000000e+00 : f32
    %110 = vector.broadcast %cst_79 : f32 to vector<8x64xf32>
    %111 = arith.maximumf %109, %110 : vector<8x64xf32>
    %c0_80 = arith.constant 0 : index
    %c0_81 = arith.constant 0 : index
    %112 = vector.load %arg32[%c0_80, %c0_81] : memref<64x128xf32, #tpu.memory_space<vmem>>, vector<64x128xf32>
    %cst_82 = arith.constant dense<0.000000e+00> : vector<8x128xf32>
    %113 = tpu.matmul %111, %112, %cst_82 {dimension_numbers = #tpu.dot_dimension_numbers<[1], [0], [0], [1], [0, 0, 1, 1], [], []>} : vector<8x64xf32>, vector<64x128xf32>, vector<8x128xf32> -> vector<8x128xf32>
    %c0_83 = arith.constant 0 : index
    %c0_84 = arith.constant 0 : index
    %114 = vector.load %arg33[%c0_83, %c0_84] : memref<1x128xf32, #tpu.memory_space<vmem>>, vector<1x128xf32>
    %115 = vector.broadcast %114 : vector<1x128xf32> to vector<8x128xf32>
    %116 = arith.addf %113, %115 : vector<8x128xf32>
    %c0_85 = arith.constant 0 : index
    %c0_86 = arith.constant 0 : index
    %117 = vector.load %arg34[%c0_85, %c0_86] : memref<1x128xf32, #tpu.memory_space<vmem>>, vector<1x128xf32>
    %118 = vector.broadcast %117 : vector<1x128xf32> to vector<8x128xf32>
    %119 = arith.mulf %116, %118 : vector<8x128xf32>
    %c0_87 = arith.constant 0 : index
    %c0_88 = arith.constant 0 : index
    %120 = vector.load %arg35[%c0_87, %c0_88] : memref<1x128xf32, #tpu.memory_space<vmem>>, vector<1x128xf32>
    %121 = vector.broadcast %120 : vector<1x128xf32> to vector<8x128xf32>
    %122 = arith.addf %119, %121 : vector<8x128xf32>
    %cst_89 = arith.constant 0.000000e+00 : f32
    %123 = vector.broadcast %cst_89 : f32 to vector<8x128xf32>
    %124 = arith.maximumf %122, %123 : vector<8x128xf32>
    %c0_90 = arith.constant 0 : index
    %c0_91 = arith.constant 0 : index
    %125 = vector.load %arg36[%c0_90, %c0_91] : memref<1x128xf32, #tpu.memory_space<vmem>>, vector<1x128xf32>
    %126 = vector.broadcast %125 : vector<1x128xf32> to vector<8x128xf32>
    %127 = arith.mulf %124, %126 : vector<8x128xf32>
    %cst_92 = arith.constant dense<0.000000e+00> : vector<8xf32>
    %128 = vector.multi_reduction <add>, %127, %cst_92 [1] : vector<8x128xf32> to vector<8xf32>
    %129 = vector.shape_cast %128 : vector<8xf32> to vector<8x1xf32>
    %c0_93 = arith.constant 0 : index
    %c0_94 = arith.constant 0 : index
    %130 = vector.load %arg37[%c0_93, %c0_94] : memref<1x1xf32, #tpu.memory_space<vmem>>, vector<1x1xf32>
    %131 = vector.broadcast %130 : vector<1x1xf32> to vector<8x1xf32>
    %132 = arith.addf %129, %131 : vector<8x1xf32>
    %cst_95 = arith.constant 0.000000e+00 : f32
    %133 = vector.broadcast %cst_95 : f32 to vector<8x1xf32>
    %134 = arith.maximumf %132, %133 : vector<8x1xf32>
    %135 = math.absf %132 : vector<8x1xf32>
    %cst_96 = arith.constant 0.000000e+00 : f32
    %136 = vector.broadcast %cst_96 : f32 to vector<8x1xf32>
    %137 = arith.subf %136, %135 : vector<8x1xf32>
    %138 = math.exp %137 : vector<8x1xf32>
    %139 = math.log1p %138 : vector<8x1xf32>
    %140 = arith.addf %134, %139 : vector<8x1xf32>
    %c0_97 = arith.constant 0 : index
    %c0_98 = arith.constant 0 : index
    %141 = vector.load %arg40[%c0_97, %c0_98] : memref<8x1xf32, #tpu.memory_space<vmem>>, vector<8x1xf32>
    tpu.vector_store %arg40[%c0_97, %c0_98], %140 {strides = array<i32>} : memref<8x1xf32, #tpu.memory_space<vmem>>, vector<8x1xf32>,
    return
  }
}

module attributes {stable_mosaic.version = 11 : i64} {
  func.func @_topic_gene_kernel(%arg0: memref<8x256xbf16, #tpu.memory_space<vmem>>, %arg1: memref<256x128xbf16, #tpu.memory_space<vmem>>, %arg2: memref<256x128xbf16, #tpu.memory_space<vmem>>, %arg3: memref<8x128xf32, #tpu.memory_space<vmem>>, %arg4: memref<8x256xf32, #tpu.memory_space<vmem>>, %arg5: memref<1x128xf32, #tpu.memory_space<vmem>>) attributes {dimension_semantics = [], scalar_prefetch = 0 : i64, scratch_operands = 0 : i64, tpu.core_type = #tpu.core_type<tc>} {
    %c0 = arith.constant 0 : index
    %c0_0 = arith.constant 0 : index
    %0 = vector.load %arg0[%c0, %c0_0] : memref<8x256xbf16, #tpu.memory_space<vmem>>, vector<8x256xbf16>
    %1 = arith.extf %0 : vector<8x256xbf16> to vector<8x256xf32>
    %cst = arith.constant dense<0xFF800000> : vector<8xf32>
    %2 = vector.multi_reduction <maximumf>, %1, %cst [1] : vector<8x256xf32> to vector<8xf32>
    %3 = vector.shape_cast %2 : vector<8xf32> to vector<8x1xf32>
    %4 = vector.broadcast %3 : vector<8x1xf32> to vector<8x256xf32>
    %5 = arith.subf %1, %4 : vector<8x256xf32>
    %6 = math.exp %5 : vector<8x256xf32>
    %cst_1 = arith.constant dense<0.000000e+00> : vector<8xf32>
    %7 = vector.multi_reduction <add>, %6, %cst_1 [1] : vector<8x256xf32> to vector<8xf32>
    %8 = vector.shape_cast %7 : vector<8xf32> to vector<8x1xf32>
    %9 = vector.broadcast %8 : vector<8x1xf32> to vector<8x256xf32>
    %10 = arith.divf %6, %9 : vector<8x256xf32>
    %c0_2 = arith.constant 0 : index
    %c0_3 = arith.constant 0 : index
    %11 = vector.load %arg4[%c0_2, %c0_3] : memref<8x256xf32, #tpu.memory_space<vmem>>, vector<8x256xf32>
    tpu.vector_store %arg4[%c0_2, %c0_3], %10 {strides = array<i32>} : memref<8x256xf32, #tpu.memory_space<vmem>>, vector<8x256xf32>,
    %cst_4 = arith.constant dense<0x7F800000> : vector<256xf32>
    %12 = vector.multi_reduction <minimumf>, %10, %cst_4 [0] : vector<8x256xf32> to vector<256xf32>
    %13 = vector.shape_cast %12 : vector<256xf32> to vector<1x256xf32>
    %cst_5 = arith.constant dense<0xFF800000> : vector<256xf32>
    %14 = vector.multi_reduction <maximumf>, %10, %cst_5 [0] : vector<8x256xf32> to vector<256xf32>
    %15 = vector.shape_cast %14 : vector<256xf32> to vector<1x256xf32>
    %16 = vector.broadcast %13 : vector<1x256xf32> to vector<8x256xf32>
    %17 = arith.subf %10, %16 : vector<8x256xf32>
    %18 = arith.subf %15, %13 : vector<1x256xf32>
    %cst_6 = arith.constant 9.99999993E-9 : f32
    %19 = vector.broadcast %cst_6 : f32 to vector<1x256xf32>
    %20 = arith.addf %18, %19 : vector<1x256xf32>
    %21 = vector.broadcast %20 : vector<1x256xf32> to vector<8x256xf32>
    %22 = arith.divf %17, %21 : vector<8x256xf32>
    %c0_7 = arith.constant 0 : index
    %c0_8 = arith.constant 0 : index
    %23 = vector.load %arg1[%c0_7, %c0_8] : memref<256x128xbf16, #tpu.memory_space<vmem>>, vector<256x128xbf16>
    %24 = arith.extf %23 : vector<256x128xbf16> to vector<256x128xf32>
    %c0_9 = arith.constant 0 : index
    %c0_10 = arith.constant 0 : index
    %25 = vector.load %arg2[%c0_9, %c0_10] : memref<256x128xbf16, #tpu.memory_space<vmem>>, vector<256x128xbf16>
    %26 = arith.extf %25 : vector<256x128xbf16> to vector<256x128xf32>
    %27 = arith.mulf %24, %26 : vector<256x128xf32>
    %cst_11 = arith.constant dense<0.000000e+00> : vector<8x128xf32>
    %28 = tpu.matmul %22, %27, %cst_11 {dimension_numbers = #tpu.dot_dimension_numbers<[1], [0], [0], [1], [0, 0, 1, 1], [], []>} : vector<8x256xf32>, vector<256x128xf32>, vector<8x128xf32> -> vector<8x128xf32>
    %c0_12 = arith.constant 0 : index
    %c0_13 = arith.constant 0 : index
    %29 = vector.load %arg3[%c0_12, %c0_13] : memref<8x128xf32, #tpu.memory_space<vmem>>, vector<8x128xf32>
    tpu.vector_store %arg3[%c0_12, %c0_13], %28 {strides = array<i32>} : memref<8x128xf32, #tpu.memory_space<vmem>>, vector<8x128xf32>,
    %cst_14 = arith.constant dense<0.000000e+00> : vector<128xf32>
    %30 = vector.multi_reduction <add>, %27, %cst_14 [0] : vector<256x128xf32> to vector<128xf32>
    %31 = vector.shape_cast %30 : vector<128xf32> to vector<1x128xf32>
    %cst_15 = arith.constant 1.000000e-07 : f32
    %32 = vector.broadcast %cst_15 : f32 to vector<1x128xf32>
    %33 = arith.addf %31, %32 : vector<1x128xf32>
    %cst_16 = arith.constant 1.000000e+00 : f32
    %34 = vector.broadcast %cst_16 : f32 to vector<1x128xf32>
    %35 = arith.divf %34, %33 : vector<1x128xf32>
    %c0_17 = arith.constant 0 : index
    %c0_18 = arith.constant 0 : index
    %36 = vector.load %arg5[%c0_17, %c0_18] : memref<1x128xf32, #tpu.memory_space<vmem>>, vector<1x128xf32>
    tpu.vector_store %arg5[%c0_17, %c0_18], %35 {strides = array<i32>} : memref<1x128xf32, #tpu.memory_space<vmem>>, vector<1x128xf32>,
    return
  }
}

module attributes {stable_mosaic.version = 11 : i64} {
  func.func @_grn_kernel(%arg0: i32, %arg1: memref<1x2x256xf32, #tpu.memory_space<vmem>>, %arg2: memref<256x128xbf16, #tpu.memory_space<vmem>>, %arg3: memref<256x128xbf16, #tpu.memory_space<vmem>>, %arg4: memref<64x256xbf16, #tpu.memory_space<vmem>>, %arg5: memref<64x256xbf16, #tpu.memory_space<vmem>>, %arg6: memref<1x128xf32, #tpu.memory_space<vmem>>, %arg7: memref<2x64x128xbf16, #tpu.memory_space<vmem>>, %arg8: memref<2x64x128xbf16, #tpu.memory_space<vmem>>, %arg9: memref<2x64x1xf32, #tpu.memory_space<vmem>>, %arg10: memref<1x2x128xf32, #tpu.memory_space<vmem>>, %arg11: memref<256x256xf32, #tpu.memory_space<vmem>>) attributes {dimension_semantics = [#tpu.dimension_semantics<parallel>], iteration_bounds = array<i64: 4>, scalar_prefetch = 0 : i64, scratch_operands = 1 : i64, tpu.core_type = #tpu.core_type<tc>, window_params = [{transform_indices = @transform_0, window_bounds = array<i64: 1, 2, 256>}, {pipeline_mode = #tpu.pipeline_mode<synchronous>, transform_indices = @transform_1, window_bounds = array<i64: 256, 128>}, {pipeline_mode = #tpu.pipeline_mode<synchronous>, transform_indices = @transform_2, window_bounds = array<i64: 256, 128>}, {pipeline_mode = #tpu.pipeline_mode<synchronous>, transform_indices = @transform_3, window_bounds = array<i64: 64, 256>}, {pipeline_mode = #tpu.pipeline_mode<synchronous>, transform_indices = @transform_4, window_bounds = array<i64: 64, 256>}, {pipeline_mode = #tpu.pipeline_mode<synchronous>, transform_indices = @transform_5, window_bounds = array<i64: 1, 128>}, {transform_indices = @transform_6, window_bounds = array<i64: 2, 64, 128>}, {transform_indices = @transform_7, window_bounds = array<i64: 2, 64, 128>}, {transform_indices = @transform_8, window_bounds = array<i64: 2, 64, 1>}, {transform_indices = @transform_9, window_bounds = array<i64: 1, 2, 128>}]} {
    %c0 = arith.constant 0 : index
    %c0_0 = arith.constant 0 : index
    %0 = vector.load %arg2[%c0, %c0_0] : memref<256x128xbf16, #tpu.memory_space<vmem>>, vector<256x128xbf16>
    %1 = arith.extf %0 : vector<256x128xbf16> to vector<256x128xf32>
    %c0_1 = arith.constant 0 : index
    %c0_2 = arith.constant 0 : index
    %2 = vector.load %arg3[%c0_1, %c0_2] : memref<256x128xbf16, #tpu.memory_space<vmem>>, vector<256x128xbf16>
    %3 = arith.extf %2 : vector<256x128xbf16> to vector<256x128xf32>
    %4 = arith.mulf %1, %3 : vector<256x128xf32>
    %c0_3 = arith.constant 0 : index
    %c0_4 = arith.constant 0 : index
    %5 = vector.load %arg4[%c0_3, %c0_4] : memref<64x256xbf16, #tpu.memory_space<vmem>>, vector<64x256xbf16>
    %6 = arith.extf %5 : vector<64x256xbf16> to vector<64x256xf32>
    %c0_5 = arith.constant 0 : index
    %c0_6 = arith.constant 0 : index
    %7 = vector.load %arg5[%c0_5, %c0_6] : memref<64x256xbf16, #tpu.memory_space<vmem>>, vector<64x256xbf16>
    %8 = arith.extf %7 : vector<64x256xbf16> to vector<64x256xf32>
    %c0_7 = arith.constant 0 : index
    %c0_8 = arith.constant 0 : index
    %c0_9 = arith.constant 0 : index
    %9 = vector.load %arg1[%c0_7, %c0_8, %c0_9] : memref<1x2x256xf32, #tpu.memory_space<vmem>>, vector<1x2x256xf32>
    %10 = vector.shape_cast %9 : vector<1x2x256xf32> to vector<2x256xf32>
    %11 = vector.extract_strided_slice %10 {offsets = [0, 0], sizes = [1, 256], strides = [1, 1]} : vector<2x256xf32> to vector<1x256xf32>
    %12 = vector.shape_cast %11 : vector<1x256xf32> to vector<256xf32>
    %cst = arith.constant 9.99999968E-21 : f32
    %13 = vector.broadcast %cst : f32 to vector<256xf32>
    %14 = arith.addf %12, %13 : vector<256xf32>
    %cst_10 = arith.constant 1.000000e+00 : f32
    %15 = vector.broadcast %cst_10 : f32 to vector<256xf32>
    %16 = arith.divf %15, %14 : vector<256xf32>
    %17 = vector.shape_cast %12 : vector<256xf32> to vector<1x256xf32>
    %18 = vector.broadcast %17 : vector<1x256xf32> to vector<64x256xf32>
    %19 = arith.mulf %6, %18 : vector<64x256xf32>
    %c0_11 = arith.constant 0 : index
    %c0_12 = arith.constant 0 : index
    %20 = vector.load %arg11[%c0_11, %c0_12] : memref<256x256xf32, #tpu.memory_space<vmem>>, vector<64x256xf32>
    tpu.vector_store %arg11[%c0_11, %c0_12], %19 {strides = array<i32>} : memref<256x256xf32, #tpu.memory_space<vmem>>, vector<64x256xf32>,
    %21 = vector.shape_cast %16 : vector<256xf32> to vector<1x256xf32>
    %22 = vector.broadcast %21 : vector<1x256xf32> to vector<64x256xf32>
    %23 = arith.mulf %8, %22 : vector<64x256xf32>
    %c64 = arith.constant 64 : index
    %c0_13 = arith.constant 0 : index
    %24 = vector.load %arg11[%c64, %c0_13] : memref<256x256xf32, #tpu.memory_space<vmem>>, vector<64x256xf32>
    tpu.vector_store %arg11[%c64, %c0_13], %23 {strides = array<i32>} : memref<256x256xf32, #tpu.memory_space<vmem>>, vector<64x256xf32>,
    %25 = vector.extract_strided_slice %10 {offsets = [1, 0], sizes = [1, 256], strides = [1, 1]} : vector<2x256xf32> to vector<1x256xf32>
    %26 = vector.shape_cast %25 : vector<1x256xf32> to vector<256xf32>
    %cst_14 = arith.constant 9.99999968E-21 : f32
    %27 = vector.broadcast %cst_14 : f32 to vector<256xf32>
    %28 = arith.addf %26, %27 : vector<256xf32>
    %cst_15 = arith.constant 1.000000e+00 : f32
    %29 = vector.broadcast %cst_15 : f32 to vector<256xf32>
    %30 = arith.divf %29, %28 : vector<256xf32>
    %31 = vector.shape_cast %26 : vector<256xf32> to vector<1x256xf32>
    %32 = vector.broadcast %31 : vector<1x256xf32> to vector<64x256xf32>
    %33 = arith.mulf %6, %32 : vector<64x256xf32>
    %c128 = arith.constant 128 : index
    %c0_16 = arith.constant 0 : index
    %34 = vector.load %arg11[%c128, %c0_16] : memref<256x256xf32, #tpu.memory_space<vmem>>, vector<64x256xf32>
    tpu.vector_store %arg11[%c128, %c0_16], %33 {strides = array<i32>} : memref<256x256xf32, #tpu.memory_space<vmem>>, vector<64x256xf32>,
    %35 = vector.shape_cast %30 : vector<256xf32> to vector<1x256xf32>
    %36 = vector.broadcast %35 : vector<1x256xf32> to vector<64x256xf32>
    %37 = arith.mulf %8, %36 : vector<64x256xf32>
    %c192 = arith.constant 192 : index
    %c0_17 = arith.constant 0 : index
    %38 = vector.load %arg11[%c192, %c0_17] : memref<256x256xf32, #tpu.memory_space<vmem>>, vector<64x256xf32>
    tpu.vector_store %arg11[%c192, %c0_17], %37 {strides = array<i32>} : memref<256x256xf32, #tpu.memory_space<vmem>>, vector<64x256xf32>,
    %c0_18 = arith.constant 0 : index
    %c0_19 = arith.constant 0 : index
    %39 = vector.load %arg11[%c0_18, %c0_19] : memref<256x256xf32, #tpu.memory_space<vmem>>, vector<256x256xf32>
    %cst_20 = arith.constant dense<0.000000e+00> : vector<256x128xf32>
    %40 = tpu.matmul %39, %4, %cst_20 {dimension_numbers = #tpu.dot_dimension_numbers<[1], [0], [0], [1], [0, 0, 1, 1], [], []>} : vector<256x256xf32>, vector<256x128xf32>, vector<256x128xf32> -> vector<256x128xf32>
    %c0_21 = arith.constant 0 : index
    %c0_22 = arith.constant 0 : index
    %41 = vector.load %arg6[%c0_21, %c0_22] : memref<1x128xf32, #tpu.memory_space<vmem>>, vector<1x128xf32>
    %42 = vector.broadcast %41 : vector<1x128xf32> to vector<256x128xf32>
    %43 = arith.mulf %40, %42 : vector<256x128xf32>
    %44 = vector.extract_strided_slice %43 {offsets = [0, 0], sizes = [64, 128], strides = [1, 1]} : vector<256x128xf32> to vector<64x128xf32>
    %45 = vector.extract_strided_slice %43 {offsets = [64, 0], sizes = [64, 128], strides = [1, 1]} : vector<256x128xf32> to vector<64x128xf32>
    %cst_23 = arith.constant dense<0xFF800000> : vector<64xf32>
    %46 = vector.multi_reduction <maximumf>, %44, %cst_23 [1] : vector<64x128xf32> to vector<64xf32>
    %47 = vector.shape_cast %46 : vector<64xf32> to vector<64x1xf32>
    %cst_24 = arith.constant dense<0xFF800000> : vector<1xf32>
    %48 = vector.multi_reduction <maximumf>, %47, %cst_24 [0] : vector<64x1xf32> to vector<1xf32>
    %49 = vector.shape_cast %48 : vector<1xf32> to vector<1x1xf32>
    %cst_25 = arith.constant dense<0x7F800000> : vector<64xf32>
    %50 = vector.multi_reduction <minimumf>, %45, %cst_25 [1] : vector<64x128xf32> to vector<64xf32>
    %51 = vector.shape_cast %50 : vector<64xf32> to vector<64x1xf32>
    %cst_26 = arith.constant dense<0x7F800000> : vector<1xf32>
    %52 = vector.multi_reduction <minimumf>, %51, %cst_26 [0] : vector<64x1xf32> to vector<1xf32>
    %53 = vector.shape_cast %52 : vector<1xf32> to vector<1x1xf32>
    %cst_27 = arith.constant 1.000000e-15 : f32
    %54 = vector.broadcast %cst_27 : f32 to vector<1x1xf32>
    %55 = arith.addf %49, %54 : vector<1x1xf32>
    %56 = vector.broadcast %55 : vector<1x1xf32> to vector<64x128xf32>
    %57 = arith.divf %44, %56 : vector<64x128xf32>
    %cst_28 = arith.constant 1.000000e-15 : f32
    %58 = vector.broadcast %cst_28 : f32 to vector<1x1xf32>
    %59 = arith.addf %53, %58 : vector<1x1xf32>
    %60 = vector.broadcast %59 : vector<1x1xf32> to vector<64x128xf32>
    %61 = arith.divf %45, %60 : vector<64x128xf32>
    %c0_29 = arith.constant 0 : index
    %c0_30 = arith.constant 0 : index
    %c0_31 = arith.constant 0 : index
    %62 = vector.load %arg7[%c0_29, %c0_30, %c0_31] : memref<2x64x128xbf16, #tpu.memory_space<vmem>>, vector<1x64x128xbf16>
    %63 = vector.shape_cast %62 : vector<1x64x128xbf16> to vector<64x128xbf16>
    %64 = arith.extf %63 : vector<64x128xbf16> to vector<64x128xf32>
    %cst_32 = arith.constant 0.000000e+00 : f32
    %65 = vector.broadcast %cst_32 : f32 to vector<64x128xf32>
    %66 = arith.maximumf %64, %65 : vector<64x128xf32>
    %c0_33 = arith.constant 0 : index
    %c0_34 = arith.constant 0 : index
    %c0_35 = arith.constant 0 : index
    %67 = vector.load %arg8[%c0_33, %c0_34, %c0_35] : memref<2x64x128xbf16, #tpu.memory_space<vmem>>, vector<1x64x128xbf16>
    %68 = vector.shape_cast %67 : vector<1x64x128xbf16> to vector<64x128xbf16>
    %69 = arith.extf %68 : vector<64x128xbf16> to vector<64x128xf32>
    %cst_36 = arith.constant 0.000000e+00 : f32
    %70 = vector.broadcast %cst_36 : f32 to vector<64x128xf32>
    %71 = arith.maximumf %69, %70 : vector<64x128xf32>
    %72 = arith.mulf %57, %66 : vector<64x128xf32>
    %73 = arith.mulf %61, %71 : vector<64x128xf32>
    %74 = arith.subf %72, %73 : vector<64x128xf32>
    %c0_37 = arith.constant 0 : index
    %c0_38 = arith.constant 0 : index
    %c0_39 = arith.constant 0 : index
    %75 = vector.load %arg9[%c0_37, %c0_38, %c0_39] : memref<2x64x1xf32, #tpu.memory_space<vmem>>, vector<1x64x1xf32>
    %76 = vector.shape_cast %75 : vector<1x64x1xf32> to vector<64x1xf32>
    %77 = vector.broadcast %76 : vector<64x1xf32> to vector<64x128xf32>
    %78 = arith.mulf %74, %77 : vector<64x128xf32>
    %cst_40 = arith.constant dense<0.000000e+00> : vector<128xf32>
    %79 = vector.multi_reduction <add>, %78, %cst_40 [0] : vector<64x128xf32> to vector<128xf32>
    %80 = vector.shape_cast %79 : vector<128xf32> to vector<1x128xf32>
    %81 = vector.extract_strided_slice %43 {offsets = [128, 0], sizes = [64, 128], strides = [1, 1]} : vector<256x128xf32> to vector<64x128xf32>
    %82 = vector.extract_strided_slice %43 {offsets = [192, 0], sizes = [64, 128], strides = [1, 1]} : vector<256x128xf32> to vector<64x128xf32>
    %cst_41 = arith.constant dense<0xFF800000> : vector<64xf32>
    %83 = vector.multi_reduction <maximumf>, %81, %cst_41 [1] : vector<64x128xf32> to vector<64xf32>
    %84 = vector.shape_cast %83 : vector<64xf32> to vector<64x1xf32>
    %cst_42 = arith.constant dense<0xFF800000> : vector<1xf32>
    %85 = vector.multi_reduction <maximumf>, %84, %cst_42 [0] : vector<64x1xf32> to vector<1xf32>
    %86 = vector.shape_cast %85 : vector<1xf32> to vector<1x1xf32>
    %cst_43 = arith.constant dense<0x7F800000> : vector<64xf32>
    %87 = vector.multi_reduction <minimumf>, %82, %cst_43 [1] : vector<64x128xf32> to vector<64xf32>
    %88 = vector.shape_cast %87 : vector<64xf32> to vector<64x1xf32>
    %cst_44 = arith.constant dense<0x7F800000> : vector<1xf32>
    %89 = vector.multi_reduction <minimumf>, %88, %cst_44 [0] : vector<64x1xf32> to vector<1xf32>
    %90 = vector.shape_cast %89 : vector<1xf32> to vector<1x1xf32>
    %cst_45 = arith.constant 1.000000e-15 : f32
    %91 = vector.broadcast %cst_45 : f32 to vector<1x1xf32>
    %92 = arith.addf %86, %91 : vector<1x1xf32>
    %93 = vector.broadcast %92 : vector<1x1xf32> to vector<64x128xf32>
    %94 = arith.divf %81, %93 : vector<64x128xf32>
    %cst_46 = arith.constant 1.000000e-15 : f32
    %95 = vector.broadcast %cst_46 : f32 to vector<1x1xf32>
    %96 = arith.addf %90, %95 : vector<1x1xf32>
    %97 = vector.broadcast %96 : vector<1x1xf32> to vector<64x128xf32>
    %98 = arith.divf %82, %97 : vector<64x128xf32>
    %c1 = arith.constant 1 : index
    %c0_47 = arith.constant 0 : index
    %c0_48 = arith.constant 0 : index
    %99 = vector.load %arg7[%c1, %c0_47, %c0_48] : memref<2x64x128xbf16, #tpu.memory_space<vmem>>, vector<1x64x128xbf16>
    %100 = vector.shape_cast %99 : vector<1x64x128xbf16> to vector<64x128xbf16>
    %101 = arith.extf %100 : vector<64x128xbf16> to vector<64x128xf32>
    %cst_49 = arith.constant 0.000000e+00 : f32
    %102 = vector.broadcast %cst_49 : f32 to vector<64x128xf32>
    %103 = arith.maximumf %101, %102 : vector<64x128xf32>
    %c1_50 = arith.constant 1 : index
    %c0_51 = arith.constant 0 : index
    %c0_52 = arith.constant 0 : index
    %104 = vector.load %arg8[%c1_50, %c0_51, %c0_52] : memref<2x64x128xbf16, #tpu.memory_space<vmem>>, vector<1x64x128xbf16>
    %105 = vector.shape_cast %104 : vector<1x64x128xbf16> to vector<64x128xbf16>
    %106 = arith.extf %105 : vector<64x128xbf16> to vector<64x128xf32>
    %cst_53 = arith.constant 0.000000e+00 : f32
    %107 = vector.broadcast %cst_53 : f32 to vector<64x128xf32>
    %108 = arith.maximumf %106, %107 : vector<64x128xf32>
    %109 = arith.mulf %94, %103 : vector<64x128xf32>
    %110 = arith.mulf %98, %108 : vector<64x128xf32>
    %111 = arith.subf %109, %110 : vector<64x128xf32>
    %c1_54 = arith.constant 1 : index
    %c0_55 = arith.constant 0 : index
    %c0_56 = arith.constant 0 : index
    %112 = vector.load %arg9[%c1_54, %c0_55, %c0_56] : memref<2x64x1xf32, #tpu.memory_space<vmem>>, vector<1x64x1xf32>
    %113 = vector.shape_cast %112 : vector<1x64x1xf32> to vector<64x1xf32>
    %114 = vector.broadcast %113 : vector<64x1xf32> to vector<64x128xf32>
    %115 = arith.mulf %111, %114 : vector<64x128xf32>
    %cst_57 = arith.constant dense<0.000000e+00> : vector<128xf32>
    %116 = vector.multi_reduction <add>, %115, %cst_57 [0] : vector<64x128xf32> to vector<128xf32>
    %117 = vector.shape_cast %116 : vector<128xf32> to vector<1x128xf32>
    %118 = tpu.concatenate %80, %117 in 0 : vector<1x128xf32>, vector<1x128xf32> -> vector<2x128xf32>
    %c0_58 = arith.constant 0 : index
    %c0_59 = arith.constant 0 : index
    %c0_60 = arith.constant 0 : index
    %119 = vector.load %arg10[%c0_58, %c0_59, %c0_60] : memref<1x2x128xf32, #tpu.memory_space<vmem>>, vector<1x2x128xf32>
    %120 = vector.shape_cast %119 : vector<1x2x128xf32> to vector<2x128xf32>
    %121 = vector.shape_cast %118 : vector<2x128xf32> to vector<1x2x128xf32>
    tpu.vector_store %arg10[%c0_58, %c0_59, %c0_60], %121 {strides = array<i32>} : memref<1x2x128xf32, #tpu.memory_space<vmem>>, vector<1x2x128xf32>,
    return
  }
  func.func @transform_0(%arg0: i32) -> (i32, i32, i32) {
    %c0_i32 = arith.constant 0 : i32
    %c0_i32_0 = arith.constant 0 : i32
    %c0_i32_1 = arith.constant 0 : i32
    return %arg0, %c0_i32, %c0_i32_0 : i32, i32, i32
  }
  func.func @transform_1(%arg0: i32) -> (i32, i32) {
    %c0_i32 = arith.constant 0 : i32
    %c0_i32_0 = arith.constant 0 : i32
    %c0_i32_1 = arith.constant 0 : i32
    return %c0_i32, %c0_i32_0 : i32, i32
  }
  func.func @transform_2(%arg0: i32) -> (i32, i32) {
    %c0_i32 = arith.constant 0 : i32
    %c0_i32_0 = arith.constant 0 : i32
    %c0_i32_1 = arith.constant 0 : i32
    return %c0_i32, %c0_i32_0 : i32, i32
  }
  func.func @transform_3(%arg0: i32) -> (i32, i32) {
    %c0_i32 = arith.constant 0 : i32
    %c0_i32_0 = arith.constant 0 : i32
    %c0_i32_1 = arith.constant 0 : i32
    return %c0_i32, %c0_i32_0 : i32, i32
  }
  func.func @transform_4(%arg0: i32) -> (i32, i32) {
    %c0_i32 = arith.constant 0 : i32
    %c0_i32_0 = arith.constant 0 : i32
    %c0_i32_1 = arith.constant 0 : i32
    return %c0_i32, %c0_i32_0 : i32, i32
  }
  func.func @transform_5(%arg0: i32) -> (i32, i32) {
    %c0_i32 = arith.constant 0 : i32
    %c0_i32_0 = arith.constant 0 : i32
    %c0_i32_1 = arith.constant 0 : i32
    return %c0_i32, %c0_i32_0 : i32, i32
  }
  func.func @transform_6(%arg0: i32) -> (i32, i32, i32) {
    %c0_i32 = arith.constant 0 : i32
    %c0_i32_0 = arith.constant 0 : i32
    %c0_i32_1 = arith.constant 0 : i32
    return %arg0, %c0_i32, %c0_i32_0 : i32, i32, i32
  }
  func.func @transform_7(%arg0: i32) -> (i32, i32, i32) {
    %c0_i32 = arith.constant 0 : i32
    %c0_i32_0 = arith.constant 0 : i32
    %c0_i32_1 = arith.constant 0 : i32
    return %arg0, %c0_i32, %c0_i32_0 : i32, i32, i32
  }
  func.func @transform_8(%arg0: i32) -> (i32, i32, i32) {
    %c0_i32 = arith.constant 0 : i32
    %c0_i32_0 = arith.constant 0 : i32
    %c0_i32_1 = arith.constant 0 : i32
    return %arg0, %c0_i32, %c0_i32_0 : i32, i32, i32
  }
  func.func @transform_9(%arg0: i32) -> (i32, i32, i32) {
    %c0_i32 = arith.constant 0 : i32
    %c0_i32_0 = arith.constant 0 : i32
    %c0_i32_1 = arith.constant 0 : i32
    return %arg0, %c0_i32, %c0_i32_0 : i32, i32, i32
  }
}

module attributes {stable_mosaic.version = 11 : i64} {
  func.func @_decoder_softmax_kernel(%arg0: i32, %arg1: memref<8xi32, #tpu.memory_space<smem>>, %arg2: memref<1x8x1xf32, #tpu.memory_space<vmem>>, %arg3: memref<8x128xf32, #tpu.memory_space<vmem>>, %arg4: memref<1x1x128xf32, #tpu.memory_space<vmem>>, %arg5: memref<1x128xf32, #tpu.memory_space<vmem>>, %arg6: memref<1x128xf32, #tpu.memory_space<vmem>>, %arg7: memref<1x1x128xf32, #tpu.memory_space<vmem>>) attributes {dimension_semantics = [#tpu.dimension_semantics<parallel>], iteration_bounds = array<i64: 8>, scalar_prefetch = 1 : i64, scratch_operands = 0 : i64, tpu.core_type = #tpu.core_type<tc>, window_params = [{transform_indices = @transform_0, window_bounds = array<i64: 1, 8, 1>}, {pipeline_mode = #tpu.pipeline_mode<synchronous>, transform_indices = @transform_1, window_bounds = array<i64: 8, 128>}, {transform_indices = @transform_2, window_bounds = array<i64: 1, 1, 128>}, {pipeline_mode = #tpu.pipeline_mode<synchronous>, transform_indices = @transform_3, window_bounds = array<i64: 1, 128>}, {pipeline_mode = #tpu.pipeline_mode<synchronous>, transform_indices = @transform_4, window_bounds = array<i64: 1, 128>}, {transform_indices = @transform_5, window_bounds = array<i64: 1, 1, 128>}]} {
    %c0 = arith.constant 0 : index
    %c0_0 = arith.constant 0 : index
    %c0_1 = arith.constant 0 : index
    %0 = vector.load %arg2[%c0, %c0_0, %c0_1] : memref<1x8x1xf32, #tpu.memory_space<vmem>>, vector<1x8x1xf32>
    %1 = vector.shape_cast %0 : vector<1x8x1xf32> to vector<8x1xf32>
    %c0_2 = arith.constant 0 : index
    %c0_3 = arith.constant 0 : index
    %2 = vector.load %arg3[%c0_2, %c0_3] : memref<8x128xf32, #tpu.memory_space<vmem>>, vector<8x128xf32>
    %3 = vector.broadcast %1 : vector<8x1xf32> to vector<8x128xf32>
    %4 = arith.mulf %2, %3 : vector<8x128xf32>
    %cst = arith.constant dense<0.000000e+00> : vector<128xf32>
    %5 = vector.multi_reduction <add>, %4, %cst [0] : vector<8x128xf32> to vector<128xf32>
    %6 = vector.shape_cast %5 : vector<128xf32> to vector<1x128xf32>
    %c0_4 = arith.constant 0 : index
    %c0_5 = arith.constant 0 : index
    %c0_6 = arith.constant 0 : index
    %7 = vector.load %arg4[%c0_4, %c0_5, %c0_6] : memref<1x1x128xf32, #tpu.memory_space<vmem>>, vector<1x1x128xf32>
    %8 = vector.shape_cast %7 : vector<1x1x128xf32> to vector<1x128xf32>
    %9 = arith.addf %6, %8 : vector<1x128xf32>
    %c0_7 = arith.constant 0 : index
    %c0_8 = arith.constant 0 : index
    %10 = vector.load %arg5[%c0_7, %c0_8] : memref<1x128xf32, #tpu.memory_space<vmem>>, vector<1x128xf32>
    %11 = arith.mulf %9, %10 : vector<1x128xf32>
    %c0_9 = arith.constant 0 : index
    %c0_10 = arith.constant 0 : index
    %12 = vector.load %arg6[%c0_9, %c0_10] : memref<1x128xf32, #tpu.memory_space<vmem>>, vector<1x128xf32>
    %13 = arith.addf %11, %12 : vector<1x128xf32>
    %cst_11 = arith.constant dense<0xFF800000> : vector<1xf32>
    %14 = vector.multi_reduction <maximumf>, %13, %cst_11 [1] : vector<1x128xf32> to vector<1xf32>
    %15 = vector.shape_cast %14 : vector<1xf32> to vector<1x1xf32>
    %16 = vector.broadcast %15 : vector<1x1xf32> to vector<1x128xf32>
    %17 = arith.subf %13, %16 : vector<1x128xf32>
    %18 = math.exp %17 : vector<1x128xf32>
    %cst_12 = arith.constant dense<0.000000e+00> : vector<1xf32>
    %19 = vector.multi_reduction <add>, %18, %cst_12 [1] : vector<1x128xf32> to vector<1xf32>
    %20 = vector.shape_cast %19 : vector<1xf32> to vector<1x1xf32>
    %21 = vector.broadcast %20 : vector<1x1xf32> to vector<1x128xf32>
    %22 = arith.divf %18, %21 : vector<1x128xf32>
    %c0_13 = arith.constant 0 : index
    %c0_14 = arith.constant 0 : index
    %c0_15 = arith.constant 0 : index
    %23 = vector.load %arg7[%c0_13, %c0_14, %c0_15] : memref<1x1x128xf32, #tpu.memory_space<vmem>>, vector<1x1x128xf32>
    %24 = vector.shape_cast %23 : vector<1x1x128xf32> to vector<1x128xf32>
    %25 = vector.shape_cast %22 : vector<1x128xf32> to vector<1x1x128xf32>
    tpu.vector_store %arg7[%c0_13, %c0_14, %c0_15], %25 {strides = array<i32>} : memref<1x1x128xf32, #tpu.memory_space<vmem>>, vector<1x1x128xf32>,
    return
  }
  func.func @transform_0(%arg0: i32, %arg1: memref<8xi32, #tpu.memory_space<smem>>) -> (i32, i32, i32) {
    %c0_i32 = arith.constant 0 : i32
    %c0_i32_0 = arith.constant 0 : i32
    %c0_i32_1 = arith.constant 0 : i32
    return %arg0, %c0_i32, %c0_i32_0 : i32, i32, i32
  }
  func.func @transform_1(%arg0: i32, %arg1: memref<8xi32, #tpu.memory_space<smem>>) -> (i32, i32) {
    %c0_i32 = arith.constant 0 : i32
    %c0_i32_0 = arith.constant 0 : i32
    %c0_i32_1 = arith.constant 0 : i32
    return %c0_i32, %c0_i32_0 : i32, i32
  }
  func.func @transform_2(%arg0: i32, %arg1: memref<8xi32, #tpu.memory_space<smem>>) -> (i32, i32, i32) {
    %0 = arith.index_cast %arg0 : i32 to index
    %1 = memref.load %arg1[%0] : memref<8xi32, #tpu.memory_space<smem>>
    %c0_i32 = arith.constant 0 : i32
    %c0_i32_0 = arith.constant 0 : i32
    %c0_i32_1 = arith.constant 0 : i32
    return %1, %c0_i32, %c0_i32_0 : i32, i32, i32
  }
  func.func @transform_3(%arg0: i32, %arg1: memref<8xi32, #tpu.memory_space<smem>>) -> (i32, i32) {
    %c0_i32 = arith.constant 0 : i32
    %c0_i32_0 = arith.constant 0 : i32
    %c0_i32_1 = arith.constant 0 : i32
    return %c0_i32, %c0_i32_0 : i32, i32
  }
  func.func @transform_4(%arg0: i32, %arg1: memref<8xi32, #tpu.memory_space<smem>>) -> (i32, i32) {
    %c0_i32 = arith.constant 0 : i32
    %c0_i32_0 = arith.constant 0 : i32
    %c0_i32_1 = arith.constant 0 : i32
    return %c0_i32, %c0_i32_0 : i32, i32
  }
  func.func @transform_5(%arg0: i32, %arg1: memref<8xi32, #tpu.memory_space<smem>>) -> (i32, i32, i32) {
    %c0_i32 = arith.constant 0 : i32
    %c0_i32_0 = arith.constant 0 : i32
    %c0_i32_1 = arith.constant 0 : i32
    return %arg0, %c0_i32, %c0_i32_0 : i32, i32, i32
  }
}

module attributes {stable_mosaic.version = 11 : i64} {
  func.func @_decoder_softmax_kernel(%arg0: i32, %arg1: memref<8xi32, #tpu.memory_space<smem>>, %arg2: memref<1x8x1xf32, #tpu.memory_space<vmem>>, %arg3: memref<8x64xf32, #tpu.memory_space<vmem>>, %arg4: memref<1x1x64xf32, #tpu.memory_space<vmem>>, %arg5: memref<1x64xf32, #tpu.memory_space<vmem>>, %arg6: memref<1x64xf32, #tpu.memory_space<vmem>>, %arg7: memref<1x1x64xf32, #tpu.memory_space<vmem>>) attributes {dimension_semantics = [#tpu.dimension_semantics<parallel>], iteration_bounds = array<i64: 8>, scalar_prefetch = 1 : i64, scratch_operands = 0 : i64, tpu.core_type = #tpu.core_type<tc>, window_params = [{transform_indices = @transform_0, window_bounds = array<i64: 1, 8, 1>}, {pipeline_mode = #tpu.pipeline_mode<synchronous>, transform_indices = @transform_1, window_bounds = array<i64: 8, 64>}, {transform_indices = @transform_2, window_bounds = array<i64: 1, 1, 64>}, {pipeline_mode = #tpu.pipeline_mode<synchronous>, transform_indices = @transform_3, window_bounds = array<i64: 1, 64>}, {pipeline_mode = #tpu.pipeline_mode<synchronous>, transform_indices = @transform_4, window_bounds = array<i64: 1, 64>}, {transform_indices = @transform_5, window_bounds = array<i64: 1, 1, 64>}]} {
    %c0 = arith.constant 0 : index
    %c0_0 = arith.constant 0 : index
    %c0_1 = arith.constant 0 : index
    %0 = vector.load %arg2[%c0, %c0_0, %c0_1] : memref<1x8x1xf32, #tpu.memory_space<vmem>>, vector<1x8x1xf32>
    %1 = vector.shape_cast %0 : vector<1x8x1xf32> to vector<8x1xf32>
    %c0_2 = arith.constant 0 : index
    %c0_3 = arith.constant 0 : index
    %2 = vector.load %arg3[%c0_2, %c0_3] : memref<8x64xf32, #tpu.memory_space<vmem>>, vector<8x64xf32>
    %3 = vector.broadcast %1 : vector<8x1xf32> to vector<8x64xf32>
    %4 = arith.mulf %2, %3 : vector<8x64xf32>
    %cst = arith.constant dense<0.000000e+00> : vector<64xf32>
    %5 = vector.multi_reduction <add>, %4, %cst [0] : vector<8x64xf32> to vector<64xf32>
    %6 = vector.shape_cast %5 : vector<64xf32> to vector<1x64xf32>
    %c0_4 = arith.constant 0 : index
    %c0_5 = arith.constant 0 : index
    %c0_6 = arith.constant 0 : index
    %7 = vector.load %arg4[%c0_4, %c0_5, %c0_6] : memref<1x1x64xf32, #tpu.memory_space<vmem>>, vector<1x1x64xf32>
    %8 = vector.shape_cast %7 : vector<1x1x64xf32> to vector<1x64xf32>
    %9 = arith.addf %6, %8 : vector<1x64xf32>
    %c0_7 = arith.constant 0 : index
    %c0_8 = arith.constant 0 : index
    %10 = vector.load %arg5[%c0_7, %c0_8] : memref<1x64xf32, #tpu.memory_space<vmem>>, vector<1x64xf32>
    %11 = arith.mulf %9, %10 : vector<1x64xf32>
    %c0_9 = arith.constant 0 : index
    %c0_10 = arith.constant 0 : index
    %12 = vector.load %arg6[%c0_9, %c0_10] : memref<1x64xf32, #tpu.memory_space<vmem>>, vector<1x64xf32>
    %13 = arith.addf %11, %12 : vector<1x64xf32>
    %cst_11 = arith.constant dense<0xFF800000> : vector<1xf32>
    %14 = vector.multi_reduction <maximumf>, %13, %cst_11 [1] : vector<1x64xf32> to vector<1xf32>
    %15 = vector.shape_cast %14 : vector<1xf32> to vector<1x1xf32>
    %16 = vector.broadcast %15 : vector<1x1xf32> to vector<1x64xf32>
    %17 = arith.subf %13, %16 : vector<1x64xf32>
    %18 = math.exp %17 : vector<1x64xf32>
    %cst_12 = arith.constant dense<0.000000e+00> : vector<1xf32>
    %19 = vector.multi_reduction <add>, %18, %cst_12 [1] : vector<1x64xf32> to vector<1xf32>
    %20 = vector.shape_cast %19 : vector<1xf32> to vector<1x1xf32>
    %21 = vector.broadcast %20 : vector<1x1xf32> to vector<1x64xf32>
    %22 = arith.divf %18, %21 : vector<1x64xf32>
    %c0_13 = arith.constant 0 : index
    %c0_14 = arith.constant 0 : index
    %c0_15 = arith.constant 0 : index
    %23 = vector.load %arg7[%c0_13, %c0_14, %c0_15] : memref<1x1x64xf32, #tpu.memory_space<vmem>>, vector<1x1x64xf32>
    %24 = vector.shape_cast %23 : vector<1x1x64xf32> to vector<1x64xf32>
    %25 = vector.shape_cast %22 : vector<1x64xf32> to vector<1x1x64xf32>
    tpu.vector_store %arg7[%c0_13, %c0_14, %c0_15], %25 {strides = array<i32>} : memref<1x1x64xf32, #tpu.memory_space<vmem>>, vector<1x1x64xf32>,
    return
  }
  func.func @transform_0(%arg0: i32, %arg1: memref<8xi32, #tpu.memory_space<smem>>) -> (i32, i32, i32) {
    %c0_i32 = arith.constant 0 : i32
    %c0_i32_0 = arith.constant 0 : i32
    %c0_i32_1 = arith.constant 0 : i32
    return %arg0, %c0_i32, %c0_i32_0 : i32, i32, i32
  }
  func.func @transform_1(%arg0: i32, %arg1: memref<8xi32, #tpu.memory_space<smem>>) -> (i32, i32) {
    %c0_i32 = arith.constant 0 : i32
    %c0_i32_0 = arith.constant 0 : i32
    %c0_i32_1 = arith.constant 0 : i32
    return %c0_i32, %c0_i32_0 : i32, i32
  }
  func.func @transform_2(%arg0: i32, %arg1: memref<8xi32, #tpu.memory_space<smem>>) -> (i32, i32, i32) {
    %0 = arith.index_cast %arg0 : i32 to index
    %1 = memref.load %arg1[%0] : memref<8xi32, #tpu.memory_space<smem>>
    %c0_i32 = arith.constant 0 : i32
    %c0_i32_0 = arith.constant 0 : i32
    %c0_i32_1 = arith.constant 0 : i32
    return %1, %c0_i32, %c0_i32_0 : i32, i32, i32
  }
  func.func @transform_3(%arg0: i32, %arg1: memref<8xi32, #tpu.memory_space<smem>>) -> (i32, i32) {
    %c0_i32 = arith.constant 0 : i32
    %c0_i32_0 = arith.constant 0 : i32
    %c0_i32_1 = arith.constant 0 : i32
    return %c0_i32, %c0_i32_0 : i32, i32
  }
  func.func @transform_4(%arg0: i32, %arg1: memref<8xi32, #tpu.memory_space<smem>>) -> (i32, i32) {
    %c0_i32 = arith.constant 0 : i32
    %c0_i32_0 = arith.constant 0 : i32
    %c0_i32_1 = arith.constant 0 : i32
    return %c0_i32, %c0_i32_0 : i32, i32
  }
  func.func @transform_5(%arg0: i32, %arg1: memref<8xi32, #tpu.memory_space<smem>>) -> (i32, i32, i32) {
    %c0_i32 = arith.constant 0 : i32
    %c0_i32_0 = arith.constant 0 : i32
    %c0_i32_1 = arith.constant 0 : i32
    return %arg0, %c0_i32, %c0_i32_0 : i32, i32, i32
  }
}

module attributes {stable_mosaic.version = 11 : i64} {
  func.func @_library_mlp_kernel(%arg0: memref<8x64xf32, #tpu.memory_space<vmem>>, %arg1: memref<64x64xf32, #tpu.memory_space<vmem>>, %arg2: memref<1x64xf32, #tpu.memory_space<vmem>>, %arg3: memref<1x64xf32, #tpu.memory_space<vmem>>, %arg4: memref<1x64xf32, #tpu.memory_space<vmem>>, %arg5: memref<64x128xf32, #tpu.memory_space<vmem>>, %arg6: memref<1x128xf32, #tpu.memory_space<vmem>>, %arg7: memref<1x128xf32, #tpu.memory_space<vmem>>, %arg8: memref<1x128xf32, #tpu.memory_space<vmem>>, %arg9: memref<1x128xf32, #tpu.memory_space<vmem>>, %arg10: memref<1x1xf32, #tpu.memory_space<vmem>>, %arg11: memref<8x1xf32, #tpu.memory_space<vmem>>) attributes {dimension_semantics = [], scalar_prefetch = 0 : i64, scratch_operands = 0 : i64, tpu.core_type = #tpu.core_type<tc>} {
    %c0 = arith.constant 0 : index
    %c0_0 = arith.constant 0 : index
    %0 = vector.load %arg0[%c0, %c0_0] : memref<8x64xf32, #tpu.memory_space<vmem>>, vector<8x64xf32>
    %c0_1 = arith.constant 0 : index
    %c0_2 = arith.constant 0 : index
    %1 = vector.load %arg1[%c0_1, %c0_2] : memref<64x64xf32, #tpu.memory_space<vmem>>, vector<64x64xf32>
    %cst = arith.constant dense<0.000000e+00> : vector<8x64xf32>
    %2 = tpu.matmul %0, %1, %cst {dimension_numbers = #tpu.dot_dimension_numbers<[1], [0], [0], [1], [0, 0, 1, 1], [], []>} : vector<8x64xf32>, vector<64x64xf32>, vector<8x64xf32> -> vector<8x64xf32>
    %c0_3 = arith.constant 0 : index
    %c0_4 = arith.constant 0 : index
    %3 = vector.load %arg2[%c0_3, %c0_4] : memref<1x64xf32, #tpu.memory_space<vmem>>, vector<1x64xf32>
    %4 = vector.broadcast %3 : vector<1x64xf32> to vector<8x64xf32>
    %5 = arith.addf %2, %4 : vector<8x64xf32>
    %c0_5 = arith.constant 0 : index
    %c0_6 = arith.constant 0 : index
    %6 = vector.load %arg3[%c0_5, %c0_6] : memref<1x64xf32, #tpu.memory_space<vmem>>, vector<1x64xf32>
    %7 = vector.broadcast %6 : vector<1x64xf32> to vector<8x64xf32>
    %8 = arith.mulf %5, %7 : vector<8x64xf32>
    %c0_7 = arith.constant 0 : index
    %c0_8 = arith.constant 0 : index
    %9 = vector.load %arg4[%c0_7, %c0_8] : memref<1x64xf32, #tpu.memory_space<vmem>>, vector<1x64xf32>
    %10 = vector.broadcast %9 : vector<1x64xf32> to vector<8x64xf32>
    %11 = arith.addf %8, %10 : vector<8x64xf32>
    %cst_9 = arith.constant 0.000000e+00 : f32
    %12 = vector.broadcast %cst_9 : f32 to vector<8x64xf32>
    %13 = arith.maximumf %11, %12 : vector<8x64xf32>
    %c0_10 = arith.constant 0 : index
    %c0_11 = arith.constant 0 : index
    %14 = vector.load %arg5[%c0_10, %c0_11] : memref<64x128xf32, #tpu.memory_space<vmem>>, vector<64x128xf32>
    %cst_12 = arith.constant dense<0.000000e+00> : vector<8x128xf32>
    %15 = tpu.matmul %13, %14, %cst_12 {dimension_numbers = #tpu.dot_dimension_numbers<[1], [0], [0], [1], [0, 0, 1, 1], [], []>} : vector<8x64xf32>, vector<64x128xf32>, vector<8x128xf32> -> vector<8x128xf32>
    %c0_13 = arith.constant 0 : index
    %c0_14 = arith.constant 0 : index
    %16 = vector.load %arg6[%c0_13, %c0_14] : memref<1x128xf32, #tpu.memory_space<vmem>>, vector<1x128xf32>
    %17 = vector.broadcast %16 : vector<1x128xf32> to vector<8x128xf32>
    %18 = arith.addf %15, %17 : vector<8x128xf32>
    %c0_15 = arith.constant 0 : index
    %c0_16 = arith.constant 0 : index
    %19 = vector.load %arg7[%c0_15, %c0_16] : memref<1x128xf32, #tpu.memory_space<vmem>>, vector<1x128xf32>
    %20 = vector.broadcast %19 : vector<1x128xf32> to vector<8x128xf32>
    %21 = arith.mulf %18, %20 : vector<8x128xf32>
    %c0_17 = arith.constant 0 : index
    %c0_18 = arith.constant 0 : index
    %22 = vector.load %arg8[%c0_17, %c0_18] : memref<1x128xf32, #tpu.memory_space<vmem>>, vector<1x128xf32>
    %23 = vector.broadcast %22 : vector<1x128xf32> to vector<8x128xf32>
    %24 = arith.addf %21, %23 : vector<8x128xf32>
    %cst_19 = arith.constant 0.000000e+00 : f32
    %25 = vector.broadcast %cst_19 : f32 to vector<8x128xf32>
    %26 = arith.maximumf %24, %25 : vector<8x128xf32>
    %c0_20 = arith.constant 0 : index
    %c0_21 = arith.constant 0 : index
    %27 = vector.load %arg9[%c0_20, %c0_21] : memref<1x128xf32, #tpu.memory_space<vmem>>, vector<1x128xf32>
    %28 = vector.broadcast %27 : vector<1x128xf32> to vector<8x128xf32>
    %29 = arith.mulf %26, %28 : vector<8x128xf32>
    %cst_22 = arith.constant dense<0.000000e+00> : vector<8xf32>
    %30 = vector.multi_reduction <add>, %29, %cst_22 [1] : vector<8x128xf32> to vector<8xf32>
    %31 = vector.shape_cast %30 : vector<8xf32> to vector<8x1xf32>
    %c0_23 = arith.constant 0 : index
    %c0_24 = arith.constant 0 : index
    %32 = vector.load %arg10[%c0_23, %c0_24] : memref<1x1xf32, #tpu.memory_space<vmem>>, vector<1x1xf32>
    %33 = vector.broadcast %32 : vector<1x1xf32> to vector<8x1xf32>
    %34 = arith.addf %31, %33 : vector<8x1xf32>
    %cst_25 = arith.constant 0.000000e+00 : f32
    %35 = vector.broadcast %cst_25 : f32 to vector<8x1xf32>
    %36 = arith.maximumf %34, %35 : vector<8x1xf32>
    %37 = math.absf %34 : vector<8x1xf32>
    %cst_26 = arith.constant 0.000000e+00 : f32
    %38 = vector.broadcast %cst_26 : f32 to vector<8x1xf32>
    %39 = arith.subf %38, %37 : vector<8x1xf32>
    %40 = math.exp %39 : vector<8x1xf32>
    %41 = math.log1p %40 : vector<8x1xf32>
    %42 = arith.addf %36, %41 : vector<8x1xf32>
    %c0_27 = arith.constant 0 : index
    %c0_28 = arith.constant 0 : index
    %43 = vector.load %arg11[%c0_27, %c0_28] : memref<8x1xf32, #tpu.memory_space<vmem>>, vector<8x1xf32>
    tpu.vector_store %arg11[%c0_27, %c0_28], %42 {strides = array<i32>} : memref<8x1xf32, #tpu.memory_space<vmem>>, vector<8x1xf32>,
    return
  }
}

module attributes {stable_mosaic.version = 11 : i64} {
  func.func @_decoder_softmax_kernel(%arg0: i32, %arg1: memref<8xi32, #tpu.memory_space<smem>>, %arg2: memref<1x8x1xf32, #tpu.memory_space<vmem>>, %arg3: memref<8x256xbf16, #tpu.memory_space<vmem>>, %arg4: memref<1x1x256xf32, #tpu.memory_space<vmem>>, %arg5: memref<1x256xf32, #tpu.memory_space<vmem>>, %arg6: memref<1x256xf32, #tpu.memory_space<vmem>>, %arg7: memref<1x1x256xf32, #tpu.memory_space<vmem>>) attributes {dimension_semantics = [#tpu.dimension_semantics<parallel>], iteration_bounds = array<i64: 8>, scalar_prefetch = 1 : i64, scratch_operands = 0 : i64, tpu.core_type = #tpu.core_type<tc>, window_params = [{transform_indices = @transform_0, window_bounds = array<i64: 1, 8, 1>}, {pipeline_mode = #tpu.pipeline_mode<synchronous>, transform_indices = @transform_1, window_bounds = array<i64: 8, 256>}, {transform_indices = @transform_2, window_bounds = array<i64: 1, 1, 256>}, {pipeline_mode = #tpu.pipeline_mode<synchronous>, transform_indices = @transform_3, window_bounds = array<i64: 1, 256>}, {pipeline_mode = #tpu.pipeline_mode<synchronous>, transform_indices = @transform_4, window_bounds = array<i64: 1, 256>}, {transform_indices = @transform_5, window_bounds = array<i64: 1, 1, 256>}]} {
    %c0 = arith.constant 0 : index
    %c0_0 = arith.constant 0 : index
    %c0_1 = arith.constant 0 : index
    %0 = vector.load %arg2[%c0, %c0_0, %c0_1] : memref<1x8x1xf32, #tpu.memory_space<vmem>>, vector<1x8x1xf32>
    %1 = vector.shape_cast %0 : vector<1x8x1xf32> to vector<8x1xf32>
    %c0_2 = arith.constant 0 : index
    %c0_3 = arith.constant 0 : index
    %2 = vector.load %arg3[%c0_2, %c0_3] : memref<8x256xbf16, #tpu.memory_space<vmem>>, vector<8x256xbf16>
    %3 = arith.extf %2 : vector<8x256xbf16> to vector<8x256xf32>
    %4 = vector.broadcast %1 : vector<8x1xf32> to vector<8x256xf32>
    %5 = arith.mulf %3, %4 : vector<8x256xf32>
    %cst = arith.constant dense<0.000000e+00> : vector<256xf32>
    %6 = vector.multi_reduction <add>, %5, %cst [0] : vector<8x256xf32> to vector<256xf32>
    %7 = vector.shape_cast %6 : vector<256xf32> to vector<1x256xf32>
    %c0_4 = arith.constant 0 : index
    %c0_5 = arith.constant 0 : index
    %c0_6 = arith.constant 0 : index
    %8 = vector.load %arg4[%c0_4, %c0_5, %c0_6] : memref<1x1x256xf32, #tpu.memory_space<vmem>>, vector<1x1x256xf32>
    %9 = vector.shape_cast %8 : vector<1x1x256xf32> to vector<1x256xf32>
    %10 = arith.addf %7, %9 : vector<1x256xf32>
    %c0_7 = arith.constant 0 : index
    %c0_8 = arith.constant 0 : index
    %11 = vector.load %arg5[%c0_7, %c0_8] : memref<1x256xf32, #tpu.memory_space<vmem>>, vector<1x256xf32>
    %12 = arith.mulf %10, %11 : vector<1x256xf32>
    %c0_9 = arith.constant 0 : index
    %c0_10 = arith.constant 0 : index
    %13 = vector.load %arg6[%c0_9, %c0_10] : memref<1x256xf32, #tpu.memory_space<vmem>>, vector<1x256xf32>
    %14 = arith.addf %12, %13 : vector<1x256xf32>
    %cst_11 = arith.constant dense<0xFF800000> : vector<1xf32>
    %15 = vector.multi_reduction <maximumf>, %14, %cst_11 [1] : vector<1x256xf32> to vector<1xf32>
    %16 = vector.shape_cast %15 : vector<1xf32> to vector<1x1xf32>
    %17 = vector.broadcast %16 : vector<1x1xf32> to vector<1x256xf32>
    %18 = arith.subf %14, %17 : vector<1x256xf32>
    %19 = math.exp %18 : vector<1x256xf32>
    %cst_12 = arith.constant dense<0.000000e+00> : vector<1xf32>
    %20 = vector.multi_reduction <add>, %19, %cst_12 [1] : vector<1x256xf32> to vector<1xf32>
    %21 = vector.shape_cast %20 : vector<1xf32> to vector<1x1xf32>
    %22 = vector.broadcast %21 : vector<1x1xf32> to vector<1x256xf32>
    %23 = arith.divf %19, %22 : vector<1x256xf32>
    %c0_13 = arith.constant 0 : index
    %c0_14 = arith.constant 0 : index
    %c0_15 = arith.constant 0 : index
    %24 = vector.load %arg7[%c0_13, %c0_14, %c0_15] : memref<1x1x256xf32, #tpu.memory_space<vmem>>, vector<1x1x256xf32>
    %25 = vector.shape_cast %24 : vector<1x1x256xf32> to vector<1x256xf32>
    %26 = vector.shape_cast %23 : vector<1x256xf32> to vector<1x1x256xf32>
    tpu.vector_store %arg7[%c0_13, %c0_14, %c0_15], %26 {strides = array<i32>} : memref<1x1x256xf32, #tpu.memory_space<vmem>>, vector<1x1x256xf32>,
    return
  }
  func.func @transform_0(%arg0: i32, %arg1: memref<8xi32, #tpu.memory_space<smem>>) -> (i32, i32, i32) {
    %c0_i32 = arith.constant 0 : i32
    %c0_i32_0 = arith.constant 0 : i32
    %c0_i32_1 = arith.constant 0 : i32
    return %arg0, %c0_i32, %c0_i32_0 : i32, i32, i32
  }
  func.func @transform_1(%arg0: i32, %arg1: memref<8xi32, #tpu.memory_space<smem>>) -> (i32, i32) {
    %c0_i32 = arith.constant 0 : i32
    %c0_i32_0 = arith.constant 0 : i32
    %c0_i32_1 = arith.constant 0 : i32
    return %c0_i32, %c0_i32_0 : i32, i32
  }
  func.func @transform_2(%arg0: i32, %arg1: memref<8xi32, #tpu.memory_space<smem>>) -> (i32, i32, i32) {
    %0 = arith.index_cast %arg0 : i32 to index
    %1 = memref.load %arg1[%0] : memref<8xi32, #tpu.memory_space<smem>>
    %c0_i32 = arith.constant 0 : i32
    %c0_i32_0 = arith.constant 0 : i32
    %c0_i32_1 = arith.constant 0 : i32
    return %1, %c0_i32, %c0_i32_0 : i32, i32, i32
  }
  func.func @transform_3(%arg0: i32, %arg1: memref<8xi32, #tpu.memory_space<smem>>) -> (i32, i32) {
    %c0_i32 = arith.constant 0 : i32
    %c0_i32_0 = arith.constant 0 : i32
    %c0_i32_1 = arith.constant 0 : i32
    return %c0_i32, %c0_i32_0 : i32, i32
  }
  func.func @transform_4(%arg0: i32, %arg1: memref<8xi32, #tpu.memory_space<smem>>) -> (i32, i32) {
    %c0_i32 = arith.constant 0 : i32
    %c0_i32_0 = arith.constant 0 : i32
    %c0_i32_1 = arith.constant 0 : i32
    return %c0_i32, %c0_i32_0 : i32, i32
  }
  func.func @transform_5(%arg0: i32, %arg1: memref<8xi32, #tpu.memory_space<smem>>) -> (i32, i32, i32) {
    %c0_i32 = arith.constant 0 : i32
    %c0_i32_0 = arith.constant 0 : i32
    %c0_i32_1 = arith.constant 0 : i32
    return %arg0, %c0_i32, %c0_i32_0 : i32, i32, i32
  }
}

</mosaic_0001>

<bundles_post_ra>
// kernel: scdori_forward.12
= control target key start
LH: loop header
LB: loop body
LE: loop exit
PB: predicated region body
PF: predicated region fallthrough
CT: control target
= control target key end

     0   :  { %s817_s0 = inlined_call_operand.vmem [shape: bf16[8,256], index: 0, kind: input, shape index: {}]   ;;  %s818_s1 = inlined_call_operand.vmem [shape: bf16[256,128], index: 1, kind: input, shape index: {}]   ;;  %s819_s2 = inlined_call_operand.vmem [shape: bf16[256,128], index: 2, kind: input, shape index: {}]   ;;  %s820_s5 = inlined_call_operand.vmem [shape: f32[1,128], index: 5, kind: output, shape index: {2}]   ;;  %s821_s4 = inlined_call_operand.vmem [shape: f32[8,256], index: 4, kind: output, shape index: {1}]   ;;  %s822_s3 = inlined_call_operand.vmem [shape: f32[8,128], index: 3, kind: output, shape index: {0}]  }
   0x1   :  { %v17_v0 = vld [vmem:[%s817_s0] sm:$0xff]  ;;  %v491_v26 = vld [vmem:[%s818_s1 + $0x48] sm:$0xff]   ;;  %v484_v40 = vld [vmem:[%s818_s1 + $0x10] sm:$0xff]  }
   0x2   :  { %v18_v1 = vunpack.c.l.bf16 %v17_v0  ;;  %v19_v2 = vunpack.c.h.bf16 %v17_v0  ;;  %v490_v12 = vld [vmem:[%s818_s1 + $0x40] sm:$0xff]   ;;  %v506_v27 = vld [vmem:[%s819_s2 + $0x48] sm:$0xff]   ;;  %v393_v33 = vunpack.c.l.bf16 %v491_v26  ;;  %v485_v41 = vld [vmem:[%s818_s1 + $0x18] sm:$0xff]   ;;  %v394_v44 = vunpack.c.h.bf16 %v491_v26 }
   0x3   :  { %v505_v13 = vld [vmem:[%s819_s2 + $0x40] sm:$0xff]   ;;  %v389_v14 = vunpack.c.l.bf16 %v490_v12  ;;  %v390_v15 = vunpack.c.h.bf16 %v490_v12  ;;  %v483_v31 = vld [vmem:[%s818_s1 + $0x8] sm:$0xff]   ;;  %v457_v34 = vunpack.c.l.bf16 %v506_v27  ;;  %v499_v42 = vld [vmem:[%s819_s2 + $0x10] sm:$0xff]   ;;  %v458_v45 = vunpack.c.h.bf16 %v506_v27 }
   0x4   :  { %v20_v3 = vmax.f32 %v18_v1, %v19_v2  ;;  %v453_v16 = vunpack.c.l.bf16 %v505_v13  ;;  %v454_v17 = vunpack.c.h.bf16 %v505_v13  ;;  %v356_v18 = vld [vmem:[%s818_s1] sm:$0xff]   ;;  %v498_v32 = vld [vmem:[%s819_s2 + $0x8] sm:$0xff]   ;;  %v361_v36 = vunpack.c.l.bf16 %v483_v31  ;;  %v500_v43 = vld [vmem:[%s819_s2 + $0x18] sm:$0xff]  }
   0x5   :  { %v420_v19 = vld [vmem:[%s819_s2] sm:$0xff]   ;;  %v357_v20 = vunpack.c.l.bf16 %v356_v18  ;;  %v358_v21 = vunpack.c.h.bf16 %v356_v18  ;;  %v362_v37 = vunpack.c.h.bf16 %v483_v31  ;;  %v425_v38 = vunpack.c.l.bf16 %v498_v32  ;;  %v492_v49 = vld [vmem:[%s818_s1 + $0x50] sm:$0xff]   ;;  %v684_v55 = vld [vmem:[%s818_s1 + $0x28] sm:$0xff]  }
   0x6   :  { %21 = vmax.xlane.f32.xlu0 %v20_v3  ;;  %v421_v22 = vunpack.c.l.bf16 %v420_v19  ;;  %v422_v23 = vunpack.c.h.bf16 %v420_v19  ;;  %v643_v24 = vmul.f32 %v453_v16, %v389_v14  ;;  %v645_v25 = vmul.f32 %v454_v17, %v390_v15  ;;  %v486_v54 = vld [vmem:[%s818_s1 + $0x20] sm:$0xff]   ;;  %v692_v61 = vld [vmem:[%s819_s2 + $0x28] sm:$0xff]   ;;  %v493_v13 = vld [vmem:[%s818_s1 + $0x58] sm:$0xff]  }
   0x7   :  { %v426_v39 = vunpack.c.h.bf16 %v498_v32  ;;  %v201_v46 = vmul.f32 %v425_v38, %v361_v36  ;;  %v673_v48 = vmul.f32 %v457_v34, %v393_v33  ;;  %v365_v50 = vunpack.c.l.bf16 %v484_v40  ;;  %v501_v56 = vld [vmem:[%s819_s2 + $0x20] sm:$0xff]   ;;  %v508_v18 = vld [vmem:[%s819_s2 + $0x58] sm:$0xff]  }
   0x8   :  { %v199_v28 = vmul.f32 %v421_v22, %v357_v20  ;;  %v200_v29 = vmul.f32 %v422_v23, %v358_v21  ;;  %v548_v30 = vpack.c.bf16 %v645_v25, %v643_v24  ;;  %v366_v51 = vunpack.c.h.bf16 %v484_v40  ;;  %v494_v23 = vld [vmem:[%s818_s1 + $0x60] sm:$0xff]  }
   0x9   :  { %v202_v47 = vmul.f32 %v426_v39, %v362_v37  ;;  %v369_v52 = vunpack.c.l.bf16 %v485_v41  ;;  %v370_v53 = vunpack.c.h.bf16 %v485_v41  ;;  %v429_v57 = vunpack.c.l.bf16 %v499_v42 }
   0xa   :  { %549 = vmatprep.subr.bf16.mxu0 %v548_v30  ;;  %v550_v35 = vpack.c.bf16 %v200_v29, %v199_v28  ;;  %v430_v58 = vunpack.c.h.bf16 %v499_v42  ;;  %v433_v59 = vunpack.c.l.bf16 %v500_v43  ;;  %v434_v60 = vunpack.c.h.bf16 %v500_v43  ;;  %v509_v30 = vld [vmem:[%s819_s2 + $0x60] sm:$0xff]  }
   0xb   :  { %v302_v62 = vadd.f32 %v200_v29, %v199_v28  ;;  %v694_v63 = vmul.f32 %v458_v45, %v394_v44  ;;  %v397_v0 = vunpack.c.l.bf16 %v492_v49  ;;  %v374_v3 = vunpack.c.h.bf16 %v486_v54  ;;  %v510_v44 = vld [vmem:[%s819_s2 + $0x68] sm:$0xff]  }
   0xc   :  { %551 = vmatpush3.bf16.msra.mxu0 %v550_v35  ;;  %v442_v12 = vunpack.c.h.bf16 %v692_v61  ;;  %v203_v14 = vmul.f32 %v429_v57, %v365_v50  ;;  %v204_v15 = vmul.f32 %v430_v58, %v366_v51  ;;  %v706_v16 = vmul.f32 %v433_v59, %v369_v52  ;;  %v495_v35 = vld [vmem:[%s818_s1 + $0x68] sm:$0xff]   ;;  %v496_v50 = vld [vmem:[%s818_s1 + $0x70] sm:$0xff]  }
   0xd   :  { %v708_v17 = vmul.f32 %v434_v60, %v370_v53  ;;  %v303_v19 = vadd.f32 %v302_v62, %v201_v46  ;;  %v552_v20 = vpack.c.bf16 %v694_v63, %v673_v48  ;;  %v554_v21 = vpack.c.bf16 %v202_v47, %v201_v46  ;;  %v511_v51 = vld [vmem:[%s819_s2 + $0x70] sm:$0xff]  }
   0xe   :  { %v401_v28 = vunpack.c.l.bf16 %v493_v13  ;;  %v402_v29 = vunpack.c.h.bf16 %v493_v13  ;;  %v465_v33 = vunpack.c.l.bf16 %v508_v18  ;;  %v466_v34 = vunpack.c.h.bf16 %v508_v18  ;;  %v488_v57 = vld [vmem:[%s818_s1 + $0x30] sm:$0xff]  }
   0xf   :  { %v304_v31 = vadd.f32 %v303_v19, %v202_v47  ;;  %553 = vmatprep.subr.bf16.mxu0 %v552_v20  ;;  %v558_v37 = vpack.c.bf16 %v204_v15, %v203_v14  ;;  %v405_v38 = vunpack.c.l.bf16 %v494_v23  ;;  %v406_v39 = vunpack.c.h.bf16 %v494_v23  ;;  %v503_v58 = vld [vmem:[%s819_s2 + $0x30] sm:$0xff]  }
  0x10   :  { %555 = vmatpush3.bf16.msra.mxu0 %v554_v21  ;;  %v730_v41 = vmul.f32 %v465_v33, %v401_v28  ;;  %v732_v42 = vmul.f32 %v466_v34, %v402_v29  ;;  %v469_v43 = vunpack.c.l.bf16 %v509_v30  ;;  %v470_v47 = vunpack.c.h.bf16 %v509_v30  ;;  %v512_v21 = vld [vmem:[%s819_s2 + $0x78] sm:$0xff]  }
  0x11   :  { %v305_v40 = vadd.f32 %v304_v31, %v203_v14  ;;  %v562_v59 = vpack.c.bf16 %v708_v17, %v706_v16  ;;  %v473_v62 = vunpack.c.l.bf16 %v510_v44  ;;  %v478_v14 = vunpack.c.h.bf16 %v511_v51  ;;  %v504_v29 = vld [vmem:[%s819_s2 + $0x38] sm:$0xff]  }
  0x12   :  { %v560_v53 = vpack.c.bf16 %v732_v42, %v730_v41  ;;  %v757_v60 = vmul.f32 %v470_v47, %v406_v39  ;;  %v381_v18 = vunpack.c.l.bf16 %v488_v57  ;;  %v382_v19 = vunpack.c.h.bf16 %v488_v57 }
  0x13   :  { %v306_v52 = vadd.f32 %v305_v40, %v204_v15  ;;  %v497_v15 = vld [vmem:[%s818_s1 + $0x78] sm:$0xff]   ;;  %v482_v31 = vunpack.c.h.bf16 %v512_v21 }
  0x93   :  { %v22_v4 = vpop.xlane.xlu0 %21 }
  0x94   :  { %v23_v5 = vsub.f32 %v18_v1, %v22_v4  ;;  %v24_v6 = vsub.f32 %v19_v2, %v22_v4  ;;  %v398_v1 = vunpack.c.h.bf16 %v492_v49  ;;  %v373_v2 = vunpack.c.l.bf16 %v486_v54 }
  0x95   :  { %v377_v4 = vunpack.c.l.bf16 %v684_v55  ;;  %v409_v49 = vunpack.c.l.bf16 %v495_v35  ;;  %v747_v54 = vmul.f32 %v469_v43, %v405_v38  ;;  %v450_v38 = vunpack.c.h.bf16 %v504_v29 }
  0x96   :  { %v25_v7 = vmul.f32 1.442695, %v23_v5  ;;  %v27_v8 = vmul.f32 1.442695, %v24_v6  ;;  %v437_v5 = vunpack.c.l.bf16 %v501_v56  ;;  %v507_v6 = vld [vmem:[%s819_s2 + $0x50] sm:$0xff]  }
  0x97   :  { %v461_v22 = vunpack.c.l.bf16 %v507_v6  ;;  %v462_v27 = vunpack.c.h.bf16 %v507_v6  ;;  %v564_v6 = vpack.c.bf16 %v757_v60, %v747_v54 }
  0x98   :  { %580 = vpow2.f32 %v25_v7  ;;  %v378_v7 = vunpack.c.h.bf16 %v684_v55  ;;  %v718_v26 = vmul.f32 %v437_v5, %v373_v2  ;;  %v413_v2 = vunpack.c.l.bf16 %v496_v50 }
  0x99   :  { %582 = vpow2.f32 %v27_v8  ;;  %v438_v8 = vunpack.c.h.bf16 %v501_v56  ;;  %v723_v32 = vmul.f32 %v461_v22, %v397_v0  ;;  %v728_v36 = vmul.f32 %v462_v27, %v398_v1 }
  0x9a   :  { %v410_v56 = vunpack.c.h.bf16 %v495_v35  ;;  %v474_v0 = vunpack.c.h.bf16 %v510_v44  ;;  %v307_v1 = vadd.f32 %v306_v52, %v706_v16  ;;  %v477_v5 = vunpack.c.l.bf16 %v511_v51 }
  0x9b   :  { %v208_v45 = vmul.f32 %v438_v8, %v374_v3  ;;  %v556_v46 = vpack.c.bf16 %v728_v36, %v723_v32  ;;  %v414_v3 = vunpack.c.h.bf16 %v496_v50  ;;  %v762_v8 = vmul.f32 %v473_v62, %v409_v49 }
  0x9c   :  { %v764_v13 = vmul.f32 %v474_v0, %v410_v56  ;;  %v445_v16 = vunpack.c.l.bf16 %v503_v58  ;;  %v308_v20 = vadd.f32 %v307_v1, %v708_v17  ;;  %v446_v22 = vunpack.c.h.bf16 %v503_v58  ;;  %v489_v17 = vld [vmem:[%s818_s1 + $0x38] sm:$0xff]  }
  0x9d   :  { %557 = vmatprep.subr.bf16.mxu0 %v556_v46  ;;  %v210_v27 = vmul.f32 %v442_v12, %v378_v7  ;;  %v566_v28 = vpack.c.bf16 %v208_v45, %v718_v26  ;;  %v227_v55 = vmul.f32 %v477_v5, %v413_v2  ;;  %v418_v7 = vunpack.c.h.bf16 %v497_v15 }
  0x9e   :  { %559 = vmatpush3.bf16.msra.mxu0 %v558_v37  ;;  %v309_v30 = vadd.f32 %v308_v20, %v718_v26  ;;  %v481_v12 = vunpack.c.l.bf16 %v512_v21  ;;  %v385_v34 = vunpack.c.l.bf16 %v489_v17  ;;  %v386_v35 = vunpack.c.h.bf16 %v489_v17 }
  0x9f   :  { %561 = vmatprep.subr.bf16.mxu0 %v560_v53  ;;  %v449_v37 = vunpack.c.l.bf16 %v504_v29  ;;  %v211_v39 = vmul.f32 %v445_v16, %v381_v18  ;;  %v212_v40 = vmul.f32 %v446_v22, %v382_v19  ;;  %v230_v47 = vmul.f32 %v482_v31, %v418_v7 }
  0xa0   :  { %v310_v33 = vadd.f32 %v309_v30, %v208_v45  ;;  %v214_v51 = vmul.f32 %v450_v38, %v386_v35 }
  0xa1   :  { %v213_v50 = vmul.f32 %v449_v37, %v385_v34  ;;  %v574_v53 = vpack.c.bf16 %v212_v40, %v211_v39 }
  0xa2   :  { %v625_v9 = vpop.eup %580  ;;  %563 = vmatpush3.bf16.msra.mxu0 %v562_v59 }
  0xa3   :  { %v627_v10 = vpop.eup %582  ;;  %565 = vmatprep.subr.bf16.mxu0 %v564_v6  ;;  %v578_v58 = vpack.c.bf16 %v214_v51, %v213_v50 }
  0xa4   :  { %v29_v11 = vadd.f32 %v627_v10, %v625_v9 }
  0xa6   :  { %30 = vadd.xlane.f32.xlu0 %v29_v11  ;;  %v441_v11 = vunpack.c.l.bf16 %v692_v61  ;;  %v228_v61 = vmul.f32 %v478_v14, %v414_v3  ;;  %567 = vmatpush3.bf16.msra.mxu0 %v566_v28 }
  0xa8   :  { %v209_v23 = vmul.f32 %v441_v11, %v377_v4  ;;  %v568_v4 = vpack.c.bf16 %v764_v13, %v762_v8  ;;  %v417_v11 = vunpack.c.l.bf16 %v497_v15  ;;  %v572_v44 = vpack.c.bf16 %v228_v61, %v227_v55 }
  0xaa   :  { %v311_v43 = vadd.f32 %v310_v33, %v209_v23  ;;  %v570_v26 = vpack.c.bf16 %v210_v27, %v209_v23  ;;  %569 = vmatprep.subr.bf16.mxu0 %v568_v4  ;;  %v229_v46 = vmul.f32 %v481_v12, %v417_v11 }
  0xac   :  { %v312_v49 = vadd.f32 %v311_v43, %v210_v27  ;;  %571 = vmatpush3.bf16.msra.mxu0 %v570_v26  ;;  %v576_v45 = vpack.c.bf16 %v230_v47, %v229_v46 }
  0xad   :  { %573 = vmatprep.subr.bf16.mxu0 %v572_v44 }
  0xae   :  { %v313_v52 = vadd.f32 %v312_v49, %v211_v39 }
  0xb0   :  { %v314_v56 = vadd.f32 %v313_v52, %v212_v40  ;;  %575 = vmatpush3.bf16.msra.mxu0 %v574_v53 }
  0xb1   :  { %577 = vmatprep.subr.bf16.mxu0 %v576_v45 }
  0xb2   :  { %v315_v57 = vadd.f32 %v314_v56, %v213_v50 }
  0xb4   :  { %v316_v59 = vadd.f32 %v315_v57, %v214_v51  ;;  %579 = vmatpush3.bf16.msra.mxu0 %v578_v58 }
  0xb6   :  { %v317_v62 = vadd.f32 %v316_v59, %v643_v24 }
  0xb8   :  { %v318_v0 = vadd.f32 %v317_v62, %v645_v25 }
  0xba   :  { %v319_v1 = vadd.f32 %v318_v0, %v673_v48 }
  0xbc   :  { %v320_v2 = vadd.f32 %v319_v1, %v694_v63 }
  0xbe   :  { %v321_v3 = vadd.f32 %v320_v2, %v723_v32 }
  0xc0   :  { %v322_v5 = vadd.f32 %v321_v3, %v728_v36 }
  0xc2   :  { %v323_v6 = vadd.f32 %v322_v5, %v730_v41 }
  0xc4   :  { %v324_v14 = vadd.f32 %v323_v6, %v732_v42 }
  0xc6   :  { %v325_v15 = vadd.f32 %v324_v14, %v747_v54 }
  0xc8   :  { %v326_v18 = vadd.f32 %v325_v15, %v757_v60 }
  0xca   :  { %v327_v24 = vadd.f32 %v326_v18, %v762_v8 }
  0xcc   :  { %v328_v25 = vadd.f32 %v327_v24, %v764_v13 }
  0xce   :  { %v329_v19 = vadd.f32 %v328_v25, %v227_v55 }
  0xd0   :  { %v330_v48 = vadd.f32 %v329_v19, %v228_v61 }
  0xd2   :  { %v331_v16 = vadd.f32 %v330_v48, %v229_v46 }
  0xd4   :  { %v332_v63 = vadd.f32 %v331_v16, %v230_v47 }
  0xd6   :  { %v333_v20 = vrot.slane %v332_v63, 4 }
  0xd8   :  { %v334_v32 = vadd.f32 %v333_v20, %v332_v63 }
  0xda   :  { %v335_v21 = vrot.slane %v334_v32, 2 }
  0xdc   :  { %v336_v36 = vadd.f32 %v335_v21, %v334_v32 }
  0xde   :  { %v337_v22 = vrot.slane %v336_v36, 1 }
  0xe0   :  { %v338_v41 = vadd.f32 %v337_v22, %v336_v36 }
  0xe2   :  { %v339_v23 = vadd.f32 1e-07, %v338_v41 }
  0xe4   :  { %584 = vrcp.f32 %v339_v23 }
  0xee   :  { %v585_v42 = vpop.eup %584 }
  0xef   :  { %342 = vst [vmem:[%s820_s5] sm:$0x1] %v585_v42 }
 0x133   :  { %v31_v54 = vpop.xlane.xlu0 %30 }
 0x134   :  { %586 = vrcp.f32 %v31_v54 }
 0x13e   :  { %v587_v60 = vpop.eup %586 }
 0x13f   :  { %v33_v8 = vmul.f32 %v587_v60, %v625_v9  ;;  %v34_v13 = vmul.f32 %v587_v60, %v627_v10 }
 0x141   :  { %35 = vst [vmem:[%s821_s4] sm:$0xff] %v33_v8  ;;  %36 = vst [vmem:[%s821_s4 + $0x8] sm:$0xff] %v34_v13  ;;  %v43_v27 = vrot.slane %v34_v13, 4  ;;  %v37_v28 = vrot.slane %v33_v8, 4 }
 0x143   :  { %v44_v17 = vmin.f32 %v34_v13, %v43_v27  ;;  %v56_v29 = vmax.f32 %v34_v13, %v43_v27  ;;  %v38_v30 = vmin.f32 %v33_v8, %v37_v28  ;;  %v50_v4 = vmax.f32 %v33_v8, %v37_v28 }
 0x145   :  { %v45_v55 = vrot.slane %v44_v17, 2  ;;  %v57_v11 = vrot.slane %v56_v29, 2  ;;  %v39_v61 = vrot.slane %v38_v30, 2  ;;  %v51_v9 = vrot.slane %v50_v4, 2 }
 0x147   :  { %v46_v7 = vmin.f32 %v44_v17, %v45_v55  ;;  %v58_v10 = vmax.f32 %v56_v29, %v57_v11  ;;  %v40_v12 = vmin.f32 %v38_v30, %v39_v61  ;;  %v52_v31 = vmax.f32 %v50_v4, %v51_v9 }
 0x149   :  { %v47_v33 = vrot.slane %v46_v7, 1  ;;  %v59_v34 = vrot.slane %v58_v10, 1  ;;  %v41_v35 = vrot.slane %v40_v12, 1  ;;  %v53_v37 = vrot.slane %v52_v31, 1 }
 0x14b   :  { %v48_v38 = vmin.f32 %v46_v7, %v47_v33  ;;  %v60_v39 = vmax.f32 %v58_v10, %v59_v34  ;;  %v42_v40 = vmin.f32 %v40_v12, %v41_v35  ;;  %v54_v43 = vmax.f32 %v52_v31, %v53_v37 }
 0x14d   :  { %v64_v26 = vsub.f32 %v60_v39, %v48_v38  ;;  %v63_v44 = vsub.f32 %v54_v43, %v42_v40  ;;  %v62_v49 = vsub.f32 %v34_v13, %v48_v38  ;;  %v61_v51 = vsub.f32 %v33_v8, %v42_v40 }
 0x14f   :  { %v66_v46 = vadd.f32 1e-08, %v64_v26  ;;  %v65_v47 = vadd.f32 1e-08, %v63_v44 }
 0x151   :  { %588 = vrcp.f32 %v66_v46 }
 0x152   :  { %590 = vrcp.f32 %v65_v47 }
 0x15b   :  { %v589_v50 = vpop.eup %588 }
 0x15c   :  { %v591_v52 = vpop.eup %590  ;;  %v70_v53 = vmul.f32 %v589_v50, %v62_v49 }
 0x15d   :  { %v68_v45 = vmul.f32 %v591_v52, %v61_v51 }
 0x15e   :  { %295 = vmatprep.mubr.f32.mxu0 %v70_v53 }
 0x15f   :  { %296 = vmatmul.mubr.f32.vlgmr.msra.gmra.mrb[0].mxu0 %v68_v45 }
 0x232   :  { %v545_v56 = vpop.f32.mrb[0].mxu0 }
 0x233   :  { %v546_v57 = vpop.f32.mrb[1].mxu0 }
 0x234   :  { %v547_v58 = vadd.f32 %v546_v57, %v545_v56 }
 0x236   :  { %301 = vst [vmem:[%s822_s3] sm:$0xff] %v547_v58 }

// kernel: scdori_forward.15
= control target key start
LH: loop header
LB: loop body
LE: loop exit
PB: predicated region body
PF: predicated region fallthrough
CT: control target
= control target key end

     0   :  { %s453_s0 = inlined_call_operand.vmem [shape: s32[8], index: 0, kind: input, shape index: {}]   ;;  %s454_s1 = inlined_call_operand.vmem [shape: f32[8,8,1], index: 1, kind: input, shape index: {}]   ;;  %s455_s2 = inlined_call_operand.vmem [shape: f32[8,128], index: 2, kind: input, shape index: {}]   ;;  %s456_s3 = inlined_call_operand.vmem [shape: f32[8,1,128], index: 3, kind: input, shape index: {}]   ;;  %s457_s4 = inlined_call_operand.vmem [shape: f32[1,128], index: 4, kind: input, shape index: {}]   ;;  %s458_s5 = inlined_call_operand.vmem [shape: f32[1,128], index: 5, kind: input, shape index: {}]   ;;  %s459_s6 = inlined_call_operand.vmem [shape: f32[8,1,128], index: 6, kind: output, shape index: {}]  }
   0x1   :  { %s11_s23 = sshll.u32 %s453_s0, 4  ;;  %s12_s23 = int_to_ptr.vmem [resolvable:$true] %s11_s23 }
   0x2   :  { %s358_s24 = scalar_lea.vmem %s12_s23, 16  ;;  %p363_p1 = scmp.lt.s32.totalorder %s12_s23, %s12_s23 }
   0x3   :  { %p359_p0 = scmp.ne.s32.totalorder %s12_s23, %s358_s24  ;;  %p364_p2 = scmp.lt.s32.totalorder %s358_s24, %s358_s24 }
   0x5   :  { %p365_p3 = por %p364_p2, %p363_p1 }
   0x7   :  { %p366_p4 = pnand %p365_p3, %p359_p0 }
   0x9   :  { %369 = shalt.err (!%p366_p4)  }
   0xa   :  { %s380_s25 = smov [#allocation3]  }
   0xb   :  { %14 = dma.vmem_to_smem %s12_s23, 16, %s380_s25, [#allocation2] }
   0xc   :  { %374 = dma.done.wait [#allocation2], 16 }
   0xd   :  { %375 = vsyncadd [#allocation2], 4294967280 }
   0xe   :  { %16 = sfence }
   0xf   :  { %s420_s26 = smov 0  }
  0x10 LB: > { %s335_s0 = sadd.s32 4294967295, %s378_s26   ;;  %p339_p5 = scmp.ge.s32.totalorder %s378_s26, 1  ;;  %s378_s26 = sphi %s420_s26, %s22_s26  }
  0x11   : > { %p205_p6 = scmp.lt.s32.totalorder %s378_s26, 9 }
  0x13   : > { %p206_p7 = pnand %p339_p5, %p205_p6 }
  0x14   : > { %p234_p8 = scmp.lt.s32.totalorder (!%p206_p7), %s335_s0, 7  ;;  %v381_v0 = vmov (!%p206_p7), 0   ;;  %s238_s8 = sld [smem:[#allocation3 + %s335_s0]] (!%p206_p7)  ;;  %v247_v2 = vld [vmem:[%s455_s2] sm:$0xff] (!%p206_p7)  ;;  %vm266_vm0 = vcmask (!%p206_p7), 1040384  }
  0x15   : > { %209 = sbr.rel (%p206_p7) target bundleno = 496 (0x1f0), region = 40  ;;  %353 = vset.pattern.permute.xlu0 (!%p206_p7), %v381_v0  ;;  %v262_v12 = vld [vmem:[%s457_s4] sm:$0x1] (!%p206_p7) }
  0x16   : > { %v264_v14 = vld [vmem:[%s458_s5] sm:$0x1] (!%p206_p7) }
  0x1a   : > { %p239_p9 = scmp.lt.s32.totalorder (!%p206_p7), %s238_s8, 7 }
  0x1c   : > { %s428_s27 = scalar_select %p234_p8, %s335_s0, 7 }
  0x1d   : > { %s461_s8 = smov (!%p239_p9, %s238_s8), 7 }
  0x1e   : > { %s340_s28 = sshll.u32 %s428_s27, 3  ;;  %s241_s13 = scalar_lea.vmem %s456_s3, %s461_s8 }
  0x1f   : > { %s237_s7 = scalar_lea.vmem %s454_s1, %s340_s28  ;;  %v260_v10 = vld [vmem:[%s241_s13] sm:$0x1]  ;;  %s245_s20 = scalar_lea.vmem %s459_s6, %s428_s27 }
  0x20   : > { %v246_v1 = vld [vmem:[%s237_s7] sm:$0xff] }
  0x21   : > { %250 = vperm.xlu0 %353, %v246_v1  }
  0xa0   : > { %v251_v3 = vpop.permute.xlu0 %250 }
  0xa1   : > { %v253_v4 = vmul.f32 %v251_v3, %v247_v2 }
  0xa3   : > { %v254_v5 = vrot.slane %v253_v4, 4 }
  0xa5   : > { %v255_v6 = vadd.f32 %v254_v5, %v253_v4 }
  0xa7   : > { %v256_v7 = vrot.slane %v255_v6, 2 }
  0xa9   : > { %v257_v8 = vadd.f32 %v256_v7, %v255_v6 }
  0xab   : > { %v258_v9 = vrot.slane %v257_v8, 1 }
  0xad   : > { %v259_v11 = vadd.f32 %v258_v9, %v257_v8 }
  0xaf   : > { %v261_v13 = vadd.f32 %v260_v10, %v259_v11 }
  0xb1   : > { %v263_v15 = vmul.f32 %v262_v12, %v261_v13 }
  0xb3   : > { %v265_v16 = vadd.f32 %v264_v14, %v263_v15 }
  0xb5   : > { %v267_v17 = vsel %vm266_vm0, %v265_v16, -inf }
  0xb6   : > { %268 = vmax.xlane.f32.xlu0 %v267_v17 }
 0x143   : > { %v269_v18 = vpop.xlane.xlu0 %268 }
 0x144   : > { %v270_v19 = vsub.f32 %v265_v16, %v269_v18 }
 0x146   : > { %v271_v20 = vmul.f32 1.442695, %v270_v19 }
 0x148   : > { %354 = vpow2.f32 %v271_v20 }
 0x152   : > { %v355_v21 = vpop.eup %354 }
 0x153   : > { %v273_v22 = vsel %vm266_vm0, %v355_v21, 0.0 }
 0x154   : > { %274 = vadd.xlane.f32.xlu1 %v273_v22 }
 0x1e1   : > { %v275_v23 = vpop.xlane.xlu1 %274 }
 0x1e2   : > { %356 = vrcp.f32 %v275_v23 }
 0x1ec   : > { %v357_v24 = vpop.eup %356 }
 0x1ed   : > { %v277_v25 = vmul.f32 %v357_v24, %v355_v21 }
 0x1ef   : > { %278 = vst [vmem:[%s245_s20] sm:$0x1] %v277_v25 }
 0x1f0 PF: > { %s22_s26 = sadd.s32 1, %s378_s26  }
 0x1f1   : > { %p19_p10 = scmp.ge.s32.totalorder %s22_s26, 10  }
 0x1f3   :  { %21 = sbr.rel (!%p19_p10) target bundleno = 16 (0x10), region = 73 }

// kernel: scdori_forward.8
= control target key start
LH: loop header
LB: loop body
LE: loop exit
PB: predicated region body
PF: predicated region fallthrough
CT: control target
= control target key end

     0   :  { %s1995_s6 = smov 1   ;;  %s1996_s10 = smov 2   ;;  %s2441_s0 = inlined_call_operand.smem [shape: u32[41], index: -1, kind: input, shape index: {}] }
   0x1   :  { %s2048_s5 = sld [smem:[%s2441_s0]]   ;;  %s1997_s14 = smov 3  }
   0x2   :  { %s2053_s9 = sld [smem:[%s2441_s0 + %s1995_s6]]   ;;  %s1998_s18 = smov 4  }
   0x3   :  { %s2058_s13 = sld [smem:[%s2441_s0 + %s1996_s10]]   ;;  %s1999_s22 = smov 5  }
   0x4   :  { %s2063_s17 = sld [smem:[%s2441_s0 + %s1997_s14]]   ;;  %s2000_s26 = smov 6  }
   0x5   :  { %s2068_s21 = sld [smem:[%s2441_s0 + %s1998_s18]]   ;;  %s2001_s30 = smov 7  }
   0x6   :  { %s2073_s25 = sld [smem:[%s2441_s0 + %s1999_s22]]   ;;  %s2002_s4 = smov 8  }
   0x7   :  { %s2078_s29 = sld [smem:[%s2441_s0 + %s2000_s26]]   ;;  %s2003_s10 = smov 9  }
   0x8   :  { %s2083_s3 = sld [smem:[%s2441_s0 + %s2001_s30]]   ;;  %s2004_s15 = smov 10  }
   0x9   :  { %s2088_s8 = sld [smem:[%s2441_s0 + %s2002_s4]]   ;;  %s2005_s20 = smov 11  }
   0xa   :  { %s2093_s14 = sld [smem:[%s2441_s0 + %s2003_s10]]   ;;  %s2006_s26 = smov 12  }
   0xb   :  { %s2098_s19 = sld [smem:[%s2441_s0 + %s2004_s15]]   ;;  %s2007_s1 = smov 13  }
   0xc   :  { %s2103_s24 = sld [smem:[%s2441_s0 + %s2005_s20]]   ;;  %s2008_s7 = smov 14  }
   0xd   :  { %s2108_s30 = sld [smem:[%s2441_s0 + %s2006_s26]]   ;;  %s2009_s15 = smov 15  }
   0xe   :  { %s2113_s6 = sld [smem:[%s2441_s0 + %s2007_s1]]   ;;  %s2010_s22 = smov 16  }
   0xf   :  { %s2118_s12 = sld [smem:[%s2441_s0 + %s2008_s7]]   ;;  %s2011_s28 = smov 17  }
  0x10   :  { %s2123_s20 = sld [smem:[%s2441_s0 + %s2009_s15]]   ;;  %s2012_s7 = smov 18  }
  0x11   :  { %s2128_s27 = sld [smem:[%s2441_s0 + %s2010_s22]]   ;;  %s2013_s15 = smov 19  }
  0x12   :  { %s2133_s4 = sld [smem:[%s2441_s0 + %s2011_s28]]   ;;  %s2014_s22 = smov 20  }
  0x13   :  { %2446 = sst [smem:[#allocation6_spill]] %s2108_s30  ;;  %s2015_s28 = smov 21  }
  0x14   :  { %2447 = sst [smem:[#allocation7_spill]] %s2113_s6  ;;  %s2032_s10 = smov 38  }
  0x15   :  { %2448 = sst [smem:[#allocation8_spill]] %s2118_s12  ;;  %s2033_s16 = smov 39  }
  0x16   :  { %s2138_s12 = sld [smem:[%s2441_s0 + %s2012_s7]]   ;;  %s2016_s7 = smov 22  }
  0x17   :  { %2449 = sst [smem:[#allocation9_spill]] %s2128_s27  ;;  %s2034_s23 = smov 40  }
  0x18   :  { %2450 = sst [smem:[#allocation10_spill]] %s2133_s4 }
  0x19   :  { %s2143_s6 = sld [smem:[%s2441_s0 + %s2013_s15]]   ;;  %s2017_s15 = smov 23  }
  0x1a   :  { %s2148_s30 = sld [smem:[%s2441_s0 + %s2014_s22]]   ;;  %s2018_s22 = smov 24  }
  0x1b   :  { %s2153_s4 = sld [smem:[%s2441_s0 + %s2015_s28]]   ;;  %s2019_s28 = smov 25  }
  0x1c   :  { %2451 = sst [smem:[#allocation11_spill]] %s2138_s12 }
  0x1d   :  { %s2158_s12 = sld [smem:[%s2441_s0 + %s2016_s7]]   ;;  %s2020_s7 = smov 26  }
  0x1e   :  { %s2173_s27 = sld [smem:[%s2441_s0 + %s2019_s28]]   ;;  %s2023_s28 = smov 29  }
  0x1f   :  { %2452 = sst [smem:[#allocation12_spill]] %s2143_s6 }
  0x20   :  { %2453 = sst [smem:[#allocation13_spill]] %s2148_s30 }
  0x21   :  { %s2163_s6 = sld [smem:[%s2441_s0 + %s2017_s15]]   ;;  %s2021_s15 = smov 27  }
  0x22   :  { %s2168_s30 = sld [smem:[%s2441_s0 + %s2018_s22]]   ;;  %s2022_s22 = smov 28  }
  0x23   :  { %2454 = sst [smem:[#allocation14_spill]] %s2158_s12 }
  0x24   :  { %2457 = sst [smem:[#allocation17_spill]] %s2173_s27 }
  0x25   :  { %s2178_s12 = sld [smem:[%s2441_s0 + %s2020_s7]]   ;;  %s2024_s7 = smov 30  }
  0x26   :  { %s2193_s27 = sld [smem:[%s2441_s0 + %s2023_s28]]   ;;  %s2027_s28 = smov 33  }
  0x27   :  { %2455 = sst [smem:[#allocation15_spill]] %s2163_s6 }
  0x28   :  { %2456 = sst [smem:[#allocation16_spill]] %s2168_s30 }
  0x29   :  { %s2183_s6 = sld [smem:[%s2441_s0 + %s2021_s15]]   ;;  %s2025_s15 = smov 31  }
  0x2a   :  { %s2188_s30 = sld [smem:[%s2441_s0 + %s2022_s22]]   ;;  %s2026_s22 = smov 32  }
  0x2b   :  { %2458 = sst [smem:[#allocation18_spill]] %s2178_s12 }
  0x2c   :  { %2461 = sst [smem:[#allocation21_spill]] %s2193_s27 }
  0x2d   :  { %s2198_s12 = sld [smem:[%s2441_s0 + %s2024_s7]]   ;;  %s2028_s7 = smov 34  }
  0x2e   :  { %s2213_s27 = sld [smem:[%s2441_s0 + %s2027_s28]]   ;;  %s2031_s28 = smov 37  }
  0x2f   :  { %2459 = sst [smem:[#allocation19_spill]] %s2183_s6 }
  0x30   :  { %2460 = sst [smem:[#allocation20_spill]] %s2188_s30 }
  0x31   :  { %s2203_s6 = sld [smem:[%s2441_s0 + %s2025_s15]]   ;;  %s2029_s15 = smov 35  }
  0x32   :  { %s2208_s30 = sld [smem:[%s2441_s0 + %s2026_s22]]   ;;  %s2030_s22 = smov 36  }
  0x33   :  { %2462 = sst [smem:[#allocation22_spill]] %s2198_s12 }
  0x34   :  { %2465 = sst [smem:[#allocation25_spill]] %s2213_s27 }
  0x35   :  { %s2218_s12 = sld [smem:[%s2441_s0 + %s2028_s7]]  }
  0x36   :  { %s1236_s27 = sld [smem:[%s2441_s0 + %s2031_s28]]  }
  0x37   :  { %2463 = sst [smem:[#allocation23_spill]] %s2203_s6 }
  0x38   :  { %2464 = sst [smem:[#allocation24_spill]] %s2208_s30 }
  0x39   :  { %s2223_s6 = sld [smem:[%s2441_s0 + %s2029_s15]]  }
  0x3a   :  { %s2228_s30 = sld [smem:[%s2441_s0 + %s2030_s22]]  }
  0x3b   :  { %2466 = sst [smem:[#allocation26_spill]] %s2218_s12 }
  0x3c   :  { %s2236_s12 = sld [smem:[%s2441_s0 + %s2032_s10]]   ;;  %v87_v0 = vstv %s1236_s27 }
  0x3d   :  { %88 = vst [vmem:[#allocation2] sm:$0x1] %v87_v0 }
  0x3f   :  { %2467 = sst [smem:[#allocation27_spill]] %s2223_s6 }
  0x40   :  { %2468 = sst [smem:[#allocation28_spill]] %s2228_s30 }
  0x41   :  { %s2241_s6 = sld [smem:[%s2441_s0 + %s2033_s16]]  }
  0x42   :  { %s2246_s30 = sld [smem:[%s2441_s0 + %s2034_s23]]  }
  0x43   :  { %v1269_v1 = vld [vmem:[%s2073_s25] sm:$0xff]   ;;  %v2035_v2 = vmov 0.0|0.0   ;;  %vm2036_vm0 = vmmov 0   ;;  %v2037_v3 = vmov 0.0   ;;  %v2038_v4 = vmov 0   ;;  %v1396_v5 = vld [vmem:[%s2073_s25 + $0x8] sm:$0xff]  }
  0x44   :  { %1752 = vmatprep.subr.bf16.mxu0 %v2035_v2  ;;  %1587 = vmatprep.mubr.msk.f32.mxu0 %vm2036_vm0, %v2037_v3  ;;  %v1397_v6 = vld [vmem:[%s2073_s25 + $0x10] sm:$0xff]   ;;  %v170_v7 = vld [vmem:[%s2058_s13] sm:$0xff]  ;;  %v209_v10 = vld [vmem:[%s2103_s24 + $0x8] sm:$0xff] }
  0x45   :  { %1754 = vmatpush3.bf16.msra.mxu0 %v1269_v1  ;;  %1961 = vset.pattern.permute.xlu0 %v2038_v4  ;;  %v435_v8 = vld [vmem:[%s2063_s17] sm:$0xff]  ;;  %v210_v11 = vld [vmem:[%s2103_s24 + $0x10] sm:$0xff]  ;;  %v1398_v12 = vld [vmem:[%s2073_s25 + $0x18] sm:$0xff]  }
  0x46   :  { %1755 = vmatprep.subr.bf16.mxu0 %v2035_v2  ;;  %1962 = vset.pattern.permute.xlu1 %v2038_v4  ;;  %v208_v9 = vld [vmem:[%s2103_s24] sm:$0xff]  ;;  %v211_v15 = vld [vmem:[%s2103_s24 + $0x18] sm:$0xff] }
  0x47   :  { %1776 = vmatprep.subr.bf16.mxu1 %v2035_v2  ;;  %1622 = vmatprep.mubr.msk.f32.mxu1 %vm2036_vm0, %v2037_v3  ;;  %v166_v13 = vld [vmem:[%s2068_s21] sm:$0xff]  ;;  %v1777_v14 = vpack.c.bf16 %v209_v10, %v208_v9  ;;  %v1780_v16 = vpack.c.bf16 %v211_v15, %v210_v11 }
  0x48   :  { %229 = vperm.xlu0 %1961, %v170_v7   ;;  %526 = vperm.xlu1 %1962, %v435_v8  }
  0x49   :  { %1757 = vmatpush3.bf16.msra.mxu0 %v1396_v5  ;;  %1778 = vmatpush3.bf16.msra.mxu1 %v1777_v14 }
  0x4a   :  { %1758 = vmatprep.subr.bf16.mxu0 %v2035_v2 }
  0x4d   :  { %1760 = vmatpush3.bf16.msra.mxu0 %v1397_v6 }
  0x4e   :  { %1761 = vmatprep.subr.bf16.mxu0 %v2035_v2 }
  0x4f   :  { %89 = vsyncpa [#allocation4], 0  ;;  %311 = vperm.xlu0 %1961, %v166_v13   ;;  %v212_v17 = vld [vmem:[%s2103_s24 + $0x20] sm:$0xff]  ;;  %v213_v18 = vld [vmem:[%s2103_s24 + $0x28] sm:$0xff]  ;;  %1779 = vmatprep.subr.bf16.mxu1 %v2035_v2  ;;  %s2469_s0 = sld [smem:[#allocation9_spill]]  ;;  %s2472_s13 = sld [smem:[#allocation12_spill]] }
  0x50   :  { %v1399_v19 = vld [vmem:[%s2073_s25 + $0x20] sm:$0xff]   ;;  %1781 = vmatpush3.bf16.msra.mxu1 %v1780_v16  ;;  %v1783_v20 = vpack.c.bf16 %v213_v18, %v212_v17  ;;  %v214_v21 = vld [vmem:[%s2103_s24 + $0x30] sm:$0xff]  ;;  %v215_v22 = vld [vmem:[%s2103_s24 + $0x38] sm:$0xff]  ;;  %s2473_s17 = sld [smem:[#allocation13_spill]]  ;;  %s2474_s21 = sld [smem:[#allocation17_spill]]  ;;  %vm743_vm1 = vcmask 523264  }
  0x51   :  { %1763 = vmatpush3.bf16.msra.mxu0 %v1398_v12  ;;  %1782 = vmatprep.subr.bf16.mxu1 %v2035_v2  ;;  %v1400_v23 = vld [vmem:[%s2073_s25 + $0x28] sm:$0xff]   ;;  %v1786_v24 = vpack.c.bf16 %v215_v22, %v214_v21  ;;  %v216_v25 = vld [vmem:[%s2103_s24 + $0x40] sm:$0xff]  ;;  %v1401_v27 = vld [vmem:[%s2073_s25 + $0x30] sm:$0xff]   ;;  %s2483_s27 = sld [smem:[#allocation24_spill]]  ;;  %s2485_s28 = sld [smem:[#allocation21_spill]]  ;;  %vm898_vm2 = vcmask 64512  }
  0x52   :  { %1764 = vmatprep.subr.bf16.mxu0 %v2035_v2  ;;  %v217_v26 = vld [vmem:[%s2103_s24 + $0x48] sm:$0xff]  ;;  %v1402_v29 = vld [vmem:[%s2073_s25 + $0x38] sm:$0xff]   ;;  %v1410_v30 = vld [vmem:[%s2123_s20 + $0x40] sm:$0xff]   ;;  %s2475_s25 = sld [smem:[#allocation18_spill]]  ;;  %s2486_s1 = sld [smem:[#allocation22_spill]] }
  0x53   :  { %v1789_v28 = vpack.c.bf16 %v217_v26, %v216_v25  ;;  %v2288_v31 = vld [vmem:[%s2048_s5] sm:$0xff]  ;;  %v169_v33 = vld [vmem:[%s2053_s9 + $0x8] sm:$0xff]  ;;  %v1412_v36 = vld [vmem:[%s2123_s20 + $0x50] sm:$0xff]   ;;  %s2470_s5 = sld [smem:[#allocation10_spill]]  ;;  %s2487_s2 = sld [smem:[#allocation23_spill]] }
  0x54   :  { %1784 = vmatpush3.bf16.msra.mxu1 %v1783_v20  ;;  %v1301_v32 = vld [vmem:[%s2123_s20] sm:$0xff]   ;;  %v1411_v34 = vld [vmem:[%s2123_s20 + $0x48] sm:$0xff]   ;;  %v1404_v37 = vld [vmem:[%s2123_s20 + $0x10] sm:$0xff]   ;;  %s2488_s10 = sld [smem:[#allocation25_spill]]  ;;  %s2489_s7 = sld [smem:[#allocation26_spill]] }
  0x55   :  { %1766 = vmatpush3.bf16.msra.mxu0 %v1399_v19  ;;  %1785 = vmatprep.subr.bf16.mxu1 %v2035_v2  ;;  %v1403_v35 = vld [vmem:[%s2123_s20 + $0x8] sm:$0xff]   ;;  %v1413_v38 = vld [vmem:[%s2123_s20 + $0x58] sm:$0xff]   ;;  %v1414_v40 = vld [vmem:[%s2123_s20 + $0x60] sm:$0xff]   ;;  %s2490_s11 = sld [smem:[#allocation27_spill]]  ;;  %s2491_s16 = sld [smem:[#allocation28_spill]] }
  0x56   :  { %1767 = vmatprep.subr.bf16.mxu0 %v2035_v2  ;;  %v1405_v39 = vld [vmem:[%s2123_s20 + $0x18] sm:$0xff]   ;;  %v1406_v41 = vld [vmem:[%s2123_s20 + $0x20] sm:$0xff]   ;;  %v1415_v42 = vld [vmem:[%s2123_s20 + $0x68] sm:$0xff]   ;;  %s2039_s15 = smov [#allocation3]  }
  0x57   :  { %v1407_v43 = vld [vmem:[%s2123_s20 + $0x28] sm:$0xff]   ;;  %v1416_v44 = vld [vmem:[%s2123_s20 + $0x70] sm:$0xff]   ;;  %v1417_v46 = vld [vmem:[%s2123_s20 + $0x78] sm:$0xff]   ;;  %s1184_s18 = sshll.u32 %s2039_s15, 4  ;;  %s1185_s18 = int_to_ptr.vmem [resolvable:$true] %s1184_s18 }
  0x58   :  { %1787 = vmatpush3.bf16.msra.mxu1 %v1786_v24  ;;  %v1408_v45 = vld [vmem:[%s2123_s20 + $0x30] sm:$0xff]   ;;  %v1409_v47 = vld [vmem:[%s2123_s20 + $0x38] sm:$0xff]   ;;  %v168_v48 = vld [vmem:[%s2053_s9] sm:$0xff]  ;;  %s2471_s9 = sld [smem:[#allocation11_spill]]  ;;  %s2482_s20 = sld [smem:[#allocation20_spill]] }
  0x59   :  { %1769 = vmatpush3.bf16.msra.mxu0 %v1400_v23  ;;  %1788 = vmatprep.subr.bf16.mxu1 %v2035_v2  ;;  %v218_v49 = vld [vmem:[%s2103_s24 + $0x50] sm:$0xff]  ;;  %v219_v50 = vld [vmem:[%s2103_s24 + $0x58] sm:$0xff]  ;;  %v220_v52 = vld [vmem:[%s2103_s24 + $0x60] sm:$0xff]  ;;  %s1971_s23 = scalar_lea.vmem %s1185_s18, 128  ;;  %p1976_p1 = scmp.lt.s32.totalorder %s1185_s18, %s1185_s18 }
  0x5a   :  { %1770 = vmatprep.subr.bf16.mxu0 %v2035_v2  ;;  %v1792_v51 = vpack.c.bf16 %v219_v50, %v218_v49  ;;  %v221_v53 = vld [vmem:[%s2103_s24 + $0x68] sm:$0xff]  ;;  %v222_v55 = vld [vmem:[%s2103_s24 + $0x70] sm:$0xff]  ;;  %v223_v56 = vld [vmem:[%s2103_s24 + $0x78] sm:$0xff]  ;;  %s2481_s24 = sld [smem:[#allocation16_spill]]  ;;  %p1972_p0 = scmp.ne.s32.totalorder %s1185_s18, %s1971_s23 }
  0x5b   :  { %v1795_v54 = vpack.c.bf16 %v221_v53, %v220_v52  ;;  %v1798_v57 = vpack.c.bf16 %v223_v56, %v222_v55  ;;  %v1240_v59 = vld [vmem:[%s2078_s29] ss:$0 sm:$0xff]  ;;  %v506_v12 = vld [vmem:[%s2153_s4 + $0x8] sm:$0xff]  ;;  %v507_v16 = vld [vmem:[%s2153_s4 + $0x10] sm:$0xff]  ;;  %s2476_s29 = sld [smem:[#allocation6_spill]]  ;;  %p1977_p2 = scmp.lt.s32.totalorder %s1971_s23, %s1971_s23 }
  0x5c   :  { %1790 = vmatpush3.bf16.msra.mxu1 %v1789_v28  ;;  %v1241_v60 = vld [vmem:[%s2083_s3] ss:$0 sm:$0xff]  ;;  %v508_v17 = vld [vmem:[%s2153_s4 + $0x18] sm:$0xff]  ;;  %v510_v20 = vld [vmem:[%s2153_s4 + $0x28] sm:$0xff]  ;;  %s2477_s3 = sld [smem:[#allocation7_spill]] }
  0x5d   :  { %1772 = vmatpush3.bf16.msra.mxu0 %v1401_v27  ;;  %1791 = vmatprep.subr.bf16.mxu1 %v2035_v2  ;;  %v1242_v5 = vld [vmem:[%s2088_s8] ss:$0 sm:$0xff]  ;;  %v1836_v18 = vpack.c.bf16 %v508_v17, %v507_v16  ;;  %v511_v22 = vld [vmem:[%s2153_s4 + $0x30] sm:$0xff]  ;;  %v512_v23 = vld [vmem:[%s2153_s4 + $0x38] sm:$0xff]  ;;  %s2478_s8 = sld [smem:[#allocation8_spill]]  ;;  %p1978_p3 = por %p1977_p2, %p1976_p1 }
  0x5e   :  { %1773 = vmatprep.subr.bf16.mxu0 %v2035_v2  ;;  %v1243_v7 = vld [vmem:[%s2093_s14] ss:$0 sm:$0xff]  ;;  %v1842_v24 = vpack.c.bf16 %v512_v23, %v511_v22  ;;  %v514_v26 = vld [vmem:[%s2153_s4 + $0x48] sm:$0xff]  ;;  %v515_v28 = vld [vmem:[%s2153_s4 + $0x50] sm:$0xff]  ;;  %s2479_s14 = sld [smem:[#allocation14_spill]] }
  0x5f   :  { %v1244_v9 = vld [vmem:[%s2098_s19] ss:$0 sm:$0xff]  ;;  %s2480_s19 = sld [smem:[#allocation15_spill]]  ;;  %p1979_p4 = pnand %p1978_p3, %p1972_p0 }
  0x60   :  { %1793 = vmatpush3.bf16.msra.mxu1 %v1792_v51  ;;  %v505_v11 = vld [vmem:[%s2153_s4] sm:$0xff] }
  0x61   :  { %1775 = vmatpush3.bf16.msra.mxu0 %v1402_v29  ;;  %1794 = vmatprep.subr.bf16.mxu1 %v2035_v2  ;;  %v1833_v14 = vpack.c.bf16 %v506_v12, %v505_v11  ;;  %v509_v19 = vld [vmem:[%s2153_s4 + $0x20] sm:$0xff]  ;;  %v516_v29 = vld [vmem:[%s2153_s4 + $0x58] sm:$0xff]  ;;  %v740_v12 = vld [vmem:[%s2475_s25 + $0x28] sm:$0xff] }
  0x62   :  { %1801 = vmatprep.subr.bf16.mxu0 %v1410_v30  ;;  %v1839_v21 = vpack.c.bf16 %v510_v20, %v509_v19  ;;  %v513_v25 = vld [vmem:[%s2153_s4 + $0x40] sm:$0xff] }
  0x63   :  { %v1845_v27 = vpack.c.bf16 %v514_v26, %v513_v25  ;;  %v1248_v30 = vld [vmem:[%s2469_s0] ss:$0 sm:$0xff] }
  0x64   :  { %1588 = vmatmul.mubr.f32.vlgmr.msra.gmra.mrb[0].mxu0 %v2288_v31  ;;  %1796 = vmatpush3.bf16.msra.mxu1 %v1795_v54  ;;  %v1251_v49 = vld [vmem:[%s2472_s13] ss:$0 sm:$0xff]  ;;  %v728_v54 = vld [vmem:[%s2474_s21 + $0x8] sm:$0xff] }
  0x65   :  { %1803 = vmatpush3.bf16.msra.mxu0 %v1301_v32  ;;  %600 = vmatprep.mubr.f32.mxu0 %v169_v33  ;;  %v1848_v33 = vpack.c.bf16 %v516_v29, %v515_v28  ;;  %v1252_v51 = vld [vmem:[%s2473_s17] ss:$0 sm:$0xff] }
  0x66   :  { %1805 = vmatprep.subr.bf16.mxu0 %v1411_v34  ;;  %1797 = vmatprep.subr.bf16.mxu1 %v2035_v2  ;;  %v517_v34 = vld [vmem:[%s2153_s4 + $0x60] sm:$0xff] }
  0x67   :  { %v727_v53 = vld [vmem:[%s2474_s21] sm:$0xff] }
  0x68   :  { %1799 = vmatpush3.bf16.msra.mxu1 %v1798_v57  ;;  %v1869_v56 = vpack.c.bf16 %v728_v54, %v727_v53  ;;  %v739_v11 = vld [vmem:[%s2475_s25 + $0x20] sm:$0xff] }
  0x69   :  { %1807 = vmatpush3.bf16.msra.mxu0 %v1403_v35  ;;  %1832 = vmatprep.subr.bf16.mxu1 %v2035_v2  ;;  %v518_v35 = vld [vmem:[%s2153_s4 + $0x68] sm:$0xff]  ;;  %v1245_v17 = vld [vmem:[%s2476_s29] ss:$0 sm:$0xff] }
  0x6a   :  { %1809 = vmatprep.subr.bf16.mxu0 %v1412_v36  ;;  %v1247_v22 = vld [vmem:[%s2478_s8] ss:$0 sm:$0xff] }
  0x6b   :  { %v1253_v26 = vld [vmem:[%s2479_s14] ss:$0 sm:$0xff] }
  0x6d   :  { %1811 = vmatpush3.bf16.msra.mxu0 %v1404_v37 }
  0x6e   :  { %1813 = vmatprep.subr.bf16.mxu0 %v1413_v38  ;;  %v1249_v38 = vld [vmem:[%s2470_s5] ss:$0 sm:$0xff] }
  0x71   :  { %1815 = vmatpush3.bf16.msra.mxu0 %v1405_v39 }
  0x72   :  { %1817 = vmatprep.subr.bf16.mxu0 %v1414_v40 }
  0x75   :  { %1819 = vmatpush3.bf16.msra.mxu0 %v1406_v41  ;;  %v1851_v41 = vpack.c.bf16 %v518_v35, %v517_v34 }
  0x76   :  { %1821 = vmatprep.subr.bf16.mxu0 %v1415_v42  ;;  %v519_v42 = vld [vmem:[%s2153_s4 + $0x70] sm:$0xff] }
  0x79   :  { %1823 = vmatpush3.bf16.msra.mxu0 %v1407_v43  ;;  %v520_v43 = vld [vmem:[%s2153_s4 + $0x78] sm:$0xff]  ;;  %s2484_s4 = sld [smem:[#allocation19_spill]] }
  0x7a   :  { %1825 = vmatprep.subr.bf16.mxu0 %v1416_v44 }
  0x7d   :  { %1827 = vmatpush3.bf16.msra.mxu0 %v1408_v45 }
  0x7e   :  { %1829 = vmatprep.subr.bf16.mxu0 %v1417_v46  ;;  %v1250_v46 = vld [vmem:[%s2471_s9] ss:$0 sm:$0xff] }
  0x81   :  { %1831 = vmatpush3.bf16.msra.mxu0 %v1409_v47 }
  0x82   :  { %1856 = vmatprep.subr.bf16.mxu0 %v2035_v2 }
  0x84   :  { %601 = vmatmul.mubr.f32.vlgmr.msra.gmra.mrb[2].mxu0 %v168_v48  ;;  %v1854_v48 = vpack.c.bf16 %v520_v43, %v519_v42  ;;  %v1424_v42 = vld [vmem:[%s2482_s20 + $0x38] sm:$0xff]   ;;  %v1038_v43 = vld [vmem:[%s2483_s27] sm:$0xff] }
  0x85   :  { %1676 = vmatprep.mubr.msk.f32.mxu0 %vm2036_vm0, %v2037_v3 }
  0xc7   :  { %v230_v58 = vpop.permute.xlu0 %229  ;;  %v527_v32 = vpop.permute.xlu1 %526 }
  0xc8   :  { %v238_v62 = vmul.f32 %v1240_v59, %v230_v58  ;;  %v535_v37 = vmul.f32 %v1248_v30, %v527_v32  ;;  %v729_v58 = vld [vmem:[%s2474_s21 + $0x10] sm:$0xff]  ;;  %v730_v59 = vld [vmem:[%s2474_s21 + $0x18] sm:$0xff]  ;;  %v1255_v32 = vld [vmem:[%s2481_s24] ss:$0 sm:$0xff] }
  0xce   :  { %v312_v61 = vpop.permute.xlu0 %311 }
  0xcf   :  { %v320_v63 = vmul.f32 %v1241_v60, %v312_v61  ;;  %v612_v44 = vmul.f32 %v1249_v38, %v312_v61  ;;  %v1872_v60 = vpack.c.bf16 %v730_v59, %v729_v58  ;;  %v731_v61 = vld [vmem:[%s2474_s21 + $0x20] sm:$0xff]  ;;  %v1419_v38 = vld [vmem:[%s2482_s20 + $0x10] sm:$0xff]  }
 0x137   :  { %v305_v0 = vpop.f32.mrb[0].mxu0 }
 0x138   :  { %v306_v1 = vadd.f32 %v305_v0, %v238_v62  ;;  %v1589_v4 = vpop.f32.mrb[1].mxu0  ;;  %v732_v62 = vld [vmem:[%s2474_s21 + $0x28] sm:$0xff]  ;;  %v733_v0 = vld [vmem:[%s2474_s21 + $0x30] sm:$0xff] }
 0x13a   :  { %v321_v6 = vadd.f32 %v320_v63, %v306_v1  ;;  %v1875_v63 = vpack.c.bf16 %v732_v62, %v731_v61  ;;  %v734_v1 = vld [vmem:[%s2474_s21 + $0x38] sm:$0xff] }
 0x13b   :  { %v1878_v4 = vpack.c.bf16 %v734_v1, %v733_v0 }
 0x13c   :  { %v328_v8 = vadd.f32 %v1242_v5, %v321_v6  ;;  %v735_v5 = vld [vmem:[%s2475_s25] sm:$0xff]  ;;  %v736_v6 = vld [vmem:[%s2475_s25 + $0x8] sm:$0xff] }
 0x13e   :  { %v335_v10 = vmul.f32 %v1243_v7, %v328_v8  ;;  %v737_v7 = vld [vmem:[%s2475_s25 + $0x10] sm:$0xff]  ;;  %v1857_v8 = vpack.c.bf16 %v736_v6, %v735_v5 }
 0x140   :  { %v342_v13 = vadd.f32 %v1244_v9, %v335_v10  ;;  %v738_v9 = vld [vmem:[%s2475_s25 + $0x18] sm:$0xff]  ;;  %1858 = vmatpush3.bf16.msra.mxu0 %v1857_v8 }
 0x141   :  { %v1860_v10 = vpack.c.bf16 %v738_v9, %v737_v7  ;;  %1859 = vmatprep.subr.bf16.mxu0 %v2035_v2 }
 0x142   :  { %v343_v15 = vmax.f32 %v342_v13, 0.0  ;;  %v1863_v13 = vpack.c.bf16 %v740_v12, %v739_v11  ;;  %v1262_v11 = vld [vmem:[%s2488_s10] ss:$0 sm:$0xff] }
 0x144   :  { %1623 = vmatmul.mubr.f32.vlgmr.msra.gmra.mrb[0].mxu1 %v343_v15  ;;  %1861 = vmatpush3.bf16.msra.mxu0 %v1860_v10  ;;  %v742_v15 = vld [vmem:[%s2475_s25 + $0x38] sm:$0xff] }
 0x145   :  { %1834 = vmatpush3.bf16.msra.mxu1 %v1833_v14  ;;  %1657 = vmatprep.mubr.msk.f32.mxu1 %vm2036_vm0, %v2037_v3  ;;  %v741_v14 = vld [vmem:[%s2475_s25 + $0x30] sm:$0xff] }
 0x146   :  { %1835 = vmatprep.subr.bf16.mxu1 %v2035_v2  ;;  %1862 = vmatprep.subr.bf16.mxu0 %v2035_v2  ;;  %v1866_v16 = vpack.c.bf16 %v742_v15, %v741_v14 }
 0x148   :  { %1864 = vmatpush3.bf16.msra.mxu0 %v1863_v13  ;;  %v1264_v13 = vld [vmem:[%s2489_s7] ss:$0 sm:$0xff] }
 0x149   :  { %1837 = vmatpush3.bf16.msra.mxu1 %v1836_v18  ;;  %1865 = vmatprep.subr.bf16.mxu0 %v2035_v2  ;;  %v1246_v18 = vld [vmem:[%s2477_s3] ss:$0 sm:$0xff] }
 0x14a   :  { %1838 = vmatprep.subr.bf16.mxu1 %v2035_v2 }
 0x14c   :  { %1867 = vmatpush3.bf16.msra.mxu0 %v1866_v16  ;;  %v1265_v16 = vld [vmem:[%s2490_s11] ss:$0 sm:$0xff] }
 0x14d   :  { %1840 = vmatpush3.bf16.msra.mxu1 %v1839_v21  ;;  %1880 = vmatprep.subr.bf16.mxu0 %v2035_v2 }
 0x14e   :  { %1841 = vmatprep.subr.bf16.mxu1 %v2035_v2 }
 0x151   :  { %1843 = vmatpush3.bf16.msra.mxu1 %v1842_v24 }
 0x152   :  { %1844 = vmatprep.subr.bf16.mxu1 %v2035_v2 }
 0x155   :  { %1846 = vmatpush3.bf16.msra.mxu1 %v1845_v27  ;;  %v1254_v27 = vld [vmem:[%s2480_s19] ss:$0 sm:$0xff] }
 0x156   :  { %1847 = vmatprep.subr.bf16.mxu1 %v2035_v2 }
 0x157   :  { %v1491_v36 = vpop.f32.mrb[2].mxu0 }
 0x158   :  { %v1492_v39 = vpop.f32.mrb[3].mxu0 }
 0x159   :  { %v1493_v40 = vadd.f32 %v1492_v39, %v1491_v36  ;;  %1849 = vmatpush3.bf16.msra.mxu1 %v1848_v33  ;;  %v1365_v36 = vld [vmem:[%s2482_s20] sm:$0xff]   ;;  %v1420_v39 = vld [vmem:[%s2482_s20 + $0x18] sm:$0xff]  }
 0x15a   :  { %1850 = vmatprep.subr.bf16.mxu1 %v2035_v2 }
 0x15b   :  { %v603_v45 = vadd.f32 %v1493_v40, %v535_v37  ;;  %v1418_v37 = vld [vmem:[%s2482_s20 + $0x8] sm:$0xff]  }
 0x15c   :  { %v1422_v40 = vld [vmem:[%s2482_s20 + $0x28] sm:$0xff]  }
 0x15d   :  { %v613_v47 = vadd.f32 %v612_v44, %v603_v45  ;;  %1852 = vmatpush3.bf16.msra.mxu1 %v1851_v41  ;;  %v1423_v41 = vld [vmem:[%s2482_s20 + $0x30] sm:$0xff]   ;;  %v1039_v44 = vld [vmem:[%s2483_s27 + $0x8] sm:$0xff] }
 0x15e   :  { %1853 = vmatprep.subr.bf16.mxu1 %v2035_v2  ;;  %v1040_v45 = vld [vmem:[%s2483_s27 + $0x10] sm:$0xff] }
 0x15f   :  { %v620_v50 = vadd.f32 %v1250_v46, %v613_v47  ;;  %v1905_v46 = vpack.c.bf16 %v1039_v44, %v1038_v43  ;;  %v1041_v47 = vld [vmem:[%s2483_s27 + $0x18] sm:$0xff] }
 0x161   :  { %v627_v52 = vmul.f32 %v1251_v49, %v620_v50  ;;  %1855 = vmatpush3.bf16.msra.mxu1 %v1854_v48  ;;  %v1908_v48 = vpack.c.bf16 %v1041_v47, %v1040_v45  ;;  %v1042_v49 = vld [vmem:[%s2483_s27 + $0x20] sm:$0xff]  ;;  %v1043_v50 = vld [vmem:[%s2483_s27 + $0x28] sm:$0xff] }
 0x162   :  { %1868 = vmatprep.subr.bf16.mxu1 %v2035_v2 }
 0x163   :  { %v634_v55 = vadd.f32 %v1252_v51, %v627_v52  ;;  %v1911_v51 = vpack.c.bf16 %v1043_v50, %v1042_v49  ;;  %v1045_v52 = vld [vmem:[%s2483_s27 + $0x38] sm:$0xff] }
 0x165   :  { %v635_v57 = vmax.f32 %v634_v55, 0.0 }
 0x167   :  { %1658 = vmatmul.mubr.f32.vlgmr.msra.gmra.mrb[2].mxu1 %v635_v57  ;;  %v1258_v57 = vld [vmem:[%s2484_s4] ss:$0 sm:$0xff] }
 0x168   :  { %1870 = vmatpush3.bf16.msra.mxu1 %v1869_v56  ;;  %1695 = vmatprep.mubr.msk.f32.mxu1 %vm2036_vm0, %v2037_v3 }
 0x169   :  { %1871 = vmatprep.subr.bf16.mxu1 %v2035_v2 }
 0x16c   :  { %1873 = vmatpush3.bf16.msra.mxu1 %v1872_v60 }
 0x16d   :  { %1874 = vmatprep.subr.bf16.mxu1 %v2035_v2 }
 0x170   :  { %1876 = vmatpush3.bf16.msra.mxu1 %v1875_v63  ;;  %v1260_v63 = vld [vmem:[%s2486_s1] ss:$0 sm:$0xff] }
 0x171   :  { %1877 = vmatprep.subr.bf16.mxu1 %v2035_v2 }
 0x174   :  { %1879 = vmatpush3.bf16.msra.mxu1 %v1878_v4  ;;  %v1261_v4 = vld [vmem:[%s2487_s2] ss:$0 sm:$0xff] }
 0x175   :  { %1904 = vmatprep.subr.bf16.mxu1 %v2035_v2 }
 0x217   :  { %v416_v19 = vpop.f32.mrb[0].mxu1 }
 0x218   :  { %v417_v20 = vadd.f32 %v1245_v17, %v416_v19  ;;  %v1624_v21 = vpop.f32.mrb[1].mxu1  ;;  %v1266_v19 = vld [vmem:[%s2491_s16] ss:$0 sm:$0xff] }
 0x21a   :  { %v426_v23 = vmul.f32 %v1246_v18, %v417_v20 }
 0x21c   :  { %v433_v24 = vadd.f32 %v1247_v22, %v426_v23 }
 0x21e   :  { %v434_v25 = vmax.f32 %v433_v24, 0.0 }
 0x220   :  { %1696 = vmatmul.mubr.msk.f32.vlgmr.msra.gmra.mrb[4].mxu1 %vm743_vm1, %v434_v25 }
 0x221   :  { %1749 = vmatprep.mubr.msk.f32.mxu1 %vm2036_vm0, %v2037_v3  ;;  %1906 = vmatpush3.bf16.msra.mxu1 %v1905_v46 }
 0x222   :  { %1907 = vmatprep.subr.bf16.mxu1 %v2035_v2 }
 0x225   :  { %1909 = vmatpush3.bf16.msra.mxu1 %v1908_v48 }
 0x226   :  { %1910 = vmatprep.subr.bf16.mxu1 %v2035_v2 }
 0x229   :  { %1912 = vmatpush3.bf16.msra.mxu1 %v1911_v51 }
 0x22a   :  { %1913 = vmatprep.subr.bf16.mxu1 %v2035_v2 }
 0x23a   :  { %v708_v28 = vpop.f32.mrb[2].mxu1 }
 0x23b   :  { %v709_v29 = vadd.f32 %v1253_v26, %v708_v28  ;;  %v1659_v30 = vpop.f32.mrb[3].mxu1 }
 0x23d   :  { %v718_v33 = vmul.f32 %v1254_v27, %v709_v29 }
 0x23f   :  { %v725_v34 = vadd.f32 %v1255_v32, %v718_v33 }
 0x241   :  { %v726_v35 = vmax.f32 %v725_v34, 0.0 }
 0x243   :  { %1677 = vmatmul.mubr.msk.f32.vlgmr.msra.gmra.mrb[4].mxu0 %vm743_vm1, %v726_v35 }
 0x244   :  { %1882 = vmatpush3.bf16.msra.mxu0 %v1365_v36  ;;  %1730 = vmatprep.mubr.msk.f32.mxu0 %vm2036_vm0, %v2037_v3  ;;  %v1421_v3 = vld [vmem:[%s2482_s20 + $0x20] sm:$0xff]  }
 0x245   :  { %1883 = vmatprep.subr.bf16.mxu0 %v2035_v2 }
 0x248   :  { %1885 = vmatpush3.bf16.msra.mxu0 %v1418_v37 }
 0x249   :  { %1886 = vmatprep.subr.bf16.mxu0 %v2035_v2 }
 0x24c   :  { %1888 = vmatpush3.bf16.msra.mxu0 %v1419_v38 }
 0x24d   :  { %1889 = vmatprep.subr.bf16.mxu0 %v2035_v2 }
 0x250   :  { %1891 = vmatpush3.bf16.msra.mxu0 %v1420_v39 }
 0x251   :  { %1892 = vmatprep.subr.bf16.mxu0 %v2035_v2 }
 0x254   :  { %1894 = vmatpush3.bf16.msra.mxu0 %v1421_v3 }
 0x255   :  { %1895 = vmatprep.subr.bf16.mxu0 %v2035_v2 }
 0x258   :  { %1897 = vmatpush3.bf16.msra.mxu0 %v1422_v40 }
 0x259   :  { %1898 = vmatprep.subr.bf16.mxu0 %v2035_v2 }
 0x25c   :  { %1900 = vmatpush3.bf16.msra.mxu0 %v1423_v41 }
 0x25d   :  { %1901 = vmatprep.subr.bf16.mxu0 %v2035_v2  ;;  %v1259_v2 = vld [vmem:[%s2485_s28] ss:$0 sm:$0xff] }
 0x260   :  { %1903 = vmatpush3.bf16.msra.mxu0 %v1424_v42 }
 0x263   :  { %1731 = vmatmul.mubr.f32.vlgmr.msra.gmra.mrb[6].mxu0 %v2288_v31  ;;  %v1044_v31 = vld [vmem:[%s2483_s27 + $0x30] sm:$0xff] }
 0x264   :  { %v1914_v53 = vpack.c.bf16 %v1045_v52, %v1044_v31 }
 0x266   :  { %1915 = vmatpush3.bf16.msra.mxu1 %v1914_v53 }
 0x2f3   :  { %v886_v54 = vpop.f32.mrb[4].mxu1 }
 0x2f4   :  { %v1697_v55 = vpop.f32.mrb[5].mxu1 }
 0x316   :  { %v813_v56 = vpop.f32.mrb[4].mxu0 }
 0x317   :  { %v887_v58 = vadd.f32 %v886_v54, %v813_v56  ;;  %v1678_v59 = vpop.f32.mrb[5].mxu0 }
 0x319   :  { %v897_v60 = vadd.f32 %v1258_v57, %v887_v58 }
 0x31b   :  { %v900_v61 = vsel %vm898_vm2, %v897_v60, -inf  ;;  %899 = vst.msk [vmem:[#allocation3] sm:$0xff] %vm898_vm2, %v897_v60 }
 0x31c   :  { %901 = vmax.xlane.f32.xlu1 %v900_v61 }
 0x336   :  { %v1017_v62 = vpop.f32.mrb[6].mxu0 }
 0x337   :  { %v1018_v0 = vadd.f32 %v1259_v2, %v1017_v62  ;;  %v1732_v1 = vpop.f32.mrb[7].mxu0 }
 0x339   :  { %v1028_v5 = vmul.f32 %v1260_v63, %v1018_v0 }
 0x33b   :  { %v1036_v6 = vadd.f32 %v1261_v4, %v1028_v5 }
 0x33d   :  { %v1037_v7 = vmax.f32 %v1036_v6, 0.0 }
 0x33f   :  { %1750 = vmatmul.mubr.msk.f32.vlgmr.msra.gmra.mrb[6].mxu1 %vm743_vm1, %v1037_v7 }
 0x3a9   :  { %v902_v8 = vpop.xlane.xlu1 %901 }
 0x3aa   :  { %v903_v9 = vsub.f32 %v897_v60, %v902_v8 }
 0x3ac   :  { %v904_v10 = vmul.f32 1.442695, %v903_v9 }
 0x3ae   :  { %1963 = vpow2.f32 %v904_v10 }
 0x3b8   :  { %v1964_v22 = vpop.eup %1963 }
 0x3b9   :  { %v906_v23 = vsel %vm898_vm2, %v1964_v22, 0.0 }
 0x412   :  { %v1122_v12 = vpop.f32.mrb[6].mxu1 }
 0x413   :  { %v1123_v14 = vadd.f32 %v1262_v11, %v1122_v12  ;;  %v1751_v15 = vpop.f32.mrb[7].mxu1 }
 0x415   :  { %v1133_v17 = vmul.f32 %v1264_v13, %v1123_v14 }
 0x417   :  { %v1141_v18 = vadd.f32 %v1265_v16, %v1133_v17 }
 0x419   :  { %v1142_v20 = vmax.f32 %v1141_v18, 0.0 }
 0x41b   :  { %v1150_v21 = vmul.f32 %v1266_v19, %v1142_v20 }
 0x41d   :  { %1151 = vadd.xlane.f32.xlu0 %v1150_v21 }
 0x421   :  { %907 = vadd.xlane.f32.xlu0 %v906_v23 }
 0x422   :  { %1982 = shalt.err (!%p1979_p4)
}
 0x423   :  { %s1983_s22 = scalar_lea.hbm %s2236_s12, 128 }
 0x424   :  { %p1984_p5 = scmp.ne.s32.totalorder %s2236_s12, %s1983_s22  ;;  %p1987_p6 = scmp.lt.u32.totalorder %s1983_s22, %s2236_s12 }
 0x426   :  { %p1989_p7 = pnand %p1987_p6, %p1984_p5 }
 0x428   :  { %1992 = shalt.err (!%p1989_p7)
}
 0x429   :  { %1187 = dma.vmem_to_hbm [thread:$0]  %s1185_s18, 128, %s2236_s12, [#allocation4]   ;;  %v1267_v24 = vld [vmem:[#allocation2] ss:$0 sm:$0xff]  ;;  %vm1176_vm4 = vcmask 7168  }
 0x4aa   :  { %v1152_v25 = vpop.xlane.xlu0 %1151 }
 0x4ab   :  { %v1160_v26 = vadd.f32 %v1267_v24, %v1152_v25 }
 0x4ad   :  { %v1162_v27 = vand.u32 2147483647, %v1160_v26  ;;  %v1161_v41 = vmax.f32 %v1160_v26, 0.0 }
 0x4ae   :  { %v908_v28 = vpop.xlane.xlu0 %907 }
 0x4af   :  { %v1163_v29 = vsub.f32 0.0, %v1162_v27  ;;  %1965 = vrcp.f32 %v908_v28 }
 0x4b1   :  { %v1164_v30 = vmul.f32 1.442695, %v1163_v29 }
 0x4b3   :  { %1967 = vpow2.f32 %v1164_v30 }
 0x4b9   :  { %v1966_v32 = vpop.eup %1965 }
 0x4ba   :  { %v910_v33 = vmul.f32 %v1966_v32, %v1964_v22 }
 0x4bc   :  { %911 = vst.msk [vmem:[%s2241_s6] sm:$0xff] %vm898_vm2, %v910_v33 }
 0x4bd   :  { %v1968_v34 = vpop.eup %1967 }
 0x4be   :  { %v1166_v35 = vadd.f32 1.0, %v1968_v34  ;;  %v1169_v36 = vmul.f32 -0.5, %v1968_v34  ;;  %v1172_v38 = vand.u32 2147483647, %v1968_v34 }
 0x4c0   :  { %1969 = vlog2.f32 %v1166_v35  ;;  %v1170_v37 = vadd.f32 1.0, %v1169_v36  ;;  %vm1173_vm3 = vcmp.lt.f32.partialorder %v1172_v38, 0.0004427343 }
 0x4c2   :  { %v1171_v40 = vmul.f32 %v1968_v34, %v1170_v37 }
 0x4ca   :  { %v1970_v39 = vpop.eup %1969 }
 0x4cb   :  { %v1168_v3 = vmul.f32 0.6931472, %v1970_v39 }
 0x4cd   :  { %v1174_v42 = vsel %vm1173_vm3, %v1171_v40, %v1168_v3 }
 0x4ce   :  { %v1175_v43 = vadd.f32 %v1174_v42, %v1161_v41 }
 0x4d0   :  { %1177 = vst.msk [vmem:[%s2246_s30] sm:$0xff] %vm1176_vm4, %v1175_v43 }
 0x4d1   :  { %1993 = dma.done.wait [#allocation4], 128  }
 0x4d2   :  { %1994 = vsyncadd [#allocation4], 4294967168 }
 0x4d3   :  { %1199 = vsyncpa [#allocation4], 1 }

// kernel: scdori_forward.10
= control target key start
LH: loop header
LB: loop body
LE: loop exit
PB: predicated region body
PF: predicated region fallthrough
CT: control target
= control target key end

     0   :  { %s458_s0 = inlined_call_operand.vmem [shape: s32[8], index: 0, kind: input, shape index: {}]   ;;  %s459_s1 = inlined_call_operand.vmem [shape: f32[8,8,1], index: 1, kind: input, shape index: {}]   ;;  %s460_s2 = inlined_call_operand.vmem [shape: f32[8,64], index: 2, kind: input, shape index: {}]   ;;  %s461_s3 = inlined_call_operand.vmem [shape: f32[8,1,64], index: 3, kind: input, shape index: {}]   ;;  %s462_s4 = inlined_call_operand.vmem [shape: f32[1,64], index: 4, kind: input, shape index: {}]   ;;  %s463_s5 = inlined_call_operand.vmem [shape: f32[1,64], index: 5, kind: input, shape index: {}]   ;;  %s464_s6 = inlined_call_operand.vmem [shape: f32[8,1,64], index: 6, kind: output, shape index: {}]  }
   0x1   :  { %s11_s23 = sshll.u32 %s458_s0, 4  ;;  %s12_s23 = int_to_ptr.vmem [resolvable:$true] %s11_s23 }
   0x2   :  { %s360_s24 = scalar_lea.vmem %s12_s23, 16  ;;  %p365_p1 = scmp.lt.s32.totalorder %s12_s23, %s12_s23 }
   0x3   :  { %p361_p0 = scmp.ne.s32.totalorder %s12_s23, %s360_s24  ;;  %p366_p2 = scmp.lt.s32.totalorder %s360_s24, %s360_s24 }
   0x5   :  { %p367_p3 = por %p366_p2, %p365_p1 }
   0x7   :  { %p368_p4 = pnand %p367_p3, %p361_p0 }
   0x9   :  { %371 = shalt.err (!%p368_p4)  }
   0xa   :  { %s382_s25 = smov [#allocation3]  }
   0xb   :  { %14 = dma.vmem_to_smem %s12_s23, 16, %s382_s25, [#allocation2] }
   0xc   :  { %376 = dma.done.wait [#allocation2], 16 }
   0xd   :  { %377 = vsyncadd [#allocation2], 4294967280 }
   0xe   :  { %16 = sfence }
   0xf   :  { %s422_s26 = smov 0  }
  0x10 LB: > { %s337_s0 = sadd.s32 4294967295, %s380_s26   ;;  %p341_p5 = scmp.ge.s32.totalorder %s380_s26, 1  ;;  %s380_s26 = sphi %s422_s26, %s22_s26  }
  0x11   : > { %p205_p6 = scmp.lt.s32.totalorder %s380_s26, 9 }
  0x13   : > { %p206_p7 = pnand %p341_p5, %p205_p6 }
  0x14   : > { %p234_p8 = scmp.lt.s32.totalorder (!%p206_p7), %s337_s0, 7  ;;  %v383_v0 = vmov (!%p206_p7), 0   ;;  %s238_s8 = sld [smem:[#allocation3 + %s337_s0]] (!%p206_p7)  ;;  %v247_v2 = vld [vmem:[%s460_s2] sm:$0xff] (!%p206_p7)  ;;  %vm254_vm0 = vcmask (!%p206_p7), 523264   ;;  %vm268_vm1 = vcmask (!%p206_p7), 516096  }
  0x15   : > { %209 = sbr.rel (%p206_p7) target bundleno = 497 (0x1f1), region = 40  ;;  %355 = vset.pattern.permute.xlu0 (!%p206_p7), %v383_v0  ;;  %v264_v13 = vld [vmem:[%s462_s4] sm:$0x1] (!%p206_p7) }
  0x16   : > { %v266_v15 = vld [vmem:[%s463_s5] sm:$0x1] (!%p206_p7) }
  0x1a   : > { %p239_p9 = scmp.lt.s32.totalorder (!%p206_p7), %s238_s8, 7 }
  0x1c   : > { %s430_s27 = scalar_select %p234_p8, %s337_s0, 7 }
  0x1d   : > { %s466_s8 = smov (!%p239_p9, %s238_s8), 7 }
  0x1e   : > { %s342_s28 = sshll.u32 %s430_s27, 3  ;;  %s241_s13 = scalar_lea.vmem %s461_s3, %s466_s8 }
  0x1f   : > { %s237_s7 = scalar_lea.vmem %s459_s1, %s342_s28  ;;  %v262_v11 = vld [vmem:[%s241_s13] sm:$0x1]  ;;  %s245_s20 = scalar_lea.vmem %s464_s6, %s430_s27 }
  0x20   : > { %v246_v1 = vld [vmem:[%s237_s7] sm:$0xff] }
  0x21   : > { %250 = vperm.xlu0 %355, %v246_v1  }
  0xa0   : > { %v251_v3 = vpop.permute.xlu0 %250 }
  0xa1   : > { %v253_v4 = vmul.f32 %v251_v3, %v247_v2 }
  0xa3   : > { %v255_v5 = vsel %vm254_vm0, %v253_v4, 0.0 }
  0xa4   : > { %v256_v6 = vrot.slane %v255_v5, 4 }
  0xa6   : > { %v257_v7 = vadd.f32 %v256_v6, %v255_v5 }
  0xa8   : > { %v258_v8 = vrot.slane %v257_v7, 2 }
  0xaa   : > { %v259_v9 = vadd.f32 %v258_v8, %v257_v7 }
  0xac   : > { %v260_v10 = vrot.slane %v259_v9, 1 }
  0xae   : > { %v261_v12 = vadd.f32 %v260_v10, %v259_v9 }
  0xb0   : > { %v263_v14 = vadd.f32 %v262_v11, %v261_v12 }
  0xb2   : > { %v265_v16 = vmul.f32 %v264_v13, %v263_v14 }
  0xb4   : > { %v267_v17 = vadd.f32 %v266_v15, %v265_v16 }
  0xb6   : > { %v269_v18 = vsel %vm268_vm1, %v267_v17, -inf }
  0xb7   : > { %270 = vmax.xlane.f32.xlu0 %v269_v18 }
 0x144   : > { %v271_v19 = vpop.xlane.xlu0 %270 }
 0x145   : > { %v272_v20 = vsub.f32 %v267_v17, %v271_v19 }
 0x147   : > { %v273_v21 = vmul.f32 1.442695, %v272_v20 }
 0x149   : > { %356 = vpow2.f32 %v273_v21 }
 0x153   : > { %v357_v22 = vpop.eup %356 }
 0x154   : > { %v275_v23 = vsel %vm268_vm1, %v357_v22, 0.0 }
 0x155   : > { %276 = vadd.xlane.f32.xlu1 %v275_v23 }
 0x1e2   : > { %v277_v24 = vpop.xlane.xlu1 %276 }
 0x1e3   : > { %358 = vrcp.f32 %v277_v24 }
 0x1ed   : > { %v359_v25 = vpop.eup %358 }
 0x1ee   : > { %v279_v26 = vmul.f32 %v359_v25, %v357_v22 }
 0x1f0   : > { %280 = vst.msk [vmem:[%s245_s20] sm:$0x1] %vm268_vm1, %v279_v26 }
 0x1f1 PF: > { %s22_s26 = sadd.s32 1, %s380_s26  }
 0x1f2   : > { %p19_p10 = scmp.ge.s32.totalorder %s22_s26, 10  }
 0x1f4   :  { %21 = sbr.rel (!%p19_p10) target bundleno = 16 (0x10), region = 73 }

// kernel: scdori_forward.14
= control target key start
LH: loop header
LB: loop body
LE: loop exit
PB: predicated region body
PF: predicated region fallthrough
CT: control target
= control target key end

     0   :  { %s2127_s30 = smov 0   ;;  %s2828_s0 = inlined_call_operand.vmem [shape: f32[4,2,256], index: 0, kind: input, shape index: {}]   ;;  %s2829_s1 = inlined_call_operand.vmem [shape: bf16[256,128], index: 1, kind: input, shape index: {}]   ;;  %s2830_s2 = inlined_call_operand.vmem [shape: bf16[256,128], index: 2, kind: input, shape index: {}]   ;;  %s2831_s3 = inlined_call_operand.vmem [shape: bf16[64,256], index: 3, kind: input, shape index: {}]   ;;  %s2832_s4 = inlined_call_operand.vmem [shape: bf16[64,256], index: 4, kind: input, shape index: {}]   ;;  %s2833_s5 = inlined_call_operand.vmem [shape: f32[1,128], index: 5, kind: input, shape index: {}]   ;;  %s2834_s6 = inlined_call_operand.vmem [shape: bf16[8,64,128], index: 6, kind: input, shape index: {}]   ;;  %s2835_s7 = inlined_call_operand.vmem [shape: bf16[8,64,128], index: 7, kind: input, shape index: {}]   ;;  %s2836_s8 = inlined_call_operand.vmem [shape: f32[8,64,1], index: 8, kind: input, shape index: {}]   ;;  %s2837_s9 = inlined_call_operand.vmem [shape: f32[4,2,128], index: 9, kind: output, shape index: {}]  }
   0x1 LB: > { %s2133_s10 = sadd.s32 4294967295, %s2073_s30   ;;  %p1685_p0 = scmp.ge.s32.totalorder %s2073_s30, 1  ;;  %s2073_s30 = sphi %s2127_s30, %s19_s30  }
   0x2   : > { %p323_p1 = scmp.lt.s32.totalorder %s2073_s30, 5 }
   0x4   : > { %p324_p2 = pnand %p1685_p0, %p323_p1 }
   0x6   : > { %327 = sbr.rel (%p324_p2) target bundleno = 657 (0x291), region = 56 }
   0xd   : > { %v1730_v0 = vld [vmem:[%s2829_s1] sm:$0xff]   ;;  %v1921_v2 = vld [vmem:[%s2829_s1 + $0x8] sm:$0xff]   ;;  %v2075_v3 = vmov 0.0|0.0   ;;  %v1922_v9 = vld [vmem:[%s2829_s1 + $0x10] sm:$0xff]   ;;  %p376_p3 = scmp.lt.s32.totalorder %s2133_s10, 3  ;;  %s1688_s22 = sshll.u32 %s2133_s10, 1 }
   0xe   : > { %v1794_v1 = vld [vmem:[%s2830_s2] sm:$0xff]   ;;  %1965 = vmatprep.subr.bf16.mxu0 %v2075_v3  ;;  %2013 = vmatprep.subr.bf16.mxu1 %v2075_v3  ;;  %v1731_v4 = vunpack.c.l.bf16 %v1730_v0  ;;  %v1732_v5 = vunpack.c.h.bf16 %v1730_v0  ;;  %v1936_v8 = vld [vmem:[%s2830_s2 + $0x8] sm:$0xff]   ;;  %v1937_v10 = vld [vmem:[%s2830_s2 + $0x10] sm:$0xff]   ;;  %v1735_v11 = vunpack.c.l.bf16 %v1921_v2  ;;  %v1736_v12 = vunpack.c.h.bf16 %v1921_v2  ;;  %p382_p4 = scmp.lt.s32.totalorder %s1688_s22, 7 }
   0xf   : > { %v1795_v6 = vunpack.c.l.bf16 %v1794_v1  ;;  %v1796_v7 = vunpack.c.h.bf16 %v1794_v1  ;;  %v1799_v13 = vunpack.c.l.bf16 %v1936_v8  ;;  %v1800_v14 = vunpack.c.h.bf16 %v1936_v8  ;;  %v1923_v19 = vld [vmem:[%s2829_s1 + $0x18] sm:$0xff]   ;;  %v1924_v33 = vld [vmem:[%s2829_s1 + $0x20] sm:$0xff]   ;;  %v1925_v42 = vld [vmem:[%s2829_s1 + $0x28] sm:$0xff]   ;;  %s2199_s24 = scalar_select %p376_p3, %s2133_s10, 3 }
  0x10   : > { %v1739_v17 = vunpack.c.l.bf16 %v1922_v9  ;;  %v1740_v18 = vunpack.c.h.bf16 %v1922_v9  ;;  %v1938_v20 = vld [vmem:[%s2830_s2 + $0x18] sm:$0xff]   ;;  %v1803_v23 = vunpack.c.l.bf16 %v1937_v10  ;;  %v1804_v24 = vunpack.c.h.bf16 %v1937_v10  ;;  %v1939_v34 = vld [vmem:[%s2830_s2 + $0x20] sm:$0xff]   ;;  %v1940_v43 = vld [vmem:[%s2830_s2 + $0x28] sm:$0xff]   ;;  %s2890_s22 = smov (!%p382_p4, %s1688_s22), 7 }
  0x11   : > { %v534_v15 = vmul.f32 %v1795_v6, %v1731_v4  ;;  %v535_v16 = vmul.f32 %v1796_v7, %v1732_v5  ;;  %v536_v21 = vmul.f32 %v1799_v13, %v1735_v11  ;;  %v537_v22 = vmul.f32 %v1800_v14, %v1736_v12  ;;  %v1926_v51 = vld [vmem:[%s2829_s1 + $0x30] sm:$0xff]   ;;  %v1927_v60 = vld [vmem:[%s2829_s1 + $0x38] sm:$0xff]   ;;  %v1928_v6 = vld [vmem:[%s2829_s1 + $0x40] sm:$0xff]   ;;  %s1725_s29 = sshll.u32 %s2199_s24, 2  ;;  %s1728_s23 = sshll.u32 %s2890_s22, 6 }
  0x12   : > { %v1743_v26 = vunpack.c.l.bf16 %v1923_v19  ;;  %v1744_v27 = vunpack.c.h.bf16 %v1923_v19  ;;  %v1807_v28 = vunpack.c.l.bf16 %v1938_v20  ;;  %v538_v30 = vmul.f32 %v1803_v23, %v1739_v17  ;;  %v1941_v52 = vld [vmem:[%s2830_s2 + $0x30] sm:$0xff]   ;;  %v1942_v61 = vld [vmem:[%s2830_s2 + $0x38] sm:$0xff]   ;;  %v1943_v7 = vld [vmem:[%s2830_s2 + $0x40] sm:$0xff]   ;;  %s380_s17 = scalar_lea.vmem %s2828_s0, %s1725_s29  ;;  %s2581_s27 = scalar_lea.vmem %s2836_s8, %s1728_s23 }
  0x13   : > { %v1966_v25 = vpack.c.bf16 %v535_v16, %v534_v15  ;;  %v1969_v29 = vpack.c.bf16 %v537_v22, %v536_v21  ;;  %v539_v31 = vmul.f32 %v1804_v24, %v1740_v18  ;;  %v1808_v32 = vunpack.c.h.bf16 %v1938_v20  ;;  %v1929_v12 = vld [vmem:[%s2829_s1 + $0x48] sm:$0xff]   ;;  %v1930_v24 = vld [vmem:[%s2829_s1 + $0x50] sm:$0xff]   ;;  %s1726_s10 = sshll.u32 %s2890_s22, 5  ;;  %s1697_s15 = sshll.u32 %s2199_s24, 1 }
  0x14   : > { %v540_v35 = vmul.f32 %v1807_v28, %v1743_v26  ;;  %v1747_v36 = vunpack.c.l.bf16 %v1924_v33  ;;  %v1811_v37 = vunpack.c.l.bf16 %v1939_v34  ;;  %v1748_v40 = vunpack.c.h.bf16 %v1924_v33  ;;  %v1944_v17 = vld [vmem:[%s2830_s2 + $0x48] sm:$0xff]   ;;  %v2231_v26 = vld [vmem:[%s380_s17] sm:$0xf]  ;;  %s2622_s11 = scalar_lea.vmem %s2834_s6, %s1726_s10  ;;  %s2646_s14 = scalar_lea.vmem %s2835_s7, %s1726_s10 }
  0x15   : > { %1967 = vmatpush1.bf16.msra.mxu0 %v1966_v25  ;;  %2029 = vmatpush1.bf16.msra.mxu1 %v1966_v25  ;;  %v1972_v38 = vpack.c.bf16 %v539_v31, %v538_v30  ;;  %v541_v39 = vmul.f32 %v1808_v32, %v1744_v27  ;;  %v1812_v41 = vunpack.c.h.bf16 %v1939_v34  ;;  %v1751_v45 = vunpack.c.l.bf16 %v1925_v42  ;;  %v2229_v25 = vld [vmem:[%s2831_s3] sm:$0xff]  ;;  %v1945_v31 = vld [vmem:[%s2830_s2 + $0x50] sm:$0xff]   ;;  %s405_s18 = scalar_lea.vmem %s2837_s9, %s1697_s15 }
  0x16   : > { %1968 = vmatprep.subr.bf16.mxu0 %v2075_v3  ;;  %2014 = vmatprep.subr.bf16.mxu1 %v2075_v3  ;;  %v542_v44 = vmul.f32 %v1811_v37, %v1747_v36  ;;  %v1815_v46 = vunpack.c.l.bf16 %v1940_v43  ;;  %v1752_v49 = vunpack.c.h.bf16 %v1925_v42  ;;  %v1816_v50 = vunpack.c.h.bf16 %v1940_v43 }
  0x17   : > { %v1975_v47 = vpack.c.bf16 %v541_v39, %v540_v35  ;;  %v543_v48 = vmul.f32 %v1812_v41, %v1748_v40  ;;  %v1755_v54 = vunpack.c.l.bf16 %v1926_v51  ;;  %v1756_v55 = vunpack.c.h.bf16 %v1926_v51 }
  0x18   : > { %v544_v53 = vmul.f32 %v1815_v46, %v1751_v45  ;;  %v545_v57 = vmul.f32 %v1816_v50, %v1752_v49  ;;  %v1819_v58 = vunpack.c.l.bf16 %v1941_v52  ;;  %v1820_v59 = vunpack.c.h.bf16 %v1941_v52  ;;  %v1946_v45 = vld [vmem:[%s2830_s2 + $0x58] sm:$0xff]  }
  0x19   : > { %1970 = vmatpush1.bf16.msra.mxu0 %v1969_v29  ;;  %2030 = vmatpush1.bf16.msra.mxu1 %v1969_v29  ;;  %v1978_v56 = vpack.c.bf16 %v543_v48, %v542_v44  ;;  %v1759_v62 = vunpack.c.l.bf16 %v1927_v60  ;;  %v1760_v63 = vunpack.c.h.bf16 %v1927_v60  ;;  %v1823_v0 = vunpack.c.l.bf16 %v1942_v61  ;;  %v1931_v44 = vld [vmem:[%s2829_s1 + $0x58] sm:$0xff]  }
  0x1a   : > { %1971 = vmatprep.subr.bf16.mxu0 %v2075_v3  ;;  %2015 = vmatprep.subr.bf16.mxu1 %v2075_v3  ;;  %v1981_v1 = vpack.c.bf16 %v545_v57, %v544_v53  ;;  %v546_v2 = vmul.f32 %v1819_v58, %v1755_v54  ;;  %v547_v4 = vmul.f32 %v1820_v59, %v1756_v55  ;;  %v1824_v5 = vunpack.c.h.bf16 %v1942_v61  ;;  %v1932_v57 = vld [vmem:[%s2829_s1 + $0x60] sm:$0xff]  }
  0x1b   : > { %v619_v8 = vlaneseq  ;;  %v548_v9 = vmul.f32 %v1823_v0, %v1759_v62  ;;  %v1763_v10 = vunpack.c.l.bf16 %v1928_v6  ;;  %v1827_v11 = vunpack.c.l.bf16 %v1943_v7  ;;  %v1947_v58 = vld [vmem:[%s2830_s2 + $0x60] sm:$0xff]  }
  0x1c   : > { %v1984_v13 = vpack.c.bf16 %v547_v4, %v546_v2  ;;  %v549_v14 = vmul.f32 %v1824_v5, %v1760_v63  ;;  %v1764_v15 = vunpack.c.h.bf16 %v1928_v6  ;;  %v1828_v16 = vunpack.c.h.bf16 %v1943_v7  ;;  %v1933_v2 = vld [vmem:[%s2829_s1 + $0x68] sm:$0xff]  }
  0x1d   : > { %1973 = vmatpush1.bf16.msra.mxu0 %v1972_v38  ;;  %2031 = vmatpush1.bf16.msra.mxu1 %v1972_v38  ;;  %v1767_v18 = vunpack.c.l.bf16 %v1929_v12  ;;  %v2221_v19 = vshrl.u32 %v619_v8, 7  ;;  %v550_v20 = vmul.f32 %v1827_v11, %v1763_v10  ;;  %v1768_v21 = vunpack.c.h.bf16 %v1929_v12  ;;  %v1948_v4 = vld [vmem:[%s2830_s2 + $0x68] sm:$0xff]   ;;  %v1934_v12 = vld [vmem:[%s2829_s1 + $0x70] sm:$0xff]  }
  0x1e   : > { %1974 = vmatprep.subr.bf16.mxu0 %v2075_v3  ;;  %2016 = vmatprep.subr.bf16.mxu1 %v2075_v3  ;;  %v1831_v22 = vunpack.c.l.bf16 %v1944_v17  ;;  %v1832_v23 = vunpack.c.h.bf16 %v1944_v17  ;;  %v1987_v27 = vpack.c.bf16 %v549_v14, %v548_v9  ;;  %v551_v28 = vmul.f32 %v1828_v16, %v1764_v15 }
  0x1f   : > { %v2234_v29 = vsub.s32 0, %v2221_v19  ;;  %v625_v30 = vsub.s32 2, %v2221_v19  ;;  %v2243_v32 = vsub.s32 1, %v2221_v19  ;;  %v726_v33 = vsub.s32 3, %v2221_v19 }
  0x20   : > { %v1771_v34 = vunpack.c.l.bf16 %v1930_v24  ;;  %v575_v35 = vunpack.c.h.bf16 %v2229_v25  ;;  %v552_v37 = vmul.f32 %v1831_v22, %v1767_v18  ;;  %v553_v38 = vmul.f32 %v1832_v23, %v1768_v21  ;;  %v1935_v22 = vld [vmem:[%s2829_s1 + $0x78] sm:$0xff]  }
  0x21   : > { %1976 = vmatpush1.bf16.msra.mxu0 %v1975_v47  ;;  %2032 = vmatpush1.bf16.msra.mxu1 %v1975_v47  ;;  %v626_v36 = vrot.slane %v2231_v26, %v625_v30  ;;  %v1772_v39 = vunpack.c.h.bf16 %v1930_v24  ;;  %v727_v40 = vrot.slane %v2231_v26, %v726_v33  ;;  %v1990_v41 = vpack.c.bf16 %v551_v28, %v550_v20  ;;  %v1950_v23 = vld [vmem:[%s2830_s2 + $0x78] sm:$0xff]  }
  0x22   : > { %1977 = vmatprep.subr.bf16.mxu0 %v2075_v3  ;;  %2017 = vmatprep.subr.bf16.mxu1 %v2075_v3  ;;  %v1835_v42 = vunpack.c.l.bf16 %v1945_v31  ;;  %v1836_v43 = vunpack.c.h.bf16 %v1945_v31  ;;  %v1775_v49 = vunpack.c.l.bf16 %v1931_v44  ;;  %v1776_v50 = vunpack.c.h.bf16 %v1931_v44 }
  0x23   : > { %v2260_v46 = vrot.slane %v626_v36, %v2234_v29  ;;  %v2265_v47 = vrot.slane %v727_v40, %v2243_v32  ;;  %v1839_v51 = vunpack.c.l.bf16 %v1946_v45  ;;  %v1993_v53 = vpack.c.bf16 %v553_v38, %v552_v37 }
  0x24   : > { %v554_v54 = vmul.f32 %v1835_v42, %v1771_v34  ;;  %v555_v55 = vmul.f32 %v1836_v43, %v1772_v39  ;;  %v1779_v60 = vunpack.c.l.bf16 %v1932_v57  ;;  %v1843_v61 = vunpack.c.l.bf16 %v1947_v58  ;;  %v567_v42 = vld [vmem:[%s2831_s3 + $0x8] sm:$0xff] }
  0x25   : > { %1979 = vmatpush1.bf16.msra.mxu0 %v1978_v56  ;;  %2033 = vmatpush1.bf16.msra.mxu1 %v1978_v56  ;;  %v638_v48 = vmul.f32 %v2260_v46, %v575_v35  ;;  %v739_v52 = vmul.f32 %v2265_v47, %v575_v35  ;;  %v1840_v56 = vunpack.c.h.bf16 %v1946_v45  ;;  %v556_v59 = vmul.f32 %v1839_v51, %v1775_v49 }
  0x26   : > { %1980 = vmatprep.subr.bf16.mxu0 %v2075_v3  ;;  %2018 = vmatprep.subr.bf16.mxu1 %v2075_v3  ;;  %v1996_v62 = vpack.c.bf16 %v555_v55, %v554_v54  ;;  %v1780_v0 = vunpack.c.h.bf16 %v1932_v57  ;;  %v558_v5 = vmul.f32 %v1843_v61, %v1779_v60  ;;  %v1783_v6 = vunpack.c.l.bf16 %v1933_v2 }
  0x27   : > { %948 = vmatprep.mubr.f32.mxu0 %v638_v48  ;;  %1028 = vmatprep.mubr.f32.mxu1 %v739_v52  ;;  %v557_v63 = vmul.f32 %v1840_v56, %v1776_v50  ;;  %v1847_v7 = vunpack.c.l.bf16 %v1948_v4  ;;  %v1784_v10 = vunpack.c.h.bf16 %v1933_v2  ;;  %v1848_v11 = vunpack.c.h.bf16 %v1948_v4  ;;  %v568_v50 = vld [vmem:[%s2831_s3 + $0x10] sm:$0xff] }
  0x28   : > { %v1787_v15 = vunpack.c.l.bf16 %v1934_v12  ;;  %v1788_v16 = vunpack.c.h.bf16 %v1934_v12  ;;  %v1791_v24 = vunpack.c.l.bf16 %v1935_v22  ;;  %v1855_v28 = vunpack.c.l.bf16 %v1950_v23 }
  0x29   : > { %1982 = vmatpush1.bf16.msra.mxu0 %v1981_v1  ;;  %2034 = vmatpush1.bf16.msra.mxu1 %v1981_v1  ;;  %v1844_v1 = vunpack.c.h.bf16 %v1947_v58  ;;  %v1999_v8 = vpack.c.bf16 %v557_v63, %v556_v59  ;;  %v560_v14 = vmul.f32 %v1847_v7, %v1783_v6  ;;  %v561_v18 = vmul.f32 %v1848_v11, %v1784_v10  ;;  %v570_v63 = vld [vmem:[%s2831_s3 + $0x20] sm:$0xff]  ;;  %v571_v6 = vld [vmem:[%s2831_s3 + $0x28] sm:$0xff] }
  0x2a   : > { %1983 = vmatprep.subr.bf16.mxu0 %v2075_v3  ;;  %2019 = vmatprep.subr.bf16.mxu1 %v2075_v3  ;;  %v1856_v36 = vunpack.c.h.bf16 %v1950_v23  ;;  %v622_v37 = vrot.slane %v2231_v26, %v2234_v29  ;;  %v723_v38 = vrot.slane %v2231_v26, %v2243_v32  ;;  %v564_v40 = vmul.f32 %v1855_v28, %v1791_v24 }
  0x2b   : > { %v559_v9 = vmul.f32 %v1844_v1, %v1780_v0  ;;  %v2005_v31 = vpack.c.bf16 %v561_v18, %v560_v14  ;;  %v574_v43 = vunpack.c.l.bf16 %v2229_v25  ;;  %v577_v49 = vunpack.c.h.bf16 %v567_v42  ;;  %v573_v18 = vld [vmem:[%s2831_s3 + $0x38] sm:$0xff] }
  0x2c   : > { %v2314_v44 = vrot.slane %v622_v37, %v2234_v29  ;;  %v2317_v45 = vrot.slane %v723_v38, %v2243_v32  ;;  %v576_v52 = vunpack.c.l.bf16 %v567_v42  ;;  %v579_v55 = vunpack.c.h.bf16 %v568_v50  ;;  %v590_v37 = vld [vmem:[%s2832_s4] sm:$0xff] }
  0x2d   : > { %1985 = vmatpush1.bf16.msra.mxu0 %v1984_v13  ;;  %2035 = vmatpush1.bf16.msra.mxu1 %v1984_v13  ;;  %v1949_v13 = vld [vmem:[%s2830_s2 + $0x70] sm:$0xff]   ;;  %v2002_v17 = vpack.c.bf16 %v559_v9, %v558_v5  ;;  %v741_v54 = vmul.f32 %v2265_v47, %v577_v49  ;;  %v615_v56 = vadd.f32 1e-20, %v2231_v26  ;;  %v578_v59 = vunpack.c.l.bf16 %v568_v50 }
  0x2e   : > { %1986 = vmatprep.subr.bf16.mxu0 %v2075_v3  ;;  %2020 = vmatprep.subr.bf16.mxu1 %v2075_v3  ;;  %v1851_v20 = vunpack.c.l.bf16 %v1949_v13  ;;  %v1852_v21 = vunpack.c.h.bf16 %v1949_v13  ;;  %v637_v25 = vmul.f32 %v2314_v44, %v574_v43  ;;  %v738_v51 = vmul.f32 %v2317_v45, %v574_v43  ;;  %v572_v13 = vld [vmem:[%s2831_s3 + $0x30] sm:$0xff] }
  0x2f   : > { %v639_v57 = vmul.f32 %v2314_v44, %v576_v52  ;;  %v740_v58 = vmul.f32 %v2317_v45, %v576_v52  ;;  %v642_v60 = vmul.f32 %v2260_v46, %v579_v55  ;;  %v743_v61 = vmul.f32 %v2265_v47, %v579_v55 }
  0x30   : > { %v562_v34 = vmul.f32 %v1851_v20, %v1787_v15  ;;  %v563_v35 = vmul.f32 %v1852_v21, %v1788_v16  ;;  %2057 = vrcp.f32 %v615_v56  ;;  %v641_v26 = vmul.f32 %v2314_v44, %v578_v59 }
  0x31   : > { %1988 = vmatpush1.bf16.msra.mxu0 %v1987_v27  ;;  %2036 = vmatpush1.bf16.msra.mxu1 %v1987_v27  ;;  %v1792_v27 = vunpack.c.h.bf16 %v1935_v22  ;;  %v742_v0 = vmul.f32 %v2317_v45, %v578_v59  ;;  %v583_v4 = vunpack.c.h.bf16 %v570_v63  ;;  %v585_v11 = vunpack.c.h.bf16 %v571_v6 }
  0x32   : > { %1989 = vmatprep.subr.bf16.mxu0 %v2075_v3  ;;  %2021 = vmatprep.subr.bf16.mxu1 %v2075_v3  ;;  %v2008_v39 = vpack.c.bf16 %v563_v35, %v562_v34  ;;  %v584_v15 = vunpack.c.l.bf16 %v571_v6  ;;  %v587_v16 = vunpack.c.h.bf16 %v572_v13  ;;  %v586_v23 = vunpack.c.l.bf16 %v572_v13 }
  0x33   : > { %v646_v10 = vmul.f32 %v2260_v46, %v583_v4  ;;  %v747_v12 = vmul.f32 %v2265_v47, %v583_v4  ;;  %v648_v20 = vmul.f32 %v2260_v46, %v585_v11  ;;  %v749_v21 = vmul.f32 %v2265_v47, %v585_v11 }
  0x34   : > { %v589_v24 = vunpack.c.h.bf16 %v573_v18  ;;  %v650_v28 = vmul.f32 %v2260_v46, %v587_v16  ;;  %v751_v35 = vmul.f32 %v2265_v47, %v587_v16  ;;  %v649_v38 = vmul.f32 %v2314_v44, %v586_v23 }
  0x35   : > { %1991 = vmatpush1.bf16.msra.mxu0 %v1990_v41  ;;  %2037 = vmatpush1.bf16.msra.mxu1 %v1990_v41  ;;  %v565_v41 = vmul.f32 %v1856_v36, %v1792_v27  ;;  %v647_v27 = vmul.f32 %v2314_v44, %v584_v15  ;;  %v599_v19 = vunpack.c.h.bf16 %v590_v37  ;;  %v598_v50 = vunpack.c.l.bf16 %v590_v37 }
  0x36   : > { %1992 = vmatprep.subr.bf16.mxu0 %v2075_v3  ;;  %2022 = vmatprep.subr.bf16.mxu1 %v2075_v3  ;;  %v753_v43 = vmul.f32 %v2265_v47, %v589_v24  ;;  %vm1589_vm0 = vcmask 1040384  }
  0x37   : > { %v2011_v48 = vpack.c.bf16 %v565_v41, %v564_v40  ;;  %v588_v40 = vunpack.c.l.bf16 %v573_v18 }
  0x39   : > { %1994 = vmatpush1.bf16.msra.mxu0 %v1993_v53  ;;  %2038 = vmatpush1.bf16.msra.mxu1 %v1993_v53  ;;  %v640_v53 = vmul.f32 %v2260_v46, %v577_v49  ;;  %v651_v49 = vmul.f32 %v2314_v44, %v588_v40 }
  0x3a   : > { %1995 = vmatprep.subr.bf16.mxu0 %v2075_v3  ;;  %2023 = vmatprep.subr.bf16.mxu1 %v2075_v3  ;;  %v2058_v22 = vpop.eup %2057 }
  0x3b   : > { %v677_v34 = vrot.slane %v2058_v22, %v625_v30  ;;  %v777_v36 = vrot.slane %v2058_v22, %v726_v33  ;;  %v673_v41 = vrot.slane %v2058_v22, %v2234_v29  ;;  %v750_v30 = vmul.f32 %v2317_v45, %v586_v23 }
  0x3c   : > { %v773_v42 = vrot.slane %v2058_v22, %v2243_v32  ;;  %v597_v22 = vld [vmem:[%s2832_s4 + $0x38] sm:$0xff] }
  0x3d   : > { %1997 = vmatpush1.bf16.msra.mxu0 %v1996_v62  ;;  %2039 = vmatpush1.bf16.msra.mxu1 %v1996_v62  ;;  %v2377_v33 = vrot.slane %v677_v34, %v2234_v29  ;;  %v613_v34 = vunpack.c.h.bf16 %v597_v22  ;;  %v612_v37 = vunpack.c.l.bf16 %v597_v22 }
  0x3e   : > { %1998 = vmatprep.subr.bf16.mxu0 %v2075_v3  ;;  %2024 = vmatprep.subr.bf16.mxu1 %v2075_v3  ;;  %v2392_v52 = vrot.slane %v773_v42, %v2243_v32  ;;  %v2447_v42 = vld [vmem:[%s2833_s5] ss:$0 sm:$0xff] }
  0x41   : > { %2000 = vmatpush1.bf16.msra.mxu0 %v1999_v8  ;;  %2040 = vmatpush1.bf16.msra.mxu1 %v1999_v8  ;;  %v582_v8 = vunpack.c.l.bf16 %v570_v63 }
  0x42   : > { %2001 = vmatprep.subr.bf16.mxu0 %v2075_v3  ;;  %2025 = vmatprep.subr.bf16.mxu1 %v2075_v3 }
  0x43   : > { %v645_v14 = vmul.f32 %v2314_v44, %v582_v8 }
  0x45   : > { %2003 = vmatpush1.bf16.msra.mxu0 %v2002_v17  ;;  %2041 = vmatpush1.bf16.msra.mxu1 %v2002_v17  ;;  %v746_v17 = vmul.f32 %v2317_v45, %v582_v8 }
  0x46   : > { %2004 = vmatprep.subr.bf16.mxu0 %v2075_v3  ;;  %2026 = vmatprep.subr.bf16.mxu1 %v2075_v3 }
  0x49   : > { %2006 = vmatpush1.bf16.msra.mxu0 %v2005_v31  ;;  %2042 = vmatpush1.bf16.msra.mxu1 %v2005_v31  ;;  %v748_v31 = vmul.f32 %v2317_v45, %v584_v15 }
  0x4a   : > { %2007 = vmatprep.subr.bf16.mxu0 %v2075_v3  ;;  %2027 = vmatprep.subr.bf16.mxu1 %v2075_v3 }
  0x4d   : > { %2009 = vmatpush1.bf16.msra.mxu0 %v2008_v39  ;;  %2043 = vmatpush1.bf16.msra.mxu1 %v2008_v39  ;;  %v652_v39 = vmul.f32 %v2260_v46, %v589_v24 }
  0x4e   : > { %2010 = vmatprep.subr.bf16.mxu0 %v2075_v3  ;;  %2028 = vmatprep.subr.bf16.mxu1 %v2075_v3  ;;  %v569_v3 = vld [vmem:[%s2831_s3 + $0x18] sm:$0xff] }
  0x4f   : > { %v581_v62 = vunpack.c.h.bf16 %v569_v3  ;;  %v580_v1 = vunpack.c.l.bf16 %v569_v3 }
  0x51   : > { %2012 = vmatpush1.bf16.msra.mxu0 %v2011_v48  ;;  %2044 = vmatpush1.bf16.msra.mxu1 %v2011_v48  ;;  %v644_v2 = vmul.f32 %v2260_v46, %v581_v62  ;;  %v745_v5 = vmul.f32 %v2265_v47, %v581_v62  ;;  %v643_v7 = vmul.f32 %v2314_v44, %v580_v1  ;;  %v591_v46 = vld [vmem:[%s2832_s4 + $0x8] sm:$0xff]  ;;  %v592_v44 = vld [vmem:[%s2832_s4 + $0x10] sm:$0xff] }
  0x52   : > { %v744_v9 = vmul.f32 %v2317_v45, %v580_v1  ;;  %v2381_v48 = vrot.slane %v777_v36, %v2243_v32  ;;  %v689_v47 = vmul.f32 %v2377_v33, %v599_v19  ;;  %v600_v55 = vunpack.c.l.bf16 %v591_v46 }
  0x53   : > { %v603_v3 = vunpack.c.h.bf16 %v592_v44  ;;  %v602_v59 = vunpack.c.l.bf16 %v592_v44 }
  0x54   : > { %949 = vmatmul.mubr.f32.vlgmr.msra.gmra.mrb[0].mxu0 %v637_v25  ;;  %1029 = vmatmul.mubr.f32.vlgmr.msra.gmra.mrb[0].mxu1 %v738_v51  ;;  %v2388_v25 = vrot.slane %v673_v41, %v2234_v29  ;;  %v752_v51 = vmul.f32 %v2317_v45, %v588_v40  ;;  %v788_v45 = vmul.f32 %v2392_v52, %v598_v50 }
  0x55   : > { %953 = vmatprep.mubr.f32.mxu0 %v640_v53  ;;  %1033 = vmatprep.mubr.f32.mxu1 %v741_v54  ;;  %v601_v53 = vunpack.c.h.bf16 %v591_v46  ;;  %v789_v54 = vmul.f32 %v2381_v48, %v599_v19  ;;  %v793_v63 = vmul.f32 %v2381_v48, %v603_v3  ;;  %v802_v41 = vmul.f32 %v2392_v52, %v612_v37 }
  0x56   : > { %v688_v29 = vmul.f32 %v2388_v25, %v598_v50  ;;  %v702_v40 = vmul.f32 %v2388_v25, %v612_v37 }
  0x57   : > { %v691_v32 = vmul.f32 %v2377_v33, %v601_v53  ;;  %v791_v56 = vmul.f32 %v2381_v48, %v601_v53 }
  0x58   : > { %954 = vmatmul.mubr.f32.gmra.mrb[2].mxu0 %v639_v57  ;;  %1034 = vmatmul.mubr.f32.gmra.mrb[2].mxu1 %v740_v58  ;;  %v593_v57 = vld [vmem:[%s2832_s4 + $0x18] sm:$0xff]  ;;  %v690_v58 = vmul.f32 %v2388_v25, %v600_v55 }
  0x59   : > { %958 = vmatprep.mubr.f32.mxu0 %v642_v60  ;;  %1038 = vmatprep.mubr.f32.mxu1 %v743_v61  ;;  %v790_v60 = vmul.f32 %v2392_v52, %v600_v55  ;;  %v693_v61 = vmul.f32 %v2377_v33, %v603_v3  ;;  %v605_v62 = vunpack.c.h.bf16 %v593_v57  ;;  %v604_v1 = vunpack.c.l.bf16 %v593_v57 }
  0x5b   : > { %v695_v4 = vmul.f32 %v2377_v33, %v605_v62  ;;  %v795_v6 = vmul.f32 %v2381_v48, %v605_v62  ;;  %v694_v8 = vmul.f32 %v2388_v25, %v604_v1 }
  0x5c   : > { %959 = vmatmul.mubr.f32.gmra.mrb[4].mxu0 %v641_v26  ;;  %1039 = vmatmul.mubr.f32.gmra.mrb[4].mxu1 %v742_v0  ;;  %v594_v26 = vld [vmem:[%s2832_s4 + $0x20] sm:$0xff]  ;;  %v692_v0 = vmul.f32 %v2388_v25, %v602_v59 }
  0x5d   : > { %963 = vmatprep.mubr.f32.mxu0 %v644_v2  ;;  %1043 = vmatprep.mubr.f32.mxu1 %v745_v5  ;;  %v792_v2 = vmul.f32 %v2392_v52, %v602_v59  ;;  %v607_v5 = vunpack.c.h.bf16 %v594_v26 }
  0x5f   : > { %v697_v11 = vmul.f32 %v2377_v33, %v607_v5  ;;  %v797_v13 = vmul.f32 %v2381_v48, %v607_v5 }
  0x60   : > { %964 = vmatmul.mubr.f32.gmra.mrb[6].mxu0 %v643_v7  ;;  %1044 = vmatmul.mubr.f32.gmra.mrb[6].mxu1 %v744_v9  ;;  %v595_v7 = vld [vmem:[%s2832_s4 + $0x28] sm:$0xff]  ;;  %v606_v9 = vunpack.c.l.bf16 %v594_v26 }
  0x61   : > { %968 = vmatprep.mubr.f32.mxu0 %v646_v10  ;;  %1048 = vmatprep.mubr.f32.mxu1 %v747_v12  ;;  %v794_v10 = vmul.f32 %v2392_v52, %v604_v1  ;;  %v609_v12 = vunpack.c.h.bf16 %v595_v7  ;;  %v608_v16 = vunpack.c.l.bf16 %v595_v7 }
  0x62   : > { %v696_v15 = vmul.f32 %v2388_v25, %v606_v9 }
  0x63   : > { %v699_v18 = vmul.f32 %v2377_v33, %v609_v12  ;;  %v698_v23 = vmul.f32 %v2388_v25, %v608_v16 }
  0x64   : > { %969 = vmatmul.mubr.f32.gmra.mrb[8].mxu0 %v645_v14  ;;  %1049 = vmatmul.mubr.f32.gmra.mrb[8].mxu1 %v746_v17  ;;  %v596_v14 = vld [vmem:[%s2832_s4 + $0x30] sm:$0xff]  ;;  %v796_v17 = vmul.f32 %v2392_v52, %v606_v9 }
  0x65   : > { %973 = vmatprep.mubr.f32.mxu0 %v648_v20  ;;  %1053 = vmatprep.mubr.f32.mxu1 %v749_v21  ;;  %v611_v20 = vunpack.c.h.bf16 %v596_v14  ;;  %v799_v21 = vmul.f32 %v2381_v48, %v609_v12  ;;  %v610_v24 = vunpack.c.l.bf16 %v596_v14 }
  0x67   : > { %v800_v36 = vmul.f32 %v2392_v52, %v610_v24 }
  0x68   : > { %974 = vmatmul.mubr.f32.gmra.mrb[10].mxu0 %v647_v27  ;;  %1054 = vmatmul.mubr.f32.gmra.mrb[10].mxu1 %v748_v31  ;;  %v798_v27 = vmul.f32 %v2392_v52, %v608_v16  ;;  %v801_v31 = vmul.f32 %v2381_v48, %v611_v20 }
  0x69   : > { %978 = vmatprep.mubr.f32.mxu0 %v650_v28  ;;  %1058 = vmatprep.mubr.f32.mxu1 %v751_v35  ;;  %v701_v28 = vmul.f32 %v2377_v33, %v611_v20  ;;  %v700_v35 = vmul.f32 %v2388_v25, %v610_v24 }
  0x6c   : > { %979 = vmatmul.mubr.f32.gmra.mrb[12].mxu0 %v649_v38  ;;  %1059 = vmatmul.mubr.f32.gmra.mrb[12].mxu1 %v750_v30  ;;  %v703_v38 = vmul.f32 %v2377_v33, %v613_v34  ;;  %v2076_v30 = vmov 0  }
  0x6d   : > { %983 = vmatprep.mubr.f32.mxu0 %v652_v39  ;;  %1063 = vmatprep.mubr.f32.mxu1 %v753_v43  ;;  %v803_v39 = vmul.f32 %v2381_v48, %v613_v34 }
  0x6e   : > { %2056 = vset.pattern.permute.xlu1 %v2076_v30  ;;  %2055 = vset.pattern.permute.xlu0 %v2076_v30 }
  0x70   : > { %984 = vmatmul.mubr.f32.gmra.mrb[14].mxu0 %v651_v49  ;;  %1064 = vmatmul.mubr.f32.gmra.mrb[14].mxu1 %v752_v51 }
  0x71   : > { %988 = vmatprep.mubr.f32.mxu0 %v689_v47  ;;  %1068 = vmatprep.mubr.f32.mxu1 %v789_v54 }
  0x74   : > { %989 = vmatmul.mubr.f32.gmra.mrb[16].mxu0 %v688_v29  ;;  %1069 = vmatmul.mubr.f32.gmra.mrb[16].mxu1 %v788_v45 }
  0x75   : > { %993 = vmatprep.mubr.f32.mxu0 %v691_v32  ;;  %1073 = vmatprep.mubr.f32.mxu1 %v791_v56 }
  0x78   : > { %994 = vmatmul.mubr.f32.gmra.mrb[18].mxu0 %v690_v58  ;;  %1074 = vmatmul.mubr.f32.gmra.mrb[18].mxu1 %v790_v60 }
  0x79   : > { %998 = vmatprep.mubr.f32.mxu0 %v693_v61  ;;  %1078 = vmatprep.mubr.f32.mxu1 %v793_v63 }
  0x7c   : > { %999 = vmatmul.mubr.f32.gmra.mrb[20].mxu0 %v692_v0  ;;  %1079 = vmatmul.mubr.f32.gmra.mrb[20].mxu1 %v792_v2 }
  0x7d   : > { %1003 = vmatprep.mubr.f32.mxu0 %v695_v4  ;;  %1083 = vmatprep.mubr.f32.mxu1 %v795_v6 }
  0x80   : > { %1004 = vmatmul.mubr.f32.gmra.mrb[22].mxu0 %v694_v8  ;;  %1084 = vmatmul.mubr.f32.gmra.mrb[22].mxu1 %v794_v10 }
  0x81   : > { %1008 = vmatprep.mubr.f32.mxu0 %v697_v11  ;;  %1088 = vmatprep.mubr.f32.mxu1 %v797_v13 }
  0x84   : > { %1009 = vmatmul.mubr.f32.gmra.mrb[24].mxu0 %v696_v15  ;;  %1089 = vmatmul.mubr.f32.gmra.mrb[24].mxu1 %v796_v17 }
  0x85   : > { %1013 = vmatprep.mubr.f32.mxu0 %v699_v18  ;;  %1093 = vmatprep.mubr.f32.mxu1 %v799_v21 }
  0x88   : > { %1014 = vmatmul.mubr.f32.gmra.mrb[26].mxu0 %v698_v23  ;;  %1094 = vmatmul.mubr.f32.gmra.mrb[26].mxu1 %v798_v27 }
  0x89   : > { %1018 = vmatprep.mubr.f32.mxu0 %v701_v28  ;;  %1098 = vmatprep.mubr.f32.mxu1 %v801_v31 }
  0x8c   : > { %1019 = vmatmul.mubr.f32.gmra.mrb[28].mxu0 %v700_v35  ;;  %1099 = vmatmul.mubr.f32.gmra.mrb[28].mxu1 %v800_v36 }
  0x8d   : > { %1023 = vmatprep.mubr.f32.mxu0 %v703_v38  ;;  %1103 = vmatprep.mubr.f32.mxu1 %v803_v39 }
  0x90   : > { %1024 = vmatmul.mubr.f32.gmra.mrb[30].mxu0 %v702_v40  ;;  %1104 = vmatmul.mubr.f32.gmra.mrb[30].mxu1 %v802_v41 }
 0x127   : > { %v950_v19 = vpop.f32.mrb[0].mxu0  ;;  %v1030_v33 = vpop.f32.mrb[0].mxu1 }
 0x128   : > { %v2450_v43 = vmul.f32 %v2447_v42, %v950_v19  ;;  %v2453_v48 = vmul.f32 %v2447_v42, %v1030_v33  ;;  %v952_v46 = vpop.f32.mrb[1].mxu0  ;;  %v1032_v49 = vpop.f32.mrb[1].mxu1 }
 0x12a   : > { %1367 = vmax.xlane.f32.xlu1 %v2453_v48  ;;  %1148 = vmax.xlane.f32.xlu0 %v2450_v43 }
 0x12b   : > { %v955_v50 = vpop.f32.mrb[2].mxu0  ;;  %v1035_v25 = vpop.f32.mrb[2].mxu1 }
 0x12c   : > { %v2458_v51 = vmul.f32 %v2447_v42, %v955_v50  ;;  %v2461_v52 = vmul.f32 %v2447_v42, %v1035_v25  ;;  %v957_v47 = vpop.f32.mrb[3].mxu0  ;;  %v1037_v53 = vpop.f32.mrb[3].mxu1 }
 0x12e   : > { %1369 = vmax.xlane.f32.xlu1 %v2461_v52  ;;  %1150 = vmax.xlane.f32.xlu0 %v2458_v51 }
 0x12f   : > { %v960_v54 = vpop.f32.mrb[4].mxu0  ;;  %v1040_v44 = vpop.f32.mrb[4].mxu1 }
 0x130   : > { %v2466_v29 = vmul.f32 %v2447_v42, %v960_v54  ;;  %v962_v55 = vpop.f32.mrb[5].mxu0  ;;  %v1042_v45 = vpop.f32.mrb[5].mxu1  ;;  %v2469_v32 = vmul.f32 %v2447_v42, %v1040_v44 }
 0x132   : > { %1152 = vmax.xlane.f32.xlu1 %v2466_v29 }
 0x133   : > { %v965_v3 = vpop.f32.mrb[6].mxu0  ;;  %v1045_v56 = vpop.f32.mrb[6].mxu1 }
 0x134   : > { %v967_v57 = vpop.f32.mrb[7].mxu0  ;;  %v1047_v58 = vpop.f32.mrb[7].mxu1  ;;  %v2473_v59 = vmul.f32 %v2447_v42, %v965_v3  ;;  %v2480_v0 = vmul.f32 %v2447_v42, %v1045_v56 }
 0x136   : > { %1371 = vmax.xlane.f32.xlu1 %v2469_v32 }
 0x137   : > { %v970_v60 = vpop.f32.mrb[8].mxu0  ;;  %v1050_v61 = vpop.f32.mrb[8].mxu1 }
 0x138   : > { %v2477_v62 = vmul.f32 %v2447_v42, %v970_v60  ;;  %v972_v63 = vpop.f32.mrb[9].mxu0  ;;  %v1052_v26 = vpop.f32.mrb[9].mxu1  ;;  %v2485_v6 = vmul.f32 %v2447_v42, %v1050_v61 }
 0x13a   : > { %1154 = vmax.xlane.f32.xlu1 %v2473_v59  ;;  %1156 = vmax.xlane.f32.xlu0 %v2477_v62 }
 0x13b   : > { %v975_v1 = vpop.f32.mrb[10].mxu0  ;;  %v1055_v2 = vpop.f32.mrb[10].mxu1 }
 0x13c   : > { %v977_v4 = vpop.f32.mrb[11].mxu0  ;;  %v1057_v5 = vpop.f32.mrb[11].mxu1  ;;  %v2492_v12 = vmul.f32 %v2447_v42, %v975_v1  ;;  %v2497_v17 = vmul.f32 %v2447_v42, %v1055_v2 }
 0x13e   : > { %1373 = vmax.xlane.f32.xlu1 %v2480_v0 }
 0x13f   : > { %v980_v7 = vpop.f32.mrb[12].mxu0  ;;  %v1060_v8 = vpop.f32.mrb[12].mxu1 }
 0x140   : > { %v2489_v9 = vmul.f32 %v2447_v42, %v980_v7  ;;  %v982_v10 = vpop.f32.mrb[13].mxu0  ;;  %v1062_v11 = vpop.f32.mrb[13].mxu1  ;;  %v2504_v24 = vmul.f32 %v2447_v42, %v1060_v8 }
 0x142   : > { %1375 = vmax.xlane.f32.xlu1 %v2485_v6  ;;  %1160 = vmax.xlane.f32.xlu0 %v2489_v9 }
 0x143   : > { %v985_v13 = vpop.f32.mrb[14].mxu0  ;;  %v1065_v14 = vpop.f32.mrb[14].mxu1 }
 0x144   : > { %v987_v15 = vpop.f32.mrb[15].mxu0  ;;  %v1067_v16 = vpop.f32.mrb[15].mxu1  ;;  %v2509_v35 = vmul.f32 %v2447_v42, %v985_v13  ;;  %v2516_v41 = vmul.f32 %v2447_v42, %v1065_v14 }
 0x146   : > { %1158 = vmax.xlane.f32.xlu1 %v2492_v12  ;;  %2849 = vst [vmem:[#allocation3_spill] sm:$0xff] %v2516_v41 }
 0x147   : > { %v990_v18 = vpop.f32.mrb[16].mxu0  ;;  %v1070_v20 = vpop.f32.mrb[16].mxu1 }
 0x148   : > { %v2501_v21 = vmul.f32 %v2447_v42, %v990_v18  ;;  %v992_v22 = vpop.f32.mrb[17].mxu0  ;;  %v1072_v23 = vpop.f32.mrb[17].mxu1  ;;  %v2525_v50 = vmul.f32 %v2447_v42, %v1070_v20  ;;  %v1715_v20 = vld [vmem:[%s2581_s27 + $0x40] sm:$0xff] }
 0x149   : > { %v1302_v22 = vld [vmem:[%s2581_s27 + $0x20] sm:$0xff]  ;;  %v1299_v23 = vld [vmem:[%s2581_s27 + $0x8] sm:$0xff] }
 0x14a   : > { %1377 = vmax.xlane.f32.xlu1 %v2497_v17  ;;  %1177 = vmin.xlane.f32.xlu0 %v2501_v21  ;;  %2850 = vst [vmem:[#allocation4_spill] sm:$0xff] %v2525_v50 }
 0x14b   : > { %v995_v27 = vpop.f32.mrb[18].mxu0  ;;  %v1075_v28 = vpop.f32.mrb[18].mxu1 }
 0x14c   : > { %v997_v31 = vpop.f32.mrb[19].mxu0  ;;  %v1077_v34 = vpop.f32.mrb[19].mxu1  ;;  %v2534_v45 = vmul.f32 %v2447_v42, %v995_v27  ;;  %v2545_v63 = vmul.f32 %v2447_v42, %v1075_v28  ;;  %v1303_v27 = vld [vmem:[%s2581_s27 + $0x28] sm:$0xff] }
 0x14d   : > { %v1716_v28 = vld [vmem:[%s2581_s27 + $0x48] sm:$0xff]  ;;  %v1304_v31 = vld [vmem:[%s2581_s27 + $0x30] sm:$0xff] }
 0x14e   : > { %1379 = vmax.xlane.f32.xlu1 %v2504_v24  ;;  %2853 = vst [vmem:[#allocation7_spill] sm:$0xff] %v2545_v63  ;;  %v1300_v34 = vld [vmem:[%s2581_s27 + $0x10] sm:$0xff] }
 0x14f   : > { %v1000_v36 = vpop.f32.mrb[20].mxu0  ;;  %v1080_v37 = vpop.f32.mrb[20].mxu1 }
 0x150   : > { %v2513_v38 = vmul.f32 %v2447_v42, %v1000_v36  ;;  %v1002_v39 = vpop.f32.mrb[21].mxu0  ;;  %v1082_v40 = vpop.f32.mrb[21].mxu1  ;;  %v2555_v8 = vmul.f32 %v2447_v42, %v1080_v37  ;;  %v1305_v36 = vld [vmem:[%s2581_s27 + $0x38] sm:$0xff]  ;;  %v1717_v37 = vld [vmem:[%s2581_s27 + $0x50] sm:$0xff] }
 0x152   : > { %1162 = vmax.xlane.f32.xlu1 %v2509_v35  ;;  %1181 = vmin.xlane.f32.xlu0 %v2513_v38  ;;  %2856 = vst [vmem:[#allocation10_spill] sm:$0xff] %v2555_v8 }
 0x153   : > { %v1005_v30 = vpop.f32.mrb[22].mxu0  ;;  %v1085_v19 = vpop.f32.mrb[22].mxu1 }
 0x154   : > { %v2521_v33 = vmul.f32 %v2447_v42, %v1005_v30  ;;  %v1007_v46 = vpop.f32.mrb[23].mxu0  ;;  %v1087_v49 = vpop.f32.mrb[23].mxu1  ;;  %v2560_v10 = vmul.f32 %v2447_v42, %v1085_v19 }
 0x156   : > { %1381 = vmax.xlane.f32.xlu1 %v2516_v41  ;;  %2857 = vst [vmem:[#allocation11_spill] sm:$0xff] %v2560_v10 }
 0x157   : > { %v1010_v25 = vpop.f32.mrb[24].mxu0  ;;  %v1090_v47 = vpop.f32.mrb[24].mxu1 }
 0x158   : > { %v2528_v53 = vmul.f32 %v2447_v42, %v1010_v25  ;;  %v1012_v54 = vpop.f32.mrb[25].mxu0  ;;  %v2531_v44 = vmul.f32 %v2447_v42, %v1090_v47  ;;  %v1092_v55 = vpop.f32.mrb[25].mxu1  ;;  %v1301_v25 = vld [vmem:[%s2581_s27 + $0x18] sm:$0xff] }
 0x15a   : > { %2851 = vst [vmem:[#allocation5_spill] sm:$0xff] %v2531_v44  ;;  %1396 = vmin.xlane.f32.xlu1 %v2525_v50  ;;  %1185 = vmin.xlane.f32.xlu0 %v2528_v53 }
 0x15b   : > { %v1015_v3 = vpop.f32.mrb[26].mxu0  ;;  %v1095_v56 = vpop.f32.mrb[26].mxu1 }
 0x15c   : > { %v2539_v57 = vmul.f32 %v2447_v42, %v1015_v3  ;;  %v1017_v58 = vpop.f32.mrb[27].mxu0  ;;  %v2542_v60 = vmul.f32 %v2447_v42, %v1095_v56  ;;  %v1097_v61 = vpop.f32.mrb[27].mxu1  ;;  %v1718_v3 = vld [vmem:[%s2581_s27 + $0x58] sm:$0xff] }
 0x15d   : > { %v1719_v61 = vld [vmem:[%s2581_s27 + $0x60] sm:$0xff] }
 0x15e   : > { %2852 = vst [vmem:[#allocation6_spill] sm:$0xff] %v2542_v60  ;;  %1179 = vmin.xlane.f32.xlu1 %v2534_v45 }
 0x15f   : > { %v1020_v26 = vpop.f32.mrb[28].mxu0  ;;  %v1100_v1 = vpop.f32.mrb[28].mxu1 }
 0x160   : > { %v2549_v2 = vmul.f32 %v2447_v42, %v1020_v26  ;;  %v2552_v4 = vmul.f32 %v2447_v42, %v1100_v1  ;;  %v1022_v5 = vpop.f32.mrb[29].mxu0  ;;  %v1102_v7 = vpop.f32.mrb[29].mxu1 }
 0x161   : > { %v1720_v7 = vld [vmem:[%s2581_s27 + $0x68] sm:$0xff] }
 0x162   : > { %2854 = vst [vmem:[#allocation8_spill] sm:$0xff] %v2549_v2  ;;  %2855 = vst [vmem:[#allocation9_spill] sm:$0xff] %v2552_v4  ;;  %1398 = vmin.xlane.f32.xlu1 %v2545_v63  ;;  %1189 = vmin.xlane.f32.xlu0 %v2549_v2 }
 0x163   : > { %v1025_v11 = vpop.f32.mrb[30].mxu0  ;;  %v1105_v13 = vpop.f32.mrb[30].mxu1 }
 0x164   : > { %v2563_v14 = vmul.f32 %v2447_v42, %v1025_v11  ;;  %v1027_v15 = vpop.f32.mrb[31].mxu0  ;;  %v2566_v16 = vmul.f32 %v2447_v42, %v1105_v13  ;;  %v1107_v18 = vpop.f32.mrb[31].mxu1  ;;  %v1298_v42 = vld [vmem:[%s2581_s27] sm:$0xff] }
 0x166   : > { %2858 = vst [vmem:[#allocation12_spill] sm:$0xff] %v2563_v14  ;;  %2859 = vst [vmem:[#allocation13_spill] sm:$0xff] %v2566_v16  ;;  %1400 = vmin.xlane.f32.xlu1 %v2555_v8  ;;  %1402 = vmin.xlane.f32.xlu0 %v2560_v10  ;;  %v1957_v8 = vld [vmem:[%s2622_s11 + $0x20] sm:$0xff]  }
 0x16a   : > { %1183 = vmin.xlane.f32.xlu1 %v2521_v33 }
 0x16e   : > { %1187 = vmin.xlane.f32.xlu1 %v2539_v57 }
 0x172   : > { %1404 = vmin.xlane.f32.xlu1 %v2531_v44 }
 0x176   : > { %1406 = vmin.xlane.f32.xlu1 %v2542_v60 }
 0x17c   : > { %1308 = vperm.xlu0 %2055, %v1298_v42   ;;  %v1721_v42 = vld [vmem:[%s2581_s27 + $0x70] sm:$0xff] }
 0x180   : > { %1530 = vperm.xlu0 %2055, %v1715_v20  }
 0x184   : > { %1328 = vperm.xlu0 %2055, %v1302_v22  }
 0x187   : > { %1313 = vperm.xlu1 %2056, %v1299_v23  }
 0x188   : > { %1333 = vperm.xlu0 %2055, %v1303_v27  }
 0x18b   : > { %1535 = vperm.xlu1 %2056, %v1716_v28  }
 0x18c   : > { %1338 = vperm.xlu0 %2055, %v1304_v31   ;;  %v1722_v31 = vld [vmem:[%s2581_s27 + $0x78] sm:$0xff] }
 0x18f   : > { %1318 = vperm.xlu1 %2056, %v1300_v34  }
 0x190   : > { %1343 = vperm.xlu0 %2055, %v1305_v36  }
 0x193   : > { %1540 = vperm.xlu1 %2056, %v1717_v37  }
 0x1b7   : > { %v1368_v39 = vpop.xlane.xlu1 %1367  ;;  %1408 = vmin.xlane.f32.xlu1 %v2552_v4  ;;  %v1149_v47 = vpop.xlane.xlu0 %1148  ;;  %v1958_v4 = vld [vmem:[%s2622_s11 + $0x28] sm:$0xff]  }
 0x1bb   : > { %v1370_v40 = vpop.xlane.xlu1 %1369  ;;  %1191 = vmin.xlane.f32.xlu1 %v2563_v14  ;;  %v1151_v58 = vpop.xlane.xlu0 %1150 }
 0x1bf   : > { %v1153_v30 = vpop.xlane.xlu1 %1152  ;;  %1410 = vmin.xlane.f32.xlu1 %v2566_v16 }
 0x1c3   : > { %v1372_v19 = vpop.xlane.xlu1 %1371 }
 0x1c7   : > { %v1155_v46 = vpop.xlane.xlu1 %1154  ;;  %v1157_v5 = vpop.xlane.xlu0 %1156 }
 0x1c8   : > { %v1164_v23 = vmax.f32 %v1149_v47, %v1157_v5 }
 0x1cb   : > { %v1374_v49 = vpop.xlane.xlu1 %1373 }
 0x1cf   : > { %v1376_v54 = vpop.xlane.xlu1 %1375  ;;  %v1161_v18 = vpop.xlane.xlu0 %1160 }
 0x1d0   : > { %v1383_v55 = vmax.f32 %v1368_v39, %v1376_v54  ;;  %1323 = vperm.xlu1 %2056, %v1301_v25   ;;  %v1166_v27 = vmax.f32 %v1153_v30, %v1161_v18 }
 0x1d3   : > { %v1159_v56 = vpop.xlane.xlu1 %1158 }
 0x1d4   : > { %1545 = vperm.xlu1 %2056, %v1718_v3   ;;  %v1165_v20 = vmax.f32 %v1151_v58, %v1159_v56 }
 0x1d6   : > { %v1168_v34 = vmax.f32 %v1164_v23, %v1165_v20 }
 0x1d7   : > { %v1378_v26 = vpop.xlane.xlu1 %1377 }
 0x1d8   : > { %v1384_v1 = vmax.f32 %v1370_v40, %v1378_v26  ;;  %1550 = vperm.xlu1 %2056, %v1719_v61  }
 0x1da   : > { %v1387_v11 = vmax.f32 %v1383_v55, %v1384_v1 }
 0x1db   : > { %v1380_v13 = vpop.xlane.xlu1 %1379 }
 0x1dc   : > { %v1385_v15 = vmax.f32 %v1372_v19, %v1380_v13  ;;  %1555 = vperm.xlu1 %2056, %v1720_v7  }
 0x1df   : > { %v1163_v22 = vpop.xlane.xlu1 %1162 }
 0x1e0   : > { %v1167_v28 = vmax.f32 %v1155_v46, %v1163_v22  ;;  %1560 = vperm.xlu1 %2056, %v1721_v42  }
 0x1e2   : > { %v1169_v36 = vmax.f32 %v1166_v27, %v1167_v28  ;;  %v1951_v27 = vld [vmem:[%s2622_s11 + $0x8] sm:$0xff]  }
 0x1e3   : > { %v1382_v37 = vpop.xlane.xlu1 %1381 }
 0x1e4   : > { %v1170_v39 = vmax.f32 %v1168_v34, %v1169_v36  ;;  %v1386_v40 = vmax.f32 %v1374_v49, %v1382_v37  ;;  %1565 = vperm.xlu1 %2056, %v1722_v31   ;;  %v1178_v49 = vpop.xlane.xlu0 %1177  ;;  %v1858_v31 = vld [vmem:[%s2622_s11] sm:$0xff]   ;;  %v1863_v37 = vunpack.c.l.bf16 %v1951_v27 }
 0x1e6   : > { %v1388_v25 = vmax.f32 %v1385_v15, %v1386_v40  ;;  %v1171_v1 = vrot.slane %v1170_v39, 4 }
 0x1e7   : > { %v2602_v55 = vpop.xlane.xlu1 %1396 }
 0x1e8   : > { %v1389_v54 = vmax.f32 %v1387_v11, %v1388_v25  ;;  %v1172_v11 = vmax.f32 %v1170_v39, %v1171_v1  ;;  %v1182_v13 = vpop.xlane.xlu0 %1181  ;;  %v1864_v39 = vunpack.c.h.bf16 %v1951_v27  ;;  %v1859_v1 = vunpack.c.l.bf16 %v1858_v31 }
 0x1ea   : > { %v1390_v5 = vrot.slane %v1389_v54, 4  ;;  %v1173_v18 = vrot.slane %v1172_v11, 2  ;;  %v2630_v60 = vmax.f32 %v1864_v39, 0.0 }
 0x1eb   : > { %v1180_v19 = vpop.xlane.xlu1 %1179 }
 0x1ec   : > { %v1391_v15 = vmax.f32 %v1389_v54, %v1390_v5  ;;  %v1186_v22 = vpop.xlane.xlu0 %1185  ;;  %v1174_v23 = vmax.f32 %v1172_v11, %v1173_v18  ;;  %v2628_v18 = vmax.f32 %v1863_v37, 0.0 }
 0x1ed   : > { %v1193_v5 = vmin.f32 %v1178_v49, %v1186_v22  ;;  %v1895_v49 = vunpack.c.l.bf16 %v1958_v4 }
 0x1ee   : > { %v1392_v20 = vrot.slane %v1391_v15, 2  ;;  %v1175_v40 = vrot.slane %v1174_v23, 1 }
 0x1ef   : > { %v2604_v3 = vpop.xlane.xlu1 %1398 }
 0x1f0   : > { %v1393_v34 = vmax.f32 %v1391_v15, %v1392_v20  ;;  %v1190_v36 = vpop.xlane.xlu0 %1189  ;;  %v1860_v15 = vunpack.c.h.bf16 %v1858_v31  ;;  %v1176_v20 = vmax.f32 %v1174_v23, %v1175_v40 }
 0x1f2   : > { %v1394_v11 = vrot.slane %v1393_v34, 1  ;;  %v1206_v39 = vadd.f32 1e-15, %v1176_v20 }
 0x1f3   : > { %v2606_v56 = vpop.xlane.xlu1 %1400 }
 0x1f4   : > { %2059 = vrcp.f32 %v1206_v39 }
 0x1f7   : > { %v1184_v30 = vpop.xlane.xlu1 %1183 }
 0x1fb   : > { %v1188_v46 = vpop.xlane.xlu1 %1187 }
 0x1fc   : > { %v1194_v25 = vmin.f32 %v1180_v19, %v1188_v46  ;;  %v1959_v46 = vld [vmem:[%s2622_s11 + $0x30] sm:$0xff]  }
 0x1ff   : > { %v1405_v47 = vpop.xlane.xlu1 %1404 }
 0x203   : > { %v1407_v58 = vpop.xlane.xlu1 %1406 }
 0x204   : > { %v1413_v27 = vmin.f32 %v2604_v3, %v1407_v58  ;;  %v1395_v3 = vmax.f32 %v1393_v34, %v1394_v11  ;;  %v1899_v58 = vunpack.c.l.bf16 %v1959_v46  ;;  %v1954_v11 = vld [vmem:[%s2646_s14 + $0x8] sm:$0xff]  }
 0x207   : > { %v2608_v61 = vpop.permute.xlu1 %1313 }
 0x208   : > { %2860 = vst [vmem:[#allocation14_spill] sm:$0xff] %v2608_v61  ;;  %v1403_v61 = vpop.xlane.xlu0 %1402 }
 0x20b   : > { %v2610_v26 = vpop.permute.xlu1 %1535 }
 0x20c   : > { %2861 = vst [vmem:[#allocation15_spill] sm:$0xff] %v2610_v26  ;;  %v1952_v26 = vld [vmem:[%s2622_s11 + $0x10] sm:$0xff]  }
 0x20d   : > { %v1867_v22 = vunpack.c.l.bf16 %v1952_v26 }
 0x20f   : > { %v2612_v7 = vpop.permute.xlu1 %1318 }
 0x210   : > { %2862 = vst [vmem:[#allocation16_spill] sm:$0xff] %v2612_v7  ;;  %v1197_v7 = vmin.f32 %v1193_v5, %v1194_v25  ;;  %v1425_v5 = vadd.f32 1e-15, %v1395_v3  ;;  %v1874_v3 = vld [vmem:[%s2646_s14] sm:$0xff]  }
 0x212   : > { %2061 = vrcp.f32 %v1425_v5  ;;  %v1876_v5 = vunpack.c.h.bf16 %v1874_v3 }
 0x213   : > { %v2615_v42 = vpop.permute.xlu1 %1540 }
 0x214   : > { %2863 = vst [vmem:[#allocation17_spill] sm:$0xff] %v2615_v42  ;;  %v1195_v42 = vmin.f32 %v1182_v13, %v1190_v36  ;;  %v2635_v13 = vmax.f32 %v1859_v1, 0.0  ;;  %v1412_v36 = vmin.f32 %v2602_v55, %v1405_v47  ;;  %v1960_v55 = vld [vmem:[%s2622_s11 + $0x38] sm:$0xff]   ;;  %v2650_v47 = vmax.f32 %v1895_v49, 0.0 }
 0x215   : > { %v1868_v1 = vunpack.c.h.bf16 %v1952_v26 }
 0x216   : > { %v1416_v40 = vmin.f32 %v1412_v36, %v1413_v27  ;;  %v2657_v36 = vmax.f32 %v1899_v58, 0.0 }
 0x217   : > { %v2667_v39 = vmax.f32 %v1868_v1, 0.0 }
 0x244   : > { %v1409_v28 = vpop.xlane.xlu1 %1408 }
 0x245   : > { %v1414_v23 = vmin.f32 %v2606_v56, %v1409_v28  ;;  %v1953_v56 = vld [vmem:[%s2622_s11 + $0x18] sm:$0xff]  }
 0x246   : > { %v1871_v20 = vunpack.c.l.bf16 %v1953_v56  ;;  %v1872_v27 = vunpack.c.h.bf16 %v1953_v56  ;;  %v1961_v56 = vld [vmem:[%s2646_s14 + $0x20] sm:$0xff]  }
 0x247   : > { %v1907_v44 = vunpack.c.l.bf16 %v1961_v56  ;;  %v1908_v10 = vunpack.c.h.bf16 %v1961_v56 }
 0x248   : > { %v1192_v54 = vpop.xlane.xlu1 %1191  ;;  %v2670_v58 = vmax.f32 %v1871_v20, 0.0 }
 0x249   : > { %v1196_v16 = vmin.f32 %v1184_v30, %v1192_v54  ;;  %v1896_v30 = vunpack.c.h.bf16 %v1958_v4  ;;  %v2654_v54 = vmax.f32 %v1867_v22, 0.0  ;;  %v2698_v56 = vmax.f32 %v1907_v44, 0.0 }
 0x24b   : > { %v1198_v19 = vmin.f32 %v1195_v42, %v1196_v16  ;;  %v2639_v16 = vmax.f32 %v1860_v15, 0.0  ;;  %v1891_v42 = vunpack.c.l.bf16 %v1957_v8  ;;  %v1903_v15 = vunpack.c.l.bf16 %v1960_v55 }
 0x24c   : > { %v1411_v63 = vpop.xlane.xlu1 %1410 }
 0x24d   : > { %v1199_v31 = vmin.f32 %v1197_v7, %v1198_v19  ;;  %v1415_v37 = vmin.f32 %v1403_v61, %v1411_v63  ;;  %v2652_v63 = vmax.f32 %v1896_v30, 0.0  ;;  %v1892_v61 = vunpack.c.h.bf16 %v1957_v8 }
 0x24e   : > { %v1900_v7 = vunpack.c.h.bf16 %v1959_v46  ;;  %v1904_v30 = vunpack.c.h.bf16 %v1960_v55  ;;  %v2659_v8 = vmax.f32 %v1891_v42, 0.0  ;;  %v2672_v42 = vmax.f32 %v1872_v27, 0.0 }
 0x24f   : > { %v1200_v25 = vrot.slane %v1199_v31, 4  ;;  %v1417_v4 = vmin.f32 %v1414_v23, %v1415_v37  ;;  %v2661_v46 = vmax.f32 %v1892_v61, 0.0  ;;  %v1962_v37 = vld [vmem:[%s2646_s14 + $0x28] sm:$0xff]   ;;  %v1955_v61 = vld [vmem:[%s2646_s14 + $0x10] sm:$0xff]  }
 0x250   : > { %v2663_v26 = vmax.f32 %v1900_v7, 0.0  ;;  %2864 = vst [vmem:[#allocation18_spill] sm:$0xff] %v2672_v42  ;;  %v2676_v7 = vmax.f32 %v1903_v15, 0.0  ;;  %v1912_v1 = vunpack.c.h.bf16 %v1962_v37  ;;  %v1883_v14 = vunpack.c.l.bf16 %v1955_v61  ;;  %v1956_v42 = vld [vmem:[%s2646_s14 + $0x18] sm:$0xff]   ;;  %v2709_v44 = vpop.permute.xlu1 %1323 }
 0x251   : > { %v1201_v28 = vmin.f32 %v1199_v31, %v1200_v25  ;;  %v1418_v34 = vmin.f32 %v1416_v40, %v1417_v4  ;;  %v1879_v31 = vunpack.c.l.bf16 %v1954_v11  ;;  %v1880_v40 = vunpack.c.h.bf16 %v1954_v11  ;;  %v1963_v25 = vld [vmem:[%s2646_s14 + $0x30] sm:$0xff]  }
 0x252   : > { %2865 = vst [vmem:[#allocation19_spill] sm:$0xff] %v2676_v7  ;;  %v1915_v27 = vunpack.c.l.bf16 %v1963_v25  ;;  %v1884_v2 = vunpack.c.h.bf16 %v1955_v61 }
 0x253   : > { %v1202_v19 = vrot.slane %v1201_v28, 2  ;;  %v1419_v49 = vrot.slane %v1418_v34, 4  ;;  %v2680_v20 = vmax.f32 %v1879_v31, 0.0  ;;  %v2682_v50 = vmax.f32 %v1880_v40, 0.0  ;;  %v2694_v31 = vpop.permute.xlu0 %1308 }
 0x255   : > { %v1203_v22 = vmin.f32 %v1201_v28, %v1202_v19  ;;  %v1420_v23 = vmin.f32 %v1418_v34, %v1419_v49  ;;  %v2678_v28 = vmax.f32 %v1904_v30, 0.0  ;;  %v1911_v34 = vunpack.c.l.bf16 %v1962_v37 }
 0x256   : > { %v1875_v19 = vunpack.c.l.bf16 %v1874_v3  ;;  %v1916_v30 = vunpack.c.h.bf16 %v1963_v25  ;;  %v2688_v37 = vmax.f32 %v1912_v1, 0.0  ;;  %v2060_v3 = vpop.eup %2059  ;;  %v2700_v25 = vmax.f32 %v1908_v10, 0.0 }
 0x257   : > { %v1204_v4 = vrot.slane %v1203_v22, 1  ;;  %v1421_v55 = vrot.slane %v1420_v23, 2  ;;  %2866 = vst [vmem:[#allocation20_spill] sm:$0xff] %v2678_v28  ;;  %v1964_v28 = vld [vmem:[%s2646_s14 + $0x38] sm:$0xff]   ;;  %v2686_v41 = vmax.f32 %v1911_v34, 0.0  ;;  %v1888_v34 = vunpack.c.h.bf16 %v1956_v42 }
 0x258   : > { %2868 = vst [vmem:[#allocation22_spill] sm:$0xff] %v2688_v37  ;;  %v1919_v61 = vunpack.c.l.bf16 %v1964_v28  ;;  %v1211_v37 = vmul.f32 %v2060_v3, %v2473_v59  ;;  %v1210_v10 = vmul.f32 %v2060_v3, %v2466_v29  ;;  %v1213_v59 = vmul.f32 %v2060_v3, %v2492_v12 }
 0x259   : > { %v1205_v11 = vmin.f32 %v1203_v22, %v1204_v4  ;;  %v1422_v49 = vmin.f32 %v1420_v23, %v1421_v55  ;;  %2867 = vst [vmem:[#allocation21_spill] sm:$0xff] %v2686_v41  ;;  %v2690_v22 = vmax.f32 %v1875_v19, 0.0  ;;  %v2692_v23 = vmax.f32 %v1876_v5, 0.0  ;;  %v2062_v41 = vpop.eup %2061 }
 0x25a   : > { %v2696_v4 = vmax.f32 %v1915_v27, 0.0  ;;  %v1887_v55 = vunpack.c.l.bf16 %v1956_v42  ;;  %v1270_v19 = vmax.f32 %v1883_v14, 0.0  ;;  %v2704_v5 = vmax.f32 %v1884_v2, 0.0  ;;  %v2715_v14 = vpop.permute.xlu0 %1530 }
 0x25b   : > { %v1216_v15 = vadd.f32 1e-15, %v1205_v11  ;;  %v1423_v7 = vrot.slane %v1422_v49, 1  ;;  %v2702_v11 = vmax.f32 %v1916_v30, 0.0  ;;  %v1920_v27 = vunpack.c.h.bf16 %v1964_v28 }
 0x25c   : > { %v1212_v42 = vmul.f32 %v2060_v3, %v2477_v62  ;;  %v2717_v2 = vmax.f32 %v1919_v61, 0.0  ;;  %v2721_v30 = vmax.f32 %v1888_v34, 0.0  ;;  %v1431_v28 = vmul.f32 %v2062_v41, %v2485_v6 }
 0x25d   : > { %2063 = vrcp.f32 %v1216_v15  ;;  %v1424_v40 = vmin.f32 %v1422_v49, %v1423_v7  ;;  %v1208_v7 = vmul.f32 %v2060_v3, %v2450_v43  ;;  %v1209_v49 = vmul.f32 %v2060_v3, %v2458_v51 }
 0x25e   : > { %v2713_v15 = vmax.f32 %v1887_v55, 0.0  ;;  %v1214_v43 = vmul.f32 %v2060_v3, %v2489_v9  ;;  %v1430_v51 = vmul.f32 %v2062_v41, %v2480_v0  ;;  %v1427_v29 = vmul.f32 %v2062_v41, %v2453_v48 }
 0x25f   : > { %v1435_v1 = vadd.f32 1e-15, %v1424_v40  ;;  %v1428_v62 = vmul.f32 %v2062_v41, %v2461_v52  ;;  %v2728_v40 = vmul.f32 %v2630_v60, %v1211_v37  ;;  %v1274_v55 = vmul.f32 %v2635_v13, %v1208_v7 }
 0x260   : > { %v1275_v61 = vmul.f32 %v2639_v16, %v1209_v49  ;;  %v2732_v12 = vmax.f32 %v1920_v27, 0.0  ;;  %v1276_v9 = vmul.f32 %v2628_v18, %v1210_v10  ;;  %v1429_v34 = vmul.f32 %v2062_v41, %v2469_v32  ;;  %v2753_v32 = vpop.permute.xlu1 %1545 }
 0x261   : > { %2065 = vrcp.f32 %v1435_v1  ;;  %v1432_v0 = vmul.f32 %v2062_v41, %v2497_v17  ;;  %v2738_v6 = vmul.f32 %v2654_v54, %v1212_v42  ;;  %v2741_v48 = vmul.f32 %v2062_v41, %v2504_v24 }
 0x262   : > { %v2744_v52 = vmul.f32 %v2667_v39, %v1213_v59  ;;  %v2747_v60 = vmul.f32 %v2670_v58, %v1214_v43  ;;  %v1215_v13 = vmul.f32 %v2060_v3, %v2509_v35  ;;  %v2751_v18 = vmul.f32 %v2652_v63, %v1430_v51  ;;  %v1329_v3 = vpop.permute.xlu0 %1328 }
 0x263   : > { %v2756_v17 = vmul.f32 %v2657_v36, %v1431_v28  ;;  %v1495_v24 = vmul.f32 %v2659_v8, %v1427_v29  ;;  %v1496_v54 = vmul.f32 %v2661_v46, %v1428_v62  ;;  %v1497_v63 = vmul.f32 %v2650_v47, %v1429_v34  ;;  %v2870_v47 = vld [vmem:[#allocation8_spill] sm:$0xff] }
 0x264   : > { %v2766_v1 = vmul.f32 %v2663_v26, %v1432_v0  ;;  %v2871_v26 = vld [vmem:[#allocation18_spill] sm:$0xff]  ;;  %v2875_v29 = vld [vmem:[#allocation4_spill] sm:$0xff] }
 0x265   : > { %v2779_v10 = vmul.f32 %v2871_v26, %v1215_v13 }
 0x267   : > { %v2064_v16 = vpop.eup %2063 }
 0x268   : > { %v1221_v39 = vmul.f32 %v2064_v16, %v2521_v33  ;;  %v1218_v58 = vmul.f32 %v2064_v16, %v2501_v21  ;;  %v1219_v37 = vmul.f32 %v2064_v16, %v2534_v45  ;;  %v1220_v35 = vmul.f32 %v2064_v16, %v2513_v38  ;;  %v2869_v38 = vld [vmem:[#allocation3_spill] sm:$0xff] }
 0x269   : > { %v1222_v36 = vmul.f32 %v2064_v16, %v2528_v53  ;;  %v1223_v8 = vmul.f32 %v2064_v16, %v2539_v57  ;;  %v2775_v49 = vmul.f32 %v2062_v41, %v2869_v38  ;;  %v1224_v27 = vmul.f32 %v2064_v16, %v2870_v47  ;;  %v2872_v53 = vld [vmem:[#allocation12_spill] sm:$0xff]  ;;  %v2873_v57 = vld [vmem:[#allocation11_spill] sm:$0xff]  ;;  %v2882_v47 = vld [vmem:[#allocation21_spill] sm:$0xff] }
 0x26a   : > { %v1285_v46 = vmul.f32 %v2682_v50, %v1221_v39  ;;  %v1282_v33 = vmul.f32 %v2690_v22, %v1218_v58  ;;  %v1283_v21 = vmul.f32 %v2692_v23, %v1219_v37  ;;  %v1284_v45 = vmul.f32 %v2680_v20, %v1220_v35  ;;  %v2874_v23 = vld [vmem:[#allocation5_spill] sm:$0xff]  ;;  %v1551_v20 = vpop.permute.xlu1 %1550  ;;  %v2876_v41 = vld [vmem:[#allocation7_spill] sm:$0xff]  ;;  %v2877_v39 = vld [vmem:[#allocation14_spill] sm:$0xff] }
 0x26b   : > { %v2066_v7 = vpop.eup %2065  ;;  %v1225_v42 = vmul.f32 %v2064_v16, %v2872_v53  ;;  %v1286_v22 = vmul.f32 %v1270_v19, %v1222_v36  ;;  %v1334_v16 = vpop.permute.xlu0 %1333  ;;  %v1287_v37 = vmul.f32 %v2704_v5, %v1223_v8  ;;  %v2879_v19 = vld [vmem:[#allocation10_spill] sm:$0xff]  ;;  %v1288_v36 = vmul.f32 %v2713_v15, %v1224_v27 }
 0x26c   : > { %v1440_v59 = vmul.f32 %v2066_v7, %v2873_v57  ;;  %v1290_v50 = vsub.f32 %v1274_v55, %v1282_v33  ;;  %v1291_v43 = vsub.f32 %v1275_v61, %v1283_v21  ;;  %v1292_v51 = vsub.f32 %v1276_v9, %v1284_v45  ;;  %v2878_v55 = vld [vmem:[#allocation22_spill] sm:$0xff]  ;;  %v2880_v33 = vld [vmem:[#allocation16_spill] sm:$0xff] }
 0x26d   : > { %v1441_v28 = vmul.f32 %v2066_v7, %v2874_v23  ;;  %v1437_v62 = vmul.f32 %v2066_v7, %v2875_v29  ;;  %v1438_v34 = vmul.f32 %v2066_v7, %v2876_v41  ;;  %v1293_v0 = vsub.f32 %v2728_v40, %v1285_v46  ;;  %v2881_v46 = vld [vmem:[#allocation6_spill] sm:$0xff] }
 0x26e   : > { %v1346_v13 = vmul.f32 %v2694_v31, %v1290_v50  ;;  %v1347_v58 = vmul.f32 %v2877_v39, %v1291_v43  ;;  %v1506_v61 = vmul.f32 %v2878_v55, %v1440_v59  ;;  %v1439_v9 = vmul.f32 %v2066_v7, %v2879_v19  ;;  %v1556_v43 = vpop.permute.xlu1 %1555 }
 0x26f   : > { %v1503_v35 = vmul.f32 %v2698_v56, %v1437_v62  ;;  %v1348_v21 = vmul.f32 %v2880_v33, %v1292_v51  ;;  %v1504_v40 = vmul.f32 %v2700_v25, %v1438_v34  ;;  %v1442_v31 = vmul.f32 %v2066_v7, %v2881_v46 }
 0x270   : > { %v1354_v45 = vadd.f32 %v1347_v58, %v1346_v13  ;;  %v1507_v38 = vmul.f32 %v2696_v4, %v1441_v28  ;;  %v1505_v26 = vmul.f32 %v2882_v47, %v1439_v9  ;;  %v1294_v8 = vsub.f32 %v2738_v6, %v1286_v22  ;;  %v2883_v4 = vld [vmem:[#allocation15_spill] sm:$0xff]  ;;  %v2884_v28 = vld [vmem:[#allocation9_spill] sm:$0xff]  ;;  %v1339_v22 = vpop.permute.xlu0 %1338 }
 0x271   : > { %v1511_v5 = vsub.f32 %v1495_v24, %v1503_v35  ;;  %v1349_v53 = vmul.f32 %v2709_v44, %v1293_v0  ;;  %v1512_v56 = vsub.f32 %v1496_v54, %v1504_v40  ;;  %v1289_v15 = vmul.f32 %v2721_v30, %v1225_v42  ;;  %v2885_v30 = vld [vmem:[#allocation13_spill] sm:$0xff] }
 0x272   : > { %v1355_v57 = vadd.f32 %v1354_v45, %v1348_v21  ;;  %v1514_v27 = vsub.f32 %v2751_v18, %v1506_v61  ;;  %v1513_v59 = vsub.f32 %v1497_v63, %v1505_v26  ;;  %v1508_v50 = vmul.f32 %v2702_v11, %v1442_v31  ;;  %v2886_v63 = vld [vmem:[#allocation17_spill] sm:$0xff] }
 0x273   : > { %v1568_v25 = vmul.f32 %v2715_v14, %v1511_v5  ;;  %v1569_v51 = vmul.f32 %v2883_v4, %v1512_v56  ;;  %v1350_v23 = vmul.f32 %v1329_v3, %v1294_v8  ;;  %v1443_v6 = vmul.f32 %v2066_v7, %v2884_v28  ;;  %v2887_v3 = vld [vmem:[#allocation19_spill] sm:$0xff] }
 0x274   : > { %v1356_v24 = vadd.f32 %v1355_v57, %v1349_v53  ;;  %v1515_v44 = vsub.f32 %v2756_v17, %v1507_v38  ;;  %v1295_v54 = vsub.f32 %v2744_v52, %v1287_v37  ;;  %v1444_v42 = vmul.f32 %v2066_v7, %v2885_v30 }
 0x275   : > { %v1296_v18 = vsub.f32 %v2747_v60, %v1288_v36  ;;  %v1570_v14 = vmul.f32 %v2886_v63, %v1513_v59  ;;  %v1576_v29 = vadd.f32 %v1569_v51, %v1568_v25  ;;  %v1509_v62 = vmul.f32 %v2717_v2, %v1443_v6  ;;  %v1561_v60 = vpop.permute.xlu1 %1560  ;;  %v2888_v2 = vld [vmem:[#allocation20_spill] sm:$0xff] }
 0x276   : > { %v1357_v11 = vadd.f32 %v1356_v24, %v1350_v23  ;;  %v1501_v41 = vmul.f32 %v2887_v3, %v2741_v48  ;;  %v1351_v34 = vmul.f32 %v1334_v16, %v1295_v54  ;;  %v1297_v0 = vsub.f32 %v2779_v10, %v1289_v15  ;;  %v1344_v48 = vpop.permute.xlu0 %1343 }
 0x277   : > { %v1571_v17 = vmul.f32 %v2753_v32, %v1514_v27  ;;  %v1577_v13 = vadd.f32 %v1576_v29, %v1570_v14  ;;  %v1516_v52 = vsub.f32 %v2766_v1, %v1508_v50  ;;  %v1510_v7 = vmul.f32 %v2732_v12, %v1444_v42 }
 0x278   : > { %v1358_v39 = vadd.f32 %v1357_v11, %v1351_v34  ;;  %v1352_v58 = vmul.f32 %v1339_v22, %v1296_v18  ;;  %v1572_v37 = vmul.f32 %v1551_v20, %v1515_v44  ;;  %v1517_v61 = vsub.f32 %v1501_v41, %v1509_v62 }
 0x279   : > { %v1578_v55 = vadd.f32 %v1577_v13, %v1571_v17  ;;  %v1502_v19 = vmul.f32 %v2888_v2, %v2775_v49  ;;  %v1353_v9 = vmul.f32 %v1344_v48, %v1297_v0  ;;  %v1573_v35 = vmul.f32 %v1556_v43, %v1516_v52  ;;  %v1566_v12 = vpop.permute.xlu1 %1565 }
 0x27a   : > { %v1359_v16 = vadd.f32 %v1358_v39, %v1352_v58  ;;  %v1574_v33 = vmul.f32 %v1561_v60, %v1517_v61 }
 0x27b   : > { %v1579_v10 = vadd.f32 %v1578_v55, %v1572_v37  ;;  %v1518_v32 = vsub.f32 %v1502_v19, %v1510_v7 }
 0x27c   : > { %v1360_v36 = vadd.f32 %v1359_v16, %v1353_v9 }
 0x27d   : > { %v1580_v1 = vadd.f32 %v1579_v10, %v1573_v35  ;;  %v1575_v40 = vmul.f32 %v1566_v12, %v1518_v32 }
 0x27e   : > { %v1361_v21 = vrot.slane %v1360_v36, 4 }
 0x27f   : > { %v1581_v45 = vadd.f32 %v1580_v1, %v1574_v33 }
 0x280   : > { %v1362_v20 = vadd.f32 %v1361_v21, %v1360_v36 }
 0x281   : > { %v1582_v46 = vadd.f32 %v1581_v45, %v1575_v40 }
 0x282   : > { %v1363_v31 = vrot.slane %v1362_v20, 2 }
 0x283   : > { %v1583_v38 = vrot.slane %v1582_v46, 4 }
 0x284   : > { %v1364_v49 = vadd.f32 %v1363_v31, %v1362_v20 }
 0x285   : > { %v1584_v47 = vadd.f32 %v1583_v38, %v1582_v46 }
 0x286   : > { %v1365_v8 = vrot.slane %v1364_v49, 1 }
 0x287   : > { %v1585_v26 = vrot.slane %v1584_v47, 2 }
 0x288   : > { %v1366_v56 = vadd.f32 %v1365_v8, %v1364_v49 }
 0x289   : > { %v1586_v5 = vadd.f32 %v1585_v26, %v1584_v47 }
 0x28b   : > { %v1587_v53 = vrot.slane %v1586_v5, 1 }
 0x28d   : > { %v1588_v57 = vadd.f32 %v1587_v53, %v1586_v5 }
 0x28f   : > { %v1590_v15 = vsel %vm1589_vm0, %v1366_v56, %v1588_v57 }
 0x290   : > { %1591 = vst [vmem:[%s405_s18] sm:$0x3] %v1590_v15 }
 0x291 PF: > { %s19_s30 = sadd.s32 1, %s2073_s30  }
 0x292   : > { %p16_p5 = scmp.ge.s32.totalorder %s19_s30, 6  }
 0x294   :  { %18 = sbr.rel (!%p16_p5) target bundleno = 1 (0x1), region = 98 }

// kernel: scdori_forward.11
= control target key start
LH: loop header
LB: loop body
LE: loop exit
PB: predicated region body
PF: predicated region fallthrough
CT: control target
= control target key end

     0   :  { %v388_v0 = vmov 0.0|0.0   ;;  %vm389_vm0 = vmmov 0   ;;  %v390_v4 = vmov 0.0   ;;  %vm56_vm1 = vcmask 523264   ;;  %s531_s1 = inlined_call_operand.vmem [shape: f32[64,64], index: 1, kind: input, shape index: {}]   ;;  %s532_s5 = inlined_call_operand.vmem [shape: f32[64,128], index: 5, kind: input, shape index: {}]   ;;  %s533_s0 = inlined_call_operand.vmem [shape: f32[8,64], index: 0, kind: input, shape index: {}]   ;;  %s534_s2 = inlined_call_operand.vmem [shape: f32[1,64], index: 2, kind: input, shape index: {}]   ;;  %s535_s3 = inlined_call_operand.vmem [shape: f32[1,64], index: 3, kind: input, shape index: {}]   ;;  %s536_s4 = inlined_call_operand.vmem [shape: f32[1,64], index: 4, kind: input, shape index: {}]   ;;  %s537_s10 = inlined_call_operand.<no memory space> [shape: f32[1,1], index: 10, kind: input, shape index: {}]   ;;  %s538_s6 = inlined_call_operand.vmem [shape: f32[1,128], index: 6, kind: input, shape index: {}]   ;;  %s539_s7 = inlined_call_operand.vmem [shape: f32[1,128], index: 7, kind: input, shape index: {}]   ;;  %s540_s8 = inlined_call_operand.vmem [shape: f32[1,128], index: 8, kind: input, shape index: {}]   ;;  %s541_s9 = inlined_call_operand.vmem [shape: f32[1,128], index: 9, kind: input, shape index: {}]   ;;  %s542_s11 = inlined_call_operand.vmem [shape: f32[8,1], index: 11, kind: output, shape index: {}]  }
   0x1   :  { %357 = vmatprep.subr.bf16.mxu0 %v388_v0  ;;  %v41_v1 = vld [vmem:[%s531_s1] sm:$0xff]  ;;  %v42_v2 = vld [vmem:[%s531_s1 + $0x8] sm:$0xff]  ;;  %v43_v3 = vld [vmem:[%s531_s1 + $0x10] sm:$0xff]  ;;  %335 = vmatprep.mubr.msk.f32.mxu0 %vm389_vm0, %v390_v4  ;;  %v16_v36 = vstv %s537_s10  ;;  %vm285_vm3 = vcmask 7168  }
   0x2   :  { %v358_v5 = vpack.c.bf16 %v42_v2, %v41_v1  ;;  %v44_v6 = vld [vmem:[%s531_s1 + $0x18] sm:$0xff]  ;;  %369 = vmatprep.subr.bf16.mxu1 %v388_v0  ;;  %354 = vmatprep.mubr.msk.f32.mxu1 %vm389_vm0, %v390_v4  ;;  %v147_v8 = vld [vmem:[%s532_s5] sm:$0xff]  ;;  %v148_v9 = vld [vmem:[%s532_s5 + $0x8] sm:$0xff]  ;;  %17 = vst [vmem:[#allocation2] sm:$0x1] %v16_v36 }
   0x3   :  { %v361_v7 = vpack.c.bf16 %v44_v6, %v43_v3  ;;  %v149_v10 = vld [vmem:[%s532_s5 + $0x10] sm:$0xff]  ;;  %v45_v11 = vld [vmem:[%s531_s1 + $0x20] sm:$0xff]  ;;  %v46_v12 = vld [vmem:[%s531_s1 + $0x28] sm:$0xff]  ;;  %v370_v13 = vpack.c.bf16 %v148_v9, %v147_v8 }
   0x4   :  { %359 = vmatpush3.bf16.msra.mxu0 %v358_v5  ;;  %v150_v14 = vld [vmem:[%s532_s5 + $0x18] sm:$0xff]  ;;  %v364_v16 = vpack.c.bf16 %v46_v12, %v45_v11  ;;  %v47_v17 = vld [vmem:[%s531_s1 + $0x30] sm:$0xff]  ;;  %v40_v20 = vld [vmem:[%s533_s0] sm:$0xff] }
   0x5   :  { %360 = vmatprep.subr.bf16.mxu0 %v388_v0  ;;  %371 = vmatpush3.bf16.msra.mxu1 %v370_v13  ;;  %v373_v15 = vpack.c.bf16 %v150_v14, %v149_v10  ;;  %v48_v18 = vld [vmem:[%s531_s1 + $0x38] sm:$0xff]  ;;  %v151_v21 = vld [vmem:[%s532_s5 + $0x20] sm:$0xff]  ;;  %v152_v22 = vld [vmem:[%s532_s5 + $0x28] sm:$0xff] }
   0x6   :  { %372 = vmatprep.subr.bf16.mxu1 %v388_v0  ;;  %v367_v19 = vpack.c.bf16 %v48_v18, %v47_v17  ;;  %v376_v23 = vpack.c.bf16 %v152_v22, %v151_v21  ;;  %v153_v24 = vld [vmem:[%s532_s5 + $0x30] sm:$0xff]  ;;  %v154_v25 = vld [vmem:[%s532_s5 + $0x38] sm:$0xff]  ;;  %v291_v27 = vld [vmem:[%s534_s2] ss:$0 sm:$0xff] }
   0x7   :  { %v379_v26 = vpack.c.bf16 %v154_v25, %v153_v24  ;;  %v293_v29 = vld [vmem:[%s535_s3] ss:$0 sm:$0xff] }
   0x8   :  { %362 = vmatpush3.bf16.msra.mxu0 %v361_v7  ;;  %v294_v32 = vld [vmem:[%s536_s4] ss:$0 sm:$0xff] }
   0x9   :  { %363 = vmatprep.subr.bf16.mxu0 %v388_v0  ;;  %374 = vmatpush3.bf16.msra.mxu1 %v373_v15  ;;  %v295_v37 = vld [vmem:[%s538_s6] ss:$0 sm:$0xff] }
   0xa   :  { %375 = vmatprep.subr.bf16.mxu1 %v388_v0  ;;  %v297_v39 = vld [vmem:[%s539_s7] ss:$0 sm:$0xff] }
   0xb   :  { %v298_v42 = vld [vmem:[%s540_s8] ss:$0 sm:$0xff] }
   0xc   :  { %365 = vmatpush3.bf16.msra.mxu0 %v364_v16  ;;  %v299_v45 = vld [vmem:[%s541_s9] ss:$0 sm:$0xff] }
   0xd   :  { %366 = vmatprep.subr.bf16.mxu0 %v388_v0  ;;  %377 = vmatpush3.bf16.msra.mxu1 %v376_v23  ;;  %v300_v48 = vld [vmem:[#allocation2] ss:$0 sm:$0xff] }
   0xe   :  { %378 = vmatprep.subr.bf16.mxu1 %v388_v0 }
  0x10   :  { %368 = vmatpush3.bf16.msra.mxu0 %v367_v19 }
  0x11   :  { %380 = vmatpush3.bf16.msra.mxu1 %v379_v26 }
  0x13   :  { %336 = vmatmul.mubr.msk.f32.vlgmr.msra.gmra.mrb[0].mxu0 %vm56_vm1, %v40_v20 }
  0xe6   :  { %v126_v28 = vpop.f32.mrb[0].mxu0 }
  0xe7   :  { %v127_v30 = vadd.f32 %v291_v27, %v126_v28  ;;  %v337_v31 = vpop.f32.mrb[1].mxu0 }
  0xe9   :  { %v137_v33 = vmul.f32 %v293_v29, %v127_v30 }
  0xeb   :  { %v145_v34 = vadd.f32 %v294_v32, %v137_v33 }
  0xed   :  { %v146_v35 = vmax.f32 %v145_v34, 0.0 }
  0xef   :  { %355 = vmatmul.mubr.msk.f32.vlgmr.msra.gmra.mrb[0].mxu1 %vm56_vm1, %v146_v35 }
 0x1c2   :  { %v231_v38 = vpop.f32.mrb[0].mxu1 }
 0x1c3   :  { %v232_v40 = vadd.f32 %v295_v37, %v231_v38  ;;  %v356_v41 = vpop.f32.mrb[1].mxu1 }
 0x1c5   :  { %v242_v43 = vmul.f32 %v297_v39, %v232_v40 }
 0x1c7   :  { %v250_v44 = vadd.f32 %v298_v42, %v242_v43 }
 0x1c9   :  { %v251_v46 = vmax.f32 %v250_v44, 0.0 }
 0x1cb   :  { %v259_v47 = vmul.f32 %v299_v45, %v251_v46 }
 0x1cd   :  { %260 = vadd.xlane.f32.xlu0 %v259_v47 }
 0x25a   :  { %v261_v49 = vpop.xlane.xlu0 %260 }
 0x25b   :  { %v269_v50 = vadd.f32 %v300_v48, %v261_v49 }
 0x25d   :  { %v271_v51 = vand.u32 2147483647, %v269_v50  ;;  %v270_v62 = vmax.f32 %v269_v50, 0.0 }
 0x25f   :  { %v272_v52 = vsub.f32 0.0, %v271_v51 }
 0x261   :  { %v273_v53 = vmul.f32 1.442695, %v272_v52 }
 0x263   :  { %384 = vpow2.f32 %v273_v53 }
 0x26d   :  { %v385_v54 = vpop.eup %384 }
 0x26e   :  { %v275_v55 = vadd.f32 1.0, %v385_v54  ;;  %v278_v56 = vmul.f32 -0.5, %v385_v54  ;;  %v281_v58 = vand.u32 2147483647, %v385_v54 }
 0x270   :  { %386 = vlog2.f32 %v275_v55  ;;  %v279_v57 = vadd.f32 1.0, %v278_v56  ;;  %vm282_vm2 = vcmp.lt.f32.partialorder %v281_v58, 0.0004427343 }
 0x272   :  { %v280_v61 = vmul.f32 %v385_v54, %v279_v57 }
 0x27a   :  { %v387_v59 = vpop.eup %386 }
 0x27b   :  { %v277_v60 = vmul.f32 0.6931472, %v387_v59 }
 0x27d   :  { %v283_v63 = vsel %vm282_vm2, %v280_v61, %v277_v60 }
 0x27e   :  { %v284_v0 = vadd.f32 %v283_v63, %v270_v62 }
 0x280   :  { %286 = vst.msk [vmem:[%s542_s11] sm:$0xff] %vm285_vm3, %v284_v0 }

// kernel: scdori_forward.9
= control target key start
LH: loop header
LB: loop body
LE: loop exit
PB: predicated region body
PF: predicated region fallthrough
CT: control target
= control target key end

     0   :  { %s554_s0 = inlined_call_operand.vmem [shape: s32[8], index: 0, kind: input, shape index: {}]   ;;  %s555_s1 = inlined_call_operand.vmem [shape: f32[8,8,1], index: 1, kind: input, shape index: {}]   ;;  %s556_s2 = inlined_call_operand.vmem [shape: bf16[8,256], index: 2, kind: input, shape index: {}]   ;;  %s557_s3 = inlined_call_operand.vmem [shape: f32[8,1,256], index: 3, kind: input, shape index: {}]   ;;  %s558_s4 = inlined_call_operand.vmem [shape: f32[1,256], index: 4, kind: input, shape index: {}]   ;;  %s559_s5 = inlined_call_operand.vmem [shape: f32[1,256], index: 5, kind: input, shape index: {}]   ;;  %s560_s6 = inlined_call_operand.vmem [shape: f32[8,1,256], index: 6, kind: output, shape index: {}]  }
   0x1   :  { %s11_s23 = sshll.u32 %s554_s0, 4  ;;  %s12_s23 = int_to_ptr.vmem [resolvable:$true] %s11_s23 }
   0x2   :  { %s452_s24 = scalar_lea.vmem %s12_s23, 16  ;;  %p457_p1 = scmp.lt.s32.totalorder %s12_s23, %s12_s23 }
   0x3   :  { %p453_p0 = scmp.ne.s32.totalorder %s12_s23, %s452_s24  ;;  %p458_p2 = scmp.lt.s32.totalorder %s452_s24, %s452_s24 }
   0x5   :  { %p459_p3 = por %p458_p2, %p457_p1 }
   0x7   :  { %p460_p4 = pnand %p459_p3, %p453_p0 }
   0x9   :  { %463 = shalt.err (!%p460_p4)  }
   0xa   :  { %s474_s25 = smov [#allocation3]  }
   0xb   :  { %14 = dma.vmem_to_smem %s12_s23, 16, %s474_s25, [#allocation2] }
   0xc   :  { %468 = dma.done.wait [#allocation2], 16 }
   0xd   :  { %469 = vsyncadd [#allocation2], 4294967280 }
   0xe   :  { %16 = sfence }
   0xf   :  { %s515_s26 = smov 0  }
  0x10 LB: > { %s424_s0 = sadd.s32 4294967295, %s472_s26   ;;  %p428_p5 = scmp.ge.s32.totalorder %s472_s26, 1  ;;  %s472_s26 = sphi %s515_s26, %s22_s26  }
  0x11   : > { %p206_p6 = scmp.lt.s32.totalorder %s472_s26, 9 }
  0x13   : > { %p207_p7 = pnand %p428_p5, %p206_p6 }
  0x14   : > { %p237_p8 = scmp.lt.s32.totalorder (!%p207_p7), %s424_s0, 7  ;;  %v475_v0 = vmov (!%p207_p7), 0   ;;  %s241_s8 = sld [smem:[#allocation3 + %s424_s0]] (!%p207_p7)  ;;  %v252_v2 = vld [vmem:[%s556_s2] sm:$0xff] (!%p207_p7)  ;;  %v276_v5 = vlaneseq (!%p207_p7)  ;;  %vm316_vm0 = vcmask (!%p207_p7), 1040384  }
  0x15   : > { %210 = sbr.rel (%p207_p7) target bundleno = 507 (0x1fb), region = 40  ;;  %445 = vset.pattern.permute.xlu0 (!%p207_p7), %v475_v0  ;;  %v253_v3 = vunpack.c.l.bf16 (!%p207_p7), %v252_v2  ;;  %v254_v4 = vunpack.c.h.bf16 (!%p207_p7), %v252_v2  ;;  %v288_v21 = vld [vmem:[%s558_s4] sm:$0x3] (!%p207_p7)  ;;  %v476_v53 = vmov (!%p207_p7), 1966171168  }
  0x16   : > { %v277_v11 = vshrl.u32 (!%p207_p7), %v276_v5, 7  ;;  %v302_v26 = vld [vmem:[%s559_s5] sm:$0x3] (!%p207_p7)  ;;  %v340_v54 = vunpack.c.l.s4 (!%p207_p7), %v476_v53  ;;  %vm356_vm1 = vcmp.lt.s32.totalorder (!%p207_p7), %v276_v5, 256 }
  0x18   : > { %v278_v16 = vsub.s32 (!%p207_p7), 0, %v277_v11  ;;  %v282_v17 = vsub.s32 (!%p207_p7), 1, %v277_v11  ;;  %v341_v55 = vunpack.c.0.s8 (!%p207_p7), %v340_v54 }
  0x1a   : > { %p242_p9 = scmp.lt.s32.totalorder (!%p207_p7), %s241_s8, 7  ;;  %v293_v29 = vrot.slane (!%p207_p7), %v288_v21, %v278_v16  ;;  %v297_v30 = vrot.slane (!%p207_p7), %v288_v21, %v282_v17  ;;  %v307_v33 = vrot.slane (!%p207_p7), %v302_v26, %v278_v16  ;;  %v311_v34 = vrot.slane (!%p207_p7), %v302_v26, %v282_v17 }
  0x1b   : > { %v344_v57 = vsub.s32 (!%p207_p7), %v341_v55, %v277_v11 }
  0x1c   : > { %s523_s27 = scalar_select %p237_p8, %s424_s0, 7 }
  0x1d   : > { %s562_s8 = smov (!%p242_p9, %s241_s8), 7 }
  0x1e   : > { %s429_s28 = sshll.u32 %s523_s27, 3  ;;  %s430_s11 = sshll.u32 %s562_s8, 1 }
  0x1f   : > { %s240_s7 = scalar_lea.vmem %s555_s1, %s429_s28  ;;  %s245_s14 = scalar_lea.vmem %s557_s3, %s430_s11 }
  0x20   : > { %v251_v1 = vld [vmem:[%s240_s7] sm:$0xff]  ;;  %s431_s19 = sshll.u32 %s523_s27, 1 }
  0x21   : > { %257 = vperm.xlu0 %445, %v251_v1   ;;  %v274_v18 = vld [vmem:[%s245_s14] sm:$0x3]  ;;  %s250_s22 = scalar_lea.vmem %s560_s6, %s431_s19 }
  0x22   : > { %v279_v24 = vrot.slane %v274_v18, %v278_v16  ;;  %v283_v25 = vrot.slane %v274_v18, %v282_v17 }
  0xa0   : > { %v258_v6 = vpop.permute.xlu0 %257 }
  0xa1   : > { %v260_v7 = vmul.f32 %v258_v6, %v253_v3  ;;  %v261_v8 = vmul.f32 %v258_v6, %v254_v4 }
  0xa3   : > { %v262_v9 = vrot.slane %v260_v7, 4  ;;  %v268_v10 = vrot.slane %v261_v8, 4 }
  0xa5   : > { %v263_v12 = vadd.f32 %v262_v9, %v260_v7  ;;  %v269_v13 = vadd.f32 %v268_v10, %v261_v8 }
  0xa7   : > { %v264_v14 = vrot.slane %v263_v12, 2  ;;  %v270_v15 = vrot.slane %v269_v13, 2 }
  0xa9   : > { %v265_v19 = vadd.f32 %v264_v14, %v263_v12  ;;  %v271_v20 = vadd.f32 %v270_v15, %v269_v13 }
  0xab   : > { %v266_v22 = vrot.slane %v265_v19, 1  ;;  %v272_v23 = vrot.slane %v271_v20, 1 }
  0xad   : > { %v267_v27 = vadd.f32 %v266_v22, %v265_v19  ;;  %v273_v28 = vadd.f32 %v272_v23, %v271_v20 }
  0xaf   : > { %v286_v31 = vadd.f32 %v279_v24, %v267_v27  ;;  %v287_v32 = vadd.f32 %v283_v25, %v273_v28 }
  0xb1   : > { %v300_v35 = vmul.f32 %v293_v29, %v286_v31  ;;  %v301_v36 = vmul.f32 %v297_v30, %v287_v32 }
  0xb3   : > { %v314_v37 = vadd.f32 %v307_v33, %v300_v35  ;;  %v315_v38 = vadd.f32 %v311_v34, %v301_v36 }
  0xb5   : > { %v317_v39 = vsel %vm316_vm0, %v314_v37, -inf  ;;  %v318_v40 = vsel %vm316_vm0, %v315_v38, -inf }
  0xb6   : > { %v319_v41 = vmax.f32 %v317_v39, %v318_v40 }
  0xb8   : > { %320 = vmax.xlane.f32.xlu0 %v319_v41 }
 0x145   : > { %v321_v42 = vpop.xlane.xlu0 %320 }
 0x146   : > { %v322_v43 = vsub.f32 %v314_v37, %v321_v42  ;;  %v323_v44 = vsub.f32 %v315_v38, %v321_v42 }
 0x148   : > { %v324_v45 = vmul.f32 1.442695, %v322_v43  ;;  %v326_v46 = vmul.f32 1.442695, %v323_v44 }
 0x14a   : > { %446 = vpow2.f32 %v324_v45 }
 0x14b   : > { %448 = vpow2.f32 %v326_v46 }
 0x154   : > { %v447_v47 = vpop.eup %446 }
 0x155   : > { %v449_v48 = vpop.eup %448  ;;  %v328_v49 = vsel %vm316_vm0, %v447_v47, 0.0 }
 0x156   : > { %v329_v50 = vsel %vm316_vm0, %v449_v48, 0.0 }
 0x157   : > { %v330_v51 = vadd.f32 %v329_v50, %v328_v49 }
 0x159   : > { %331 = vadd.xlane.f32.xlu1 %v330_v51 }
 0x1e6   : > { %v332_v52 = vpop.xlane.xlu1 %331 }
 0x1e7   : > { %450 = vrcp.f32 %v332_v52 }
 0x1f1   : > { %v451_v56 = vpop.eup %450 }
 0x1f2   : > { %v334_v58 = vmul.f32 %v451_v56, %v447_v47  ;;  %v335_v59 = vmul.f32 %v451_v56, %v449_v48 }
 0x1f4   : > { %v338_v60 = vcombine.low %v334_v58, %v335_v59 }
 0x1f6   : > { %v345_v61 = vrot.slane %v338_v60, %v344_v57 }
 0x1f8   : > { %v352_v62 = vrot.slane %v345_v61, %v344_v57 }
 0x1fa   : > { %358 = vst.msk [vmem:[%s250_s22] sm:$0x3] %vm356_vm1, %v352_v62 }
 0x1fb PF: > { %s22_s26 = sadd.s32 1, %s472_s26  }
 0x1fc   : > { %p19_p10 = scmp.ge.s32.totalorder %s22_s26, 10  }
 0x1fe   :  { %21 = sbr.rel (!%p19_p10) target bundleno = 16 (0x10), region = 73 }

</bundles_post_ra>
